<compile_context>
chip_gen: v5e
topology: v5e:2x2
jax: 0.10.0
libtpu: 0.0.40
codegen_flags: <defaults>
</compile_context>

<pallas_src>
import jax
import jax.numpy as jnp
from jax import lax
from jax.experimental import pallas as pl
from jax.experimental.pallas import tpu as pltpu


def _region_offsets(ns, nt):
    """Static lane offsets of the three packed fields inside one time-step region."""
    o_Q = 0                # Qaug: rows 0:nt+1, lanes [0, nt+1)
    o_V = nt + 1           # Vaug: rows 0:ns+1, lanes [nt+1, nt+ns+2)
    o_K = nt + ns + 2      # [K|k]: rows 0:nc,  lanes [nt+ns+2, nt+2ns+3)
    return o_Q, o_V, o_K


def _region_width(ns, nt):
    """Lanes per time-step region, rounded up to a full 128-lane tile (lane-dense output)."""
    used = nt + 2 * ns + 3
    return ((used + 127) // 128) * 128


def _dotT(a, b):
    """a^T @ b without materializing the transpose (contract axis 0 of both operands)."""
    return lax.dot_general(a, b, (((0,), (0,)), ((), ())),
                           preferred_element_type=jnp.float32)


def _dot(a, b):
    return jnp.dot(a, b, preferred_element_type=jnp.float32)


def _riccati_kernel(G_ref, Caug_ref, out_ref):
    # Block shapes: G (H,Bb,ns+1,nt+1), Caug (H,Bb,nt+1,nt+1), out (Bb, nt+1, (H+1)*CW)
    H, Bb = G_ref.shape[0], G_ref.shape[1]
    na = G_ref.shape[2]           # ns + 1
    nta = G_ref.shape[3]          # nt + 1
    ns = na - 1
    nt = nta - 1
    nc = nt - ns
    CW = out_ref.shape[2] // (H + 1)
    o_Q, o_V, o_K = _region_offsets(ns, nt)
    d = out_ref.dtype

    # Hoisted out of the loops (JAX does not CSE iota/broadcasts).
    row_ids = lax.broadcasted_iota(jnp.int32, (nc, 1), 0)

    # Terminal V_H = v_H = vc_H = 0: zero ONLY the Vaug lanes of region H.
    # Invariant: every other lane the wrapper reads is written in the t-loop below;
    # all remaining lanes of the slab are stale/undefined and must never be read.
    Hbase = H * CW
    for m in range(Bb):
        out_ref[m, 0:na, Hbase + o_V:Hbase + o_V + na] = jnp.zeros((na, na), d)

    # One augmented value-function carry per interleaved batch member (f32).
    # Vaug = [[V, v], [v^T, 2*vc]]
    M = [jnp.zeros((na, na), jnp.float32) for _ in range(Bb)]

    # Backward Riccati sweep.  Static unroll: H is small, and the unroll gives the LLO
    # scheduler full visibility for interleaving the Bb independent chains.
    # TODO(synk): for very large horizons switch to lax.fori_loop + VMEM scratch carry.
    for t in range(H - 1, -1, -1):
        base = t * CW
        for m in range(Bb):
            Gt = G_ref[t, m].astype(jnp.float32)      # (ns+1, nt+1)
            Ct = Caug_ref[t, m].astype(jnp.float32)   # (nt+1, nt+1)

            # ---- compute_Q / q / qc fused: Qaug = Caug + G^T Vaug G  (2 dots) ----
            Qaug = Ct + _dotT(Gt, _dot(M[m], Gt))     # (nt+1, nt+1), order [x | 1 | u]

            # ---- compute_K: unpivoted Gauss-Jordan on the u-rows of Qaug ----
            # aug = [Q_ux | q_u | Q_uu]; pivot for row i sits at lane ns+1+i.
            aug = Qaug[ns + 1:, :]                    # (nc, nt+1)
            for i in range(nc):
                col = ns + 1 + i
                piv = aug[i:i + 1, col:col + 1]       # (1, 1)
                r = pl.reciprocal(piv, approx=True)   # EUP vrcp (own VLIW slot)
                r = r * (2.0 - piv * r)               # one Newton step -> ~f32 accuracy
                row = aug[i:i + 1, :] * r
                fac = aug[:, col:col + 1]             # (nc, 1)
                aug = jnp.where(row_ids == i, row, aug - fac * row)
            S = -aug[:, :ns + 1]                      # [K | k]  (nc, ns+1), contiguous

            # ---- compute_V (shortcut): Vaug' = Qaug_xb,xb + Qaug_xb,u @ [K|k]  (1 dot) ----
            Mn = Qaug[:ns + 1, :ns + 1] + _dot(Qaug[:ns + 1, ns + 1:], S)
            M[m] = Mn

            # ---- packed lane-dense outputs: 3 stores per step per member ----
            out_ref[m, 0:nta, base + o_Q:base + o_Q + nta] = Qaug.astype(d)
            out_ref[m, 0:na, base + o_V:base + o_V + na] = Mn.astype(d)
            out_ref[m, 0:nc, base + o_K:base + o_K + na] = S.astype(d)


def _pick_block_b(batch, max_block=4):
    """Interleave up to `max_block` independent Riccati chains per grid step."""
    for bb in range(min(max_block, batch), 0, -1):
        if batch % bb == 0:
            return bb
    return 1


def lqr_control_pallas(F, f, C, c, *, n_state, block_b=None):
    """Pallas equivalent of NamedLQRControl.forward (named-tensor refinement is a no-op)."""
    H, B = F.shape[0], F.shape[1]
    ns = n_state
    nt = C.shape[-1]
    nc = nt - ns
    dt = F.dtype
    o_Q, o_V, o_K = _region_offsets(ns, nt)
    CW = _region_width(ns, nt)
    W = (H + 1) * CW

    # Batch blocking: interleaving >1 chain is the main win on single-TC v5e/v6e.
    # On v7x prefer a block_b that keeps (B // block_b) a multiple of 2 (pass explicitly).
    Bb = _pick_block_b(B) if block_b is None else block_b
    assert B % Bb == 0, (B, Bb)

    # ---- wrapper-side layout plumbing: build the augmented [x | 1 | u] system ----
    Fx, Fu = F[..., :ns], F[..., ns:]
    g_top = jnp.concatenate([Fx, f, Fu], axis=-1)                    # (H,B,ns,nt+1)
    g_bot = jnp.zeros(g_top[..., :1, :].shape, dt).at[..., ns].set(1)
    G = jnp.concatenate([g_top, g_bot], axis=-2)                     # (H,B,ns+1,nt+1)

    cT = jnp.swapaxes(c, -2, -1)                                     # (H,B,1,nt)
    rows_x = jnp.concatenate([C[..., :ns, :ns], c[..., :ns, :], C[..., :ns, ns:]], axis=-1)
    row_b = jnp.concatenate([cT[..., :ns], jnp.zeros_like(cT[..., :1]), cT[..., ns:]], axis=-1)
    rows_u = jnp.concatenate([C[..., ns:, :ns], c[..., ns:, :], C[..., ns:, ns:]], axis=-1)
    Caug = jnp.concatenate([rows_x, row_b, rows_u], axis=-2)         # (H,B,nt+1,nt+1)

    in_specs = [
        pl.BlockSpec((H, Bb, ns + 1, nt + 1), lambda b: (0, b, 0, 0)),   # G
        pl.BlockSpec((H, Bb, nt + 1, nt + 1), lambda b: (0, b, 0, 0)),   # Caug
    ]
    out_specs = pl.BlockSpec((Bb, nt + 1, W), lambda b: (b, 0, 0))
    out_shape = jax.ShapeDtypeStruct((B, nt + 1, W), dt)

    slab = pl.pallas_call(
        _riccati_kernel,
        out_shape=out_shape,
        grid_spec=pltpu.PrefetchScalarGridSpec(
            num_scalar_prefetch=0,
            grid=(B // Bb,),
            in_specs=in_specs,
            out_specs=out_specs,
        ),
        compiler_params=pltpu.CompilerParams(dimension_semantics=("parallel",)),
    )(G, Caug)

    # ---- unpack: pure layout plumbing (reshape + transpose + static slices/gathers) ----
    slab = slab.reshape(B, nt + 1, H + 1, CW)
    slab = jnp.transpose(slab, (2, 0, 1, 3))                         # (H+1, B, nt+1, CW)

    qslab = slab[:H, :, :, o_Q:o_Q + nt + 1]                         # (H,B,nt+1,nt+1)
    vslab = slab[:, :, :ns + 1, o_V:o_V + ns + 1]                    # (H+1,B,ns+1,ns+1)
    kslab = slab[:H, :, :nc, o_K:o_K + ns + 1]                       # (H,B,nc,ns+1)

    tau = jnp.array(list(range(ns)) + list(range(ns + 1, nt + 1)))   # drop the bias index
    Q = jnp.take(jnp.take(qslab, tau, axis=2), tau, axis=3)          # (H,B,nt,nt)
    q = jnp.take(qslab[..., ns], tau, axis=2)[..., None]             # (H,B,nt,1)
    qc = qslab[..., ns:ns + 1, ns:ns + 1] * 0.5                      # (H,B,1,1)
    V = vslab[..., :ns, :ns]                                         # (H+1,B,ns,ns)
    v = vslab[..., :ns, ns:ns + 1]                                   # (H+1,B,ns,1)
    vc = vslab[..., ns:ns + 1, ns:ns + 1] * 0.5                      # (H+1,B,1,1)
    K = kslab[..., :ns]                                              # (H,B,nc,ns)
    k = kslab[..., ns:ns + 1]                                        # (H,B,nc,1)
    return (K, k), (Q, q, qc), (V, v, vc)


def lqr_control_ref(F, f, C, c, n_state):
    """Pure-JAX reference mirroring the PyTorch LQRControl.forward."""
    H, B, ns = F.shape[0], F.shape[1], n_state
    T = lambda x: jnp.swapaxes(x, -2, -1)
    V = jnp.zeros((B, ns, ns), F.dtype)
    v = jnp.zeros((B, ns, 1), F.dtype)
    vc = jnp.zeros((B, 1, 1), F.dtype)
    Ks, ks = [], []
    Qs, qs, qcs = [], [], []
    Vs, vs, vcs = [V], [v], [vc]
    for t in range(H - 1, -1, -1):
        Ft, ft, Ct, ct = F[t], f[t], C[t], c[t]
        FT = T(Ft)
        FV = FT @ V
        Q = Ct + FV @ Ft
        q = ct + FV @ ft + FT @ v
        qc = T(ft) @ V @ ft / 2 + T(ft) @ v + vc
        Q_uu = Q[..., ns:, ns:]
        Q_ux = Q[..., ns:, :ns]
        q_u = q[..., ns:, :]
        Q_xx = Q[..., :ns, :ns]
        Q_xu = Q[..., :ns, ns:]
        q_x = q[..., :ns, :]
        inv = jnp.linalg.inv(Q_uu)
        K = -inv @ Q_ux
        k = -inv @ q_u
        KT = T(K)
        KTQ = KT @ Q_uu
        V = Q_xx + Q_xu @ K + KT @ Q_ux + KTQ @ K
        v = Q_xu @ k + KTQ @ k + q_x + KT @ q_u
        vc = T(k) @ Q_uu @ k / 2 + T(k) @ q_u + qc
        Ks.insert(0, K); ks.insert(0, k)
        Qs.insert(0, Q); qs.insert(0, q); qcs.insert(0, qc)
        Vs.insert(0, V); vs.insert(0, v); vcs.insert(0, vc)
    return ((jnp.stack(Ks), jnp.stack(ks)),
            (jnp.stack(Qs), jnp.stack(qs), jnp.stack(qcs)),
            (jnp.stack(Vs), jnp.stack(vs), jnp.stack(vcs)))


if __name__ == "__main__":
    # NamedLQRControl(n_state=8, n_ctrl=4, horizon=6), batch=2
    n_state, n_ctrl, horizon, batch = 8, 4, 6, 2
    n_tau = n_state + n_ctrl

    key = jax.random.PRNGKey(0)
    kF, kf, kC, kc = jax.random.split(key, 4)
    F = 0.1 * jax.random.normal(kF, (horizon, batch, n_state, n_tau), jnp.float32)
    f = 0.1 * jax.random.normal(kf, (horizon, batch, n_state, 1), jnp.float32)
    R = jax.random.normal(kC, (horizon, batch, n_tau, n_tau), jnp.float32)
    # symmetric positive-definite cost so Q_uu is invertible (as the LQR solver assumes)
    C = R @ jnp.swapaxes(R, -2, -1) / n_tau + jnp.eye(n_tau, dtype=jnp.float32)
    c = 0.1 * jax.random.normal(kc, (horizon, batch, n_tau, 1), jnp.float32)

    run = jax.jit(lambda F_, f_, C_, c_: lqr_control_pallas(F_, f_, C_, c_, n_state=n_state))
    (K, k), (Q, q, qc), (V, v, vc) = run(F, f, C, c)
    jax.block_until_ready((K, k, Q, q, qc, V, v, vc))

    (Kr, kr), (Qr, qr, qcr), (Vr, vr, vcr) = lqr_control_ref(F, f, C, c, n_state)

    pairs = [(K, Kr), (k, kr), (Q, Qr), (q, qr), (qc, qcr), (V, Vr), (v, vr), (vc, vcr)]
    for got, want in pairs:
        assert got.shape == want.shape, (got.shape, want.shape)
        err = float(jnp.max(jnp.abs(got - want)))
        assert jnp.allclose(got, want, atol=1e-3, rtol=1e-3), err

    print("KERNEL_OK")
</pallas_src>

<mosaic_0001>
module attributes {stable_mosaic.version = 11 : i64} {
  func.func @_riccati_kernel(%arg0: i32, %arg1: memref<6x2x9x13xf32, #tpu.memory_space<vmem>>, %arg2: memref<6x2x13x13xf32, #tpu.memory_space<vmem>>, %arg3: memref<2x13x896xf32, #tpu.memory_space<vmem>>) attributes {dimension_semantics = [#tpu.dimension_semantics<parallel>], iteration_bounds = array<i64: 1>, scalar_prefetch = 0 : i64, scratch_operands = 0 : i64, tpu.core_type = #tpu.core_type<tc>, window_params = [{transform_indices = @transform_0, window_bounds = array<i64: 6, 2, 9, 13>}, {transform_indices = @transform_1, window_bounds = array<i64: 6, 2, 13, 13>}, {transform_indices = @transform_2, window_bounds = array<i64: 2, 13, 896>}]} {
    %0 = tpu.iota {dimensions = array<i32: 0>} : vector<4x1xi32>
    %cst = arith.constant 0.000000e+00 : f32
    %1 = vector.broadcast %cst : f32 to vector<9x9xf32>
    %c0 = arith.constant 0 : index
    %c0_0 = arith.constant 0 : index
    %c781 = arith.constant 781 : index
    %2 = vector.load %arg3[%c0, %c0_0, %c781] : memref<2x13x896xf32, #tpu.memory_space<vmem>>, vector<1x9x9xf32>
    %3 = vector.shape_cast %2 : vector<1x9x9xf32> to vector<9x9xf32>
    %4 = vector.shape_cast %1 : vector<9x9xf32> to vector<1x9x9xf32>
    tpu.vector_store %arg3[%c0, %c0_0, %c781], %4 {strides = array<i32>} : memref<2x13x896xf32, #tpu.memory_space<vmem>>, vector<1x9x9xf32>,
    %cst_1 = arith.constant 0.000000e+00 : f32
    %5 = vector.broadcast %cst_1 : f32 to vector<9x9xf32>
    %c1 = arith.constant 1 : index
    %c0_2 = arith.constant 0 : index
    %c781_3 = arith.constant 781 : index
    %6 = vector.load %arg3[%c1, %c0_2, %c781_3] : memref<2x13x896xf32, #tpu.memory_space<vmem>>, vector<1x9x9xf32>
    %7 = vector.shape_cast %6 : vector<1x9x9xf32> to vector<9x9xf32>
    %8 = vector.shape_cast %5 : vector<9x9xf32> to vector<1x9x9xf32>
    tpu.vector_store %arg3[%c1, %c0_2, %c781_3], %8 {strides = array<i32>} : memref<2x13x896xf32, #tpu.memory_space<vmem>>, vector<1x9x9xf32>,
    %cst_4 = arith.constant 0.000000e+00 : f32
    %9 = vector.broadcast %cst_4 : f32 to vector<9x9xf32>
    %cst_5 = arith.constant 0.000000e+00 : f32
    %10 = vector.broadcast %cst_5 : f32 to vector<9x9xf32>
    %c5 = arith.constant 5 : index
    %c0_6 = arith.constant 0 : index
    %c0_7 = arith.constant 0 : index
    %c0_8 = arith.constant 0 : index
    %11 = vector.load %arg1[%c5, %c0_6, %c0_7, %c0_8] : memref<6x2x9x13xf32, #tpu.memory_space<vmem>>, vector<1x1x9x13xf32>
    %12 = vector.shape_cast %11 : vector<1x1x9x13xf32> to vector<9x13xf32>
    %c5_9 = arith.constant 5 : index
    %c0_10 = arith.constant 0 : index
    %c0_11 = arith.constant 0 : index
    %c0_12 = arith.constant 0 : index
    %13 = vector.load %arg2[%c5_9, %c0_10, %c0_11, %c0_12] : memref<6x2x13x13xf32, #tpu.memory_space<vmem>>, vector<1x1x13x13xf32>
    %14 = vector.shape_cast %13 : vector<1x1x13x13xf32> to vector<13x13xf32>
    %cst_13 = arith.constant dense<0.000000e+00> : vector<9x13xf32>
    %15 = tpu.matmul %9, %12, %cst_13 {dimension_numbers = #tpu.dot_dimension_numbers<[1], [0], [0], [1], [0, 0, 1, 1], [], []>} : vector<9x9xf32>, vector<9x13xf32>, vector<9x13xf32> -> vector<9x13xf32>
    %cst_14 = arith.constant dense<0.000000e+00> : vector<13x13xf32>
    %16 = tpu.matmul %12, %15, %cst_14 {dimension_numbers = #tpu.dot_dimension_numbers<[0], [0], [1], [1], [0, 1, 1, 1], [], []>} : vector<9x13xf32>, vector<9x13xf32>, vector<13x13xf32> -> vector<13x13xf32>
    %17 = arith.addf %14, %16 : vector<13x13xf32>
    %18 = vector.extract_strided_slice %17 {offsets = [9, 0], sizes = [4, 13], strides = [1, 1]} : vector<13x13xf32> to vector<4x13xf32>
    %19 = vector.extract_strided_slice %18 {offsets = [0, 9], sizes = [1, 1], strides = [1, 1]} : vector<4x13xf32> to vector<1x1xf32>
    %20 = tpu.reciprocal %19 {approx = true} : vector<1x1xf32> -> vector<1x1xf32>
    %21 = arith.mulf %19, %20 : vector<1x1xf32>
    %cst_15 = arith.constant 2.000000e+00 : f32
    %22 = vector.broadcast %cst_15 : f32 to vector<1x1xf32>
    %23 = arith.subf %22, %21 : vector<1x1xf32>
    %24 = arith.mulf %20, %23 : vector<1x1xf32>
    %25 = vector.extract_strided_slice %18 {offsets = [0, 0], sizes = [1, 13], strides = [1, 1]} : vector<4x13xf32> to vector<1x13xf32>
    %26 = vector.broadcast %24 : vector<1x1xf32> to vector<1x13xf32>
    %27 = arith.mulf %25, %26 : vector<1x13xf32>
    %28 = vector.extract_strided_slice %18 {offsets = [0, 9], sizes = [4, 1], strides = [1, 1]} : vector<4x13xf32> to vector<4x1xf32>
    %c0_i32 = arith.constant 0 : i32
    %29 = vector.broadcast %c0_i32 : i32 to vector<4x1xi32>
    %30 = arith.cmpi eq, %0, %29 : vector<4x1xi32>
    %31 = vector.broadcast %28 : vector<4x1xf32> to vector<4x13xf32>
    %32 = vector.broadcast %27 : vector<1x13xf32> to vector<4x13xf32>
    %33 = arith.mulf %31, %32 : vector<4x13xf32>
    %34 = arith.subf %18, %33 : vector<4x13xf32>
    %35 = vector.shape_cast %30 : vector<4x1xi1> to vector<4x1xi1>
    %36 = vector.broadcast %35 : vector<4x1xi1> to vector<4x13xi1>
    %37 = vector.shape_cast %27 : vector<1x13xf32> to vector<1x13xf32>
    %38 = vector.broadcast %37 : vector<1x13xf32> to vector<4x13xf32>
    %39 = arith.select %36, %38, %34 : vector<4x13xi1>, vector<4x13xf32>
    %40 = vector.extract_strided_slice %39 {offsets = [1, 10], sizes = [1, 1], strides = [1, 1]} : vector<4x13xf32> to vector<1x1xf32>
    %41 = tpu.reciprocal %40 {approx = true} : vector<1x1xf32> -> vector<1x1xf32>
    %42 = arith.mulf %40, %41 : vector<1x1xf32>
    %cst_16 = arith.constant 2.000000e+00 : f32
    %43 = vector.broadcast %cst_16 : f32 to vector<1x1xf32>
    %44 = arith.subf %43, %42 : vector<1x1xf32>
    %45 = arith.mulf %41, %44 : vector<1x1xf32>
    %46 = vector.extract_strided_slice %39 {offsets = [1, 0], sizes = [1, 13], strides = [1, 1]} : vector<4x13xf32> to vector<1x13xf32>
    %47 = vector.broadcast %45 : vector<1x1xf32> to vector<1x13xf32>
    %48 = arith.mulf %46, %47 : vector<1x13xf32>
    %49 = vector.extract_strided_slice %39 {offsets = [0, 10], sizes = [4, 1], strides = [1, 1]} : vector<4x13xf32> to vector<4x1xf32>
    %c1_i32 = arith.constant 1 : i32
    %50 = vector.broadcast %c1_i32 : i32 to vector<4x1xi32>
    %51 = arith.cmpi eq, %0, %50 : vector<4x1xi32>
    %52 = vector.broadcast %49 : vector<4x1xf32> to vector<4x13xf32>
    %53 = vector.broadcast %48 : vector<1x13xf32> to vector<4x13xf32>
    %54 = arith.mulf %52, %53 : vector<4x13xf32>
    %55 = arith.subf %39, %54 : vector<4x13xf32>
    %56 = vector.shape_cast %51 : vector<4x1xi1> to vector<4x1xi1>
    %57 = vector.broadcast %56 : vector<4x1xi1> to vector<4x13xi1>
    %58 = vector.shape_cast %48 : vector<1x13xf32> to vector<1x13xf32>
    %59 = vector.broadcast %58 : vector<1x13xf32> to vector<4x13xf32>
    %60 = arith.select %57, %59, %55 : vector<4x13xi1>, vector<4x13xf32>
    %61 = vector.extract_strided_slice %60 {offsets = [2, 11], sizes = [1, 1], strides = [1, 1]} : vector<4x13xf32> to vector<1x1xf32>
    %62 = tpu.reciprocal %61 {approx = true} : vector<1x1xf32> -> vector<1x1xf32>
    %63 = arith.mulf %61, %62 : vector<1x1xf32>
    %cst_17 = arith.constant 2.000000e+00 : f32
    %64 = vector.broadcast %cst_17 : f32 to vector<1x1xf32>
    %65 = arith.subf %64, %63 : vector<1x1xf32>
    %66 = arith.mulf %62, %65 : vector<1x1xf32>
    %67 = vector.extract_strided_slice %60 {offsets = [2, 0], sizes = [1, 13], strides = [1, 1]} : vector<4x13xf32> to vector<1x13xf32>
    %68 = vector.broadcast %66 : vector<1x1xf32> to vector<1x13xf32>
    %69 = arith.mulf %67, %68 : vector<1x13xf32>
    %70 = vector.extract_strided_slice %60 {offsets = [0, 11], sizes = [4, 1], strides = [1, 1]} : vector<4x13xf32> to vector<4x1xf32>
    %c2_i32 = arith.constant 2 : i32
    %71 = vector.broadcast %c2_i32 : i32 to vector<4x1xi32>
    %72 = arith.cmpi eq, %0, %71 : vector<4x1xi32>
    %73 = vector.broadcast %70 : vector<4x1xf32> to vector<4x13xf32>
    %74 = vector.broadcast %69 : vector<1x13xf32> to vector<4x13xf32>
    %75 = arith.mulf %73, %74 : vector<4x13xf32>
    %76 = arith.subf %60, %75 : vector<4x13xf32>
    %77 = vector.shape_cast %72 : vector<4x1xi1> to vector<4x1xi1>
    %78 = vector.broadcast %77 : vector<4x1xi1> to vector<4x13xi1>
    %79 = vector.shape_cast %69 : vector<1x13xf32> to vector<1x13xf32>
    %80 = vector.broadcast %79 : vector<1x13xf32> to vector<4x13xf32>
    %81 = arith.select %78, %80, %76 : vector<4x13xi1>, vector<4x13xf32>
    %82 = vector.extract_strided_slice %81 {offsets = [3, 12], sizes = [1, 1], strides = [1, 1]} : vector<4x13xf32> to vector<1x1xf32>
    %83 = tpu.reciprocal %82 {approx = true} : vector<1x1xf32> -> vector<1x1xf32>
    %84 = arith.mulf %82, %83 : vector<1x1xf32>
    %cst_18 = arith.constant 2.000000e+00 : f32
    %85 = vector.broadcast %cst_18 : f32 to vector<1x1xf32>
    %86 = arith.subf %85, %84 : vector<1x1xf32>
    %87 = arith.mulf %83, %86 : vector<1x1xf32>
    %88 = vector.extract_strided_slice %81 {offsets = [3, 0], sizes = [1, 13], strides = [1, 1]} : vector<4x13xf32> to vector<1x13xf32>
    %89 = vector.broadcast %87 : vector<1x1xf32> to vector<1x13xf32>
    %90 = arith.mulf %88, %89 : vector<1x13xf32>
    %91 = vector.extract_strided_slice %81 {offsets = [0, 12], sizes = [4, 1], strides = [1, 1]} : vector<4x13xf32> to vector<4x1xf32>
    %c3_i32 = arith.constant 3 : i32
    %92 = vector.broadcast %c3_i32 : i32 to vector<4x1xi32>
    %93 = arith.cmpi eq, %0, %92 : vector<4x1xi32>
    %94 = vector.broadcast %91 : vector<4x1xf32> to vector<4x13xf32>
    %95 = vector.broadcast %90 : vector<1x13xf32> to vector<4x13xf32>
    %96 = arith.mulf %94, %95 : vector<4x13xf32>
    %97 = arith.subf %81, %96 : vector<4x13xf32>
    %98 = vector.shape_cast %93 : vector<4x1xi1> to vector<4x1xi1>
    %99 = vector.broadcast %98 : vector<4x1xi1> to vector<4x13xi1>
    %100 = vector.shape_cast %90 : vector<1x13xf32> to vector<1x13xf32>
    %101 = vector.broadcast %100 : vector<1x13xf32> to vector<4x13xf32>
    %102 = arith.select %99, %101, %97 : vector<4x13xi1>, vector<4x13xf32>
    %103 = vector.extract_strided_slice %102 {offsets = [0, 0], sizes = [4, 9], strides = [1, 1]} : vector<4x13xf32> to vector<4x9xf32>
    %cst_19 = arith.constant 0.000000e+00 : f32
    %104 = vector.broadcast %cst_19 : f32 to vector<4x9xf32>
    %105 = arith.subf %104, %103 : vector<4x9xf32>
    %106 = vector.extract_strided_slice %17 {offsets = [0, 0], sizes = [9, 9], strides = [1, 1]} : vector<13x13xf32> to vector<9x9xf32>
    %107 = vector.extract_strided_slice %17 {offsets = [0, 9], sizes = [9, 4], strides = [1, 1]} : vector<13x13xf32> to vector<9x4xf32>
    %cst_20 = arith.constant dense<0.000000e+00> : vector<9x9xf32>
    %108 = tpu.matmul %107, %105, %cst_20 {dimension_numbers = #tpu.dot_dimension_numbers<[1], [0], [0], [1], [0, 0, 1, 1], [], []>} : vector<9x4xf32>, vector<4x9xf32>, vector<9x9xf32> -> vector<9x9xf32>
    %109 = arith.addf %106, %108 : vector<9x9xf32>
    %c0_21 = arith.constant 0 : index
    %c0_22 = arith.constant 0 : index
    %c640 = arith.constant 640 : index
    %110 = vector.load %arg3[%c0_21, %c0_22, %c640] : memref<2x13x896xf32, #tpu.memory_space<vmem>>, vector<1x13x13xf32>
    %111 = vector.shape_cast %110 : vector<1x13x13xf32> to vector<13x13xf32>
    %112 = vector.shape_cast %17 : vector<13x13xf32> to vector<1x13x13xf32>
    tpu.vector_store %arg3[%c0_21, %c0_22, %c640], %112 {strides = array<i32>} : memref<2x13x896xf32, #tpu.memory_space<vmem>>, vector<1x13x13xf32>,
    %c0_23 = arith.constant 0 : index
    %c0_24 = arith.constant 0 : index
    %c653 = arith.constant 653 : index
    %113 = vector.load %arg3[%c0_23, %c0_24, %c653] : memref<2x13x896xf32, #tpu.memory_space<vmem>>, vector<1x9x9xf32>
    %114 = vector.shape_cast %113 : vector<1x9x9xf32> to vector<9x9xf32>
    %115 = vector.shape_cast %109 : vector<9x9xf32> to vector<1x9x9xf32>
    tpu.vector_store %arg3[%c0_23, %c0_24, %c653], %115 {strides = array<i32>} : memref<2x13x896xf32, #tpu.memory_space<vmem>>, vector<1x9x9xf32>,
    %c0_25 = arith.constant 0 : index
    %c0_26 = arith.constant 0 : index
    %c662 = arith.constant 662 : index
    %116 = vector.load %arg3[%c0_25, %c0_26, %c662] : memref<2x13x896xf32, #tpu.memory_space<vmem>>, vector<1x4x9xf32>
    %117 = vector.shape_cast %116 : vector<1x4x9xf32> to vector<4x9xf32>
    %118 = vector.shape_cast %105 : vector<4x9xf32> to vector<1x4x9xf32>
    tpu.vector_store %arg3[%c0_25, %c0_26, %c662], %118 {strides = array<i32>} : memref<2x13x896xf32, #tpu.memory_space<vmem>>, vector<1x4x9xf32>,
    %c5_27 = arith.constant 5 : index
    %c1_28 = arith.constant 1 : index
    %c0_29 = arith.constant 0 : index
    %c0_30 = arith.constant 0 : index
    %119 = vector.load %arg1[%c5_27, %c1_28, %c0_29, %c0_30] : memref<6x2x9x13xf32, #tpu.memory_space<vmem>>, vector<1x1x9x13xf32>
    %120 = vector.shape_cast %119 : vector<1x1x9x13xf32> to vector<9x13xf32>
    %c5_31 = arith.constant 5 : index
    %c1_32 = arith.constant 1 : index
    %c0_33 = arith.constant 0 : index
    %c0_34 = arith.constant 0 : index
    %121 = vector.load %arg2[%c5_31, %c1_32, %c0_33, %c0_34] : memref<6x2x13x13xf32, #tpu.memory_space<vmem>>, vector<1x1x13x13xf32>
    %122 = vector.shape_cast %121 : vector<1x1x13x13xf32> to vector<13x13xf32>
    %cst_35 = arith.constant dense<0.000000e+00> : vector<9x13xf32>
    %123 = tpu.matmul %10, %120, %cst_35 {dimension_numbers = #tpu.dot_dimension_numbers<[1], [0], [0], [1], [0, 0, 1, 1], [], []>} : vector<9x9xf32>, vector<9x13xf32>, vector<9x13xf32> -> vector<9x13xf32>
    %cst_36 = arith.constant dense<0.000000e+00> : vector<13x13xf32>
    %124 = tpu.matmul %120, %123, %cst_36 {dimension_numbers = #tpu.dot_dimension_numbers<[0], [0], [1], [1], [0, 1, 1, 1], [], []>} : vector<9x13xf32>, vector<9x13xf32>, vector<13x13xf32> -> vector<13x13xf32>
    %125 = arith.addf %122, %124 : vector<13x13xf32>
    %126 = vector.extract_strided_slice %125 {offsets = [9, 0], sizes = [4, 13], strides = [1, 1]} : vector<13x13xf32> to vector<4x13xf32>
    %127 = vector.extract_strided_slice %126 {offsets = [0, 9], sizes = [1, 1], strides = [1, 1]} : vector<4x13xf32> to vector<1x1xf32>
    %128 = tpu.reciprocal %127 {approx = true} : vector<1x1xf32> -> vector<1x1xf32>
    %129 = arith.mulf %127, %128 : vector<1x1xf32>
    %cst_37 = arith.constant 2.000000e+00 : f32
    %130 = vector.broadcast %cst_37 : f32 to vector<1x1xf32>
    %131 = arith.subf %130, %129 : vector<1x1xf32>
    %132 = arith.mulf %128, %131 : vector<1x1xf32>
    %133 = vector.extract_strided_slice %126 {offsets = [0, 0], sizes = [1, 13], strides = [1, 1]} : vector<4x13xf32> to vector<1x13xf32>
    %134 = vector.broadcast %132 : vector<1x1xf32> to vector<1x13xf32>
    %135 = arith.mulf %133, %134 : vector<1x13xf32>
    %136 = vector.extract_strided_slice %126 {offsets = [0, 9], sizes = [4, 1], strides = [1, 1]} : vector<4x13xf32> to vector<4x1xf32>
    %c0_i32_38 = arith.constant 0 : i32
    %137 = vector.broadcast %c0_i32_38 : i32 to vector<4x1xi32>
    %138 = arith.cmpi eq, %0, %137 : vector<4x1xi32>
    %139 = vector.broadcast %136 : vector<4x1xf32> to vector<4x13xf32>
    %140 = vector.broadcast %135 : vector<1x13xf32> to vector<4x13xf32>
    %141 = arith.mulf %139, %140 : vector<4x13xf32>
    %142 = arith.subf %126, %141 : vector<4x13xf32>
    %143 = vector.shape_cast %138 : vector<4x1xi1> to vector<4x1xi1>
    %144 = vector.broadcast %143 : vector<4x1xi1> to vector<4x13xi1>
    %145 = vector.shape_cast %135 : vector<1x13xf32> to vector<1x13xf32>
    %146 = vector.broadcast %145 : vector<1x13xf32> to vector<4x13xf32>
    %147 = arith.select %144, %146, %142 : vector<4x13xi1>, vector<4x13xf32>
    %148 = vector.extract_strided_slice %147 {offsets = [1, 10], sizes = [1, 1], strides = [1, 1]} : vector<4x13xf32> to vector<1x1xf32>
    %149 = tpu.reciprocal %148 {approx = true} : vector<1x1xf32> -> vector<1x1xf32>
    %150 = arith.mulf %148, %149 : vector<1x1xf32>
    %cst_39 = arith.constant 2.000000e+00 : f32
    %151 = vector.broadcast %cst_39 : f32 to vector<1x1xf32>
    %152 = arith.subf %151, %150 : vector<1x1xf32>
    %153 = arith.mulf %149, %152 : vector<1x1xf32>
    %154 = vector.extract_strided_slice %147 {offsets = [1, 0], sizes = [1, 13], strides = [1, 1]} : vector<4x13xf32> to vector<1x13xf32>
    %155 = vector.broadcast %153 : vector<1x1xf32> to vector<1x13xf32>
    %156 = arith.mulf %154, %155 : vector<1x13xf32>
    %157 = vector.extract_strided_slice %147 {offsets = [0, 10], sizes = [4, 1], strides = [1, 1]} : vector<4x13xf32> to vector<4x1xf32>
    %c1_i32_40 = arith.constant 1 : i32
    %158 = vector.broadcast %c1_i32_40 : i32 to vector<4x1xi32>
    %159 = arith.cmpi eq, %0, %158 : vector<4x1xi32>
    %160 = vector.broadcast %157 : vector<4x1xf32> to vector<4x13xf32>
    %161 = vector.broadcast %156 : vector<1x13xf32> to vector<4x13xf32>
    %162 = arith.mulf %160, %161 : vector<4x13xf32>
    %163 = arith.subf %147, %162 : vector<4x13xf32>
    %164 = vector.shape_cast %159 : vector<4x1xi1> to vector<4x1xi1>
    %165 = vector.broadcast %164 : vector<4x1xi1> to vector<4x13xi1>
    %166 = vector.shape_cast %156 : vector<1x13xf32> to vector<1x13xf32>
    %167 = vector.broadcast %166 : vector<1x13xf32> to vector<4x13xf32>
    %168 = arith.select %165, %167, %163 : vector<4x13xi1>, vector<4x13xf32>
    %169 = vector.extract_strided_slice %168 {offsets = [2, 11], sizes = [1, 1], strides = [1, 1]} : vector<4x13xf32> to vector<1x1xf32>
    %170 = tpu.reciprocal %169 {approx = true} : vector<1x1xf32> -> vector<1x1xf32>
    %171 = arith.mulf %169, %170 : vector<1x1xf32>
    %cst_41 = arith.constant 2.000000e+00 : f32
    %172 = vector.broadcast %cst_41 : f32 to vector<1x1xf32>
    %173 = arith.subf %172, %171 : vector<1x1xf32>
    %174 = arith.mulf %170, %173 : vector<1x1xf32>
    %175 = vector.extract_strided_slice %168 {offsets = [2, 0], sizes = [1, 13], strides = [1, 1]} : vector<4x13xf32> to vector<1x13xf32>
    %176 = vector.broadcast %174 : vector<1x1xf32> to vector<1x13xf32>
    %177 = arith.mulf %175, %176 : vector<1x13xf32>
    %178 = vector.extract_strided_slice %168 {offsets = [0, 11], sizes = [4, 1], strides = [1, 1]} : vector<4x13xf32> to vector<4x1xf32>
    %c2_i32_42 = arith.constant 2 : i32
    %179 = vector.broadcast %c2_i32_42 : i32 to vector<4x1xi32>
    %180 = arith.cmpi eq, %0, %179 : vector<4x1xi32>
    %181 = vector.broadcast %178 : vector<4x1xf32> to vector<4x13xf32>
    %182 = vector.broadcast %177 : vector<1x13xf32> to vector<4x13xf32>
    %183 = arith.mulf %181, %182 : vector<4x13xf32>
    %184 = arith.subf %168, %183 : vector<4x13xf32>
    %185 = vector.shape_cast %180 : vector<4x1xi1> to vector<4x1xi1>
    %186 = vector.broadcast %185 : vector<4x1xi1> to vector<4x13xi1>
    %187 = vector.shape_cast %177 : vector<1x13xf32> to vector<1x13xf32>
    %188 = vector.broadcast %187 : vector<1x13xf32> to vector<4x13xf32>
    %189 = arith.select %186, %188, %184 : vector<4x13xi1>, vector<4x13xf32>
    %190 = vector.extract_strided_slice %189 {offsets = [3, 12], sizes = [1, 1], strides = [1, 1]} : vector<4x13xf32> to vector<1x1xf32>
    %191 = tpu.reciprocal %190 {approx = true} : vector<1x1xf32> -> vector<1x1xf32>
    %192 = arith.mulf %190, %191 : vector<1x1xf32>
    %cst_43 = arith.constant 2.000000e+00 : f32
    %193 = vector.broadcast %cst_43 : f32 to vector<1x1xf32>
    %194 = arith.subf %193, %192 : vector<1x1xf32>
    %195 = arith.mulf %191, %194 : vector<1x1xf32>
    %196 = vector.extract_strided_slice %189 {offsets = [3, 0], sizes = [1, 13], strides = [1, 1]} : vector<4x13xf32> to vector<1x13xf32>
    %197 = vector.broadcast %195 : vector<1x1xf32> to vector<1x13xf32>
    %198 = arith.mulf %196, %197 : vector<1x13xf32>
    %199 = vector.extract_strided_slice %189 {offsets = [0, 12], sizes = [4, 1], strides = [1, 1]} : vector<4x13xf32> to vector<4x1xf32>
    %c3_i32_44 = arith.constant 3 : i32
    %200 = vector.broadcast %c3_i32_44 : i32 to vector<4x1xi32>
    %201 = arith.cmpi eq, %0, %200 : vector<4x1xi32>
    %202 = vector.broadcast %199 : vector<4x1xf32> to vector<4x13xf32>
    %203 = vector.broadcast %198 : vector<1x13xf32> to vector<4x13xf32>
    %204 = arith.mulf %202, %203 : vector<4x13xf32>
    %205 = arith.subf %189, %204 : vector<4x13xf32>
    %206 = vector.shape_cast %201 : vector<4x1xi1> to vector<4x1xi1>
    %207 = vector.broadcast %206 : vector<4x1xi1> to vector<4x13xi1>
    %208 = vector.shape_cast %198 : vector<1x13xf32> to vector<1x13xf32>
    %209 = vector.broadcast %208 : vector<1x13xf32> to vector<4x13xf32>
    %210 = arith.select %207, %209, %205 : vector<4x13xi1>, vector<4x13xf32>
    %211 = vector.extract_strided_slice %210 {offsets = [0, 0], sizes = [4, 9], strides = [1, 1]} : vector<4x13xf32> to vector<4x9xf32>
    %cst_45 = arith.constant 0.000000e+00 : f32
    %212 = vector.broadcast %cst_45 : f32 to vector<4x9xf32>
    %213 = arith.subf %212, %211 : vector<4x9xf32>
    %214 = vector.extract_strided_slice %125 {offsets = [0, 0], sizes = [9, 9], strides = [1, 1]} : vector<13x13xf32> to vector<9x9xf32>
    %215 = vector.extract_strided_slice %125 {offsets = [0, 9], sizes = [9, 4], strides = [1, 1]} : vector<13x13xf32> to vector<9x4xf32>
    %cst_46 = arith.constant dense<0.000000e+00> : vector<9x9xf32>
    %216 = tpu.matmul %215, %213, %cst_46 {dimension_numbers = #tpu.dot_dimension_numbers<[1], [0], [0], [1], [0, 0, 1, 1], [], []>} : vector<9x4xf32>, vector<4x9xf32>, vector<9x9xf32> -> vector<9x9xf32>
    %217 = arith.addf %214, %216 : vector<9x9xf32>
    %c1_47 = arith.constant 1 : index
    %c0_48 = arith.constant 0 : index
    %c640_49 = arith.constant 640 : index
    %218 = vector.load %arg3[%c1_47, %c0_48, %c640_49] : memref<2x13x896xf32, #tpu.memory_space<vmem>>, vector<1x13x13xf32>
    %219 = vector.shape_cast %218 : vector<1x13x13xf32> to vector<13x13xf32>
    %220 = vector.shape_cast %125 : vector<13x13xf32> to vector<1x13x13xf32>
    tpu.vector_store %arg3[%c1_47, %c0_48, %c640_49], %220 {strides = array<i32>} : memref<2x13x896xf32, #tpu.memory_space<vmem>>, vector<1x13x13xf32>,
    %c1_50 = arith.constant 1 : index
    %c0_51 = arith.constant 0 : index
    %c653_52 = arith.constant 653 : index
    %221 = vector.load %arg3[%c1_50, %c0_51, %c653_52] : memref<2x13x896xf32, #tpu.memory_space<vmem>>, vector<1x9x9xf32>
    %222 = vector.shape_cast %221 : vector<1x9x9xf32> to vector<9x9xf32>
    %223 = vector.shape_cast %217 : vector<9x9xf32> to vector<1x9x9xf32>
    tpu.vector_store %arg3[%c1_50, %c0_51, %c653_52], %223 {strides = array<i32>} : memref<2x13x896xf32, #tpu.memory_space<vmem>>, vector<1x9x9xf32>,
    %c1_53 = arith.constant 1 : index
    %c0_54 = arith.constant 0 : index
    %c662_55 = arith.constant 662 : index
    %224 = vector.load %arg3[%c1_53, %c0_54, %c662_55] : memref<2x13x896xf32, #tpu.memory_space<vmem>>, vector<1x4x9xf32>
    %225 = vector.shape_cast %224 : vector<1x4x9xf32> to vector<4x9xf32>
    %226 = vector.shape_cast %213 : vector<4x9xf32> to vector<1x4x9xf32>
    tpu.vector_store %arg3[%c1_53, %c0_54, %c662_55], %226 {strides = array<i32>} : memref<2x13x896xf32, #tpu.memory_space<vmem>>, vector<1x4x9xf32>,
    %c4 = arith.constant 4 : index
    %c0_56 = arith.constant 0 : index
    %c0_57 = arith.constant 0 : index
    %c0_58 = arith.constant 0 : index
    %227 = vector.load %arg1[%c4, %c0_56, %c0_57, %c0_58] : memref<6x2x9x13xf32, #tpu.memory_space<vmem>>, vector<1x1x9x13xf32>
    %228 = vector.shape_cast %227 : vector<1x1x9x13xf32> to vector<9x13xf32>
    %c4_59 = arith.constant 4 : index
    %c0_60 = arith.constant 0 : index
    %c0_61 = arith.constant 0 : index
    %c0_62 = arith.constant 0 : index
    %229 = vector.load %arg2[%c4_59, %c0_60, %c0_61, %c0_62] : memref<6x2x13x13xf32, #tpu.memory_space<vmem>>, vector<1x1x13x13xf32>
    %230 = vector.shape_cast %229 : vector<1x1x13x13xf32> to vector<13x13xf32>
    %cst_63 = arith.constant dense<0.000000e+00> : vector<9x13xf32>
    %231 = tpu.matmul %109, %228, %cst_63 {dimension_numbers = #tpu.dot_dimension_numbers<[1], [0], [0], [1], [0, 0, 1, 1], [], []>} : vector<9x9xf32>, vector<9x13xf32>, vector<9x13xf32> -> vector<9x13xf32>
    %cst_64 = arith.constant dense<0.000000e+00> : vector<13x13xf32>
    %232 = tpu.matmul %228, %231, %cst_64 {dimension_numbers = #tpu.dot_dimension_numbers<[0], [0], [1], [1], [0, 1, 1, 1], [], []>} : vector<9x13xf32>, vector<9x13xf32>, vector<13x13xf32> -> vector<13x13xf32>
    %233 = arith.addf %230, %232 : vector<13x13xf32>
    %234 = vector.extract_strided_slice %233 {offsets = [9, 0], sizes = [4, 13], strides = [1, 1]} : vector<13x13xf32> to vector<4x13xf32>
    %235 = vector.extract_strided_slice %234 {offsets = [0, 9], sizes = [1, 1], strides = [1, 1]} : vector<4x13xf32> to vector<1x1xf32>
    %236 = tpu.reciprocal %235 {approx = true} : vector<1x1xf32> -> vector<1x1xf32>
    %237 = arith.mulf %235, %236 : vector<1x1xf32>
    %cst_65 = arith.constant 2.000000e+00 : f32
    %238 = vector.broadcast %cst_65 : f32 to vector<1x1xf32>
    %239 = arith.subf %238, %237 : vector<1x1xf32>
    %240 = arith.mulf %236, %239 : vector<1x1xf32>
    %241 = vector.extract_strided_slice %234 {offsets = [0, 0], sizes = [1, 13], strides = [1, 1]} : vector<4x13xf32> to vector<1x13xf32>
    %242 = vector.broadcast %240 : vector<1x1xf32> to vector<1x13xf32>
    %243 = arith.mulf %241, %242 : vector<1x13xf32>
    %244 = vector.extract_strided_slice %234 {offsets = [0, 9], sizes = [4, 1], strides = [1, 1]} : vector<4x13xf32> to vector<4x1xf32>
    %c0_i32_66 = arith.constant 0 : i32
    %245 = vector.broadcast %c0_i32_66 : i32 to vector<4x1xi32>
    %246 = arith.cmpi eq, %0, %245 : vector<4x1xi32>
    %247 = vector.broadcast %244 : vector<4x1xf32> to vector<4x13xf32>
    %248 = vector.broadcast %243 : vector<1x13xf32> to vector<4x13xf32>
    %249 = arith.mulf %247, %248 : vector<4x13xf32>
    %250 = arith.subf %234, %249 : vector<4x13xf32>
    %251 = vector.shape_cast %246 : vector<4x1xi1> to vector<4x1xi1>
    %252 = vector.broadcast %251 : vector<4x1xi1> to vector<4x13xi1>
    %253 = vector.shape_cast %243 : vector<1x13xf32> to vector<1x13xf32>
    %254 = vector.broadcast %253 : vector<1x13xf32> to vector<4x13xf32>
    %255 = arith.select %252, %254, %250 : vector<4x13xi1>, vector<4x13xf32>
    %256 = vector.extract_strided_slice %255 {offsets = [1, 10], sizes = [1, 1], strides = [1, 1]} : vector<4x13xf32> to vector<1x1xf32>
    %257 = tpu.reciprocal %256 {approx = true} : vector<1x1xf32> -> vector<1x1xf32>
    %258 = arith.mulf %256, %257 : vector<1x1xf32>
    %cst_67 = arith.constant 2.000000e+00 : f32
    %259 = vector.broadcast %cst_67 : f32 to vector<1x1xf32>
    %260 = arith.subf %259, %258 : vector<1x1xf32>
    %261 = arith.mulf %257, %260 : vector<1x1xf32>
    %262 = vector.extract_strided_slice %255 {offsets = [1, 0], sizes = [1, 13], strides = [1, 1]} : vector<4x13xf32> to vector<1x13xf32>
    %263 = vector.broadcast %261 : vector<1x1xf32> to vector<1x13xf32>
    %264 = arith.mulf %262, %263 : vector<1x13xf32>
    %265 = vector.extract_strided_slice %255 {offsets = [0, 10], sizes = [4, 1], strides = [1, 1]} : vector<4x13xf32> to vector<4x1xf32>
    %c1_i32_68 = arith.constant 1 : i32
    %266 = vector.broadcast %c1_i32_68 : i32 to vector<4x1xi32>
    %267 = arith.cmpi eq, %0, %266 : vector<4x1xi32>
    %268 = vector.broadcast %265 : vector<4x1xf32> to vector<4x13xf32>
    %269 = vector.broadcast %264 : vector<1x13xf32> to vector<4x13xf32>
    %270 = arith.mulf %268, %269 : vector<4x13xf32>
    %271 = arith.subf %255, %270 : vector<4x13xf32>
    %272 = vector.shape_cast %267 : vector<4x1xi1> to vector<4x1xi1>
    %273 = vector.broadcast %272 : vector<4x1xi1> to vector<4x13xi1>
    %274 = vector.shape_cast %264 : vector<1x13xf32> to vector<1x13xf32>
    %275 = vector.broadcast %274 : vector<1x13xf32> to vector<4x13xf32>
    %276 = arith.select %273, %275, %271 : vector<4x13xi1>, vector<4x13xf32>
    %277 = vector.extract_strided_slice %276 {offsets = [2, 11], sizes = [1, 1], strides = [1, 1]} : vector<4x13xf32> to vector<1x1xf32>
    %278 = tpu.reciprocal %277 {approx = true} : vector<1x1xf32> -> vector<1x1xf32>
    %279 = arith.mulf %277, %278 : vector<1x1xf32>
    %cst_69 = arith.constant 2.000000e+00 : f32
    %280 = vector.broadcast %cst_69 : f32 to vector<1x1xf32>
    %281 = arith.subf %280, %279 : vector<1x1xf32>
    %282 = arith.mulf %278, %281 : vector<1x1xf32>
    %283 = vector.extract_strided_slice %276 {offsets = [2, 0], sizes = [1, 13], strides = [1, 1]} : vector<4x13xf32> to vector<1x13xf32>
    %284 = vector.broadcast %282 : vector<1x1xf32> to vector<1x13xf32>
    %285 = arith.mulf %283, %284 : vector<1x13xf32>
    %286 = vector.extract_strided_slice %276 {offsets = [0, 11], sizes = [4, 1], strides = [1, 1]} : vector<4x13xf32> to vector<4x1xf32>
    %c2_i32_70 = arith.constant 2 : i32
    %287 = vector.broadcast %c2_i32_70 : i32 to vector<4x1xi32>
    %288 = arith.cmpi eq, %0, %287 : vector<4x1xi32>
    %289 = vector.broadcast %286 : vector<4x1xf32> to vector<4x13xf32>
    %290 = vector.broadcast %285 : vector<1x13xf32> to vector<4x13xf32>
    %291 = arith.mulf %289, %290 : vector<4x13xf32>
    %292 = arith.subf %276, %291 : vector<4x13xf32>
    %293 = vector.shape_cast %288 : vector<4x1xi1> to vector<4x1xi1>
    %294 = vector.broadcast %293 : vector<4x1xi1> to vector<4x13xi1>
    %295 = vector.shape_cast %285 : vector<1x13xf32> to vector<1x13xf32>
    %296 = vector.broadcast %295 : vector<1x13xf32> to vector<4x13xf32>
    %297 = arith.select %294, %296, %292 : vector<4x13xi1>, vector<4x13xf32>
    %298 = vector.extract_strided_slice %297 {offsets = [3, 12], sizes = [1, 1], strides = [1, 1]} : vector<4x13xf32> to vector<1x1xf32>
    %299 = tpu.reciprocal %298 {approx = true} : vector<1x1xf32> -> vector<1x1xf32>
    %300 = arith.mulf %298, %299 : vector<1x1xf32>
    %cst_71 = arith.constant 2.000000e+00 : f32
    %301 = vector.broadcast %cst_71 : f32 to vector<1x1xf32>
    %302 = arith.subf %301, %300 : vector<1x1xf32>
    %303 = arith.mulf %299, %302 : vector<1x1xf32>
    %304 = vector.extract_strided_slice %297 {offsets = [3, 0], sizes = [1, 13], strides = [1, 1]} : vector<4x13xf32> to vector<1x13xf32>
    %305 = vector.broadcast %303 : vector<1x1xf32> to vector<1x13xf32>
    %306 = arith.mulf %304, %305 : vector<1x13xf32>
    %307 = vector.extract_strided_slice %297 {offsets = [0, 12], sizes = [4, 1], strides = [1, 1]} : vector<4x13xf32> to vector<4x1xf32>
    %c3_i32_72 = arith.constant 3 : i32
    %308 = vector.broadcast %c3_i32_72 : i32 to vector<4x1xi32>
    %309 = arith.cmpi eq, %0, %308 : vector<4x1xi32>
    %310 = vector.broadcast %307 : vector<4x1xf32> to vector<4x13xf32>
    %311 = vector.broadcast %306 : vector<1x13xf32> to vector<4x13xf32>
    %312 = arith.mulf %310, %311 : vector<4x13xf32>
    %313 = arith.subf %297, %312 : vector<4x13xf32>
    %314 = vector.shape_cast %309 : vector<4x1xi1> to vector<4x1xi1>
    %315 = vector.broadcast %314 : vector<4x1xi1> to vector<4x13xi1>
    %316 = vector.shape_cast %306 : vector<1x13xf32> to vector<1x13xf32>
    %317 = vector.broadcast %316 : vector<1x13xf32> to vector<4x13xf32>
    %318 = arith.select %315, %317, %313 : vector<4x13xi1>, vector<4x13xf32>
    %319 = vector.extract_strided_slice %318 {offsets = [0, 0], sizes = [4, 9], strides = [1, 1]} : vector<4x13xf32> to vector<4x9xf32>
    %cst_73 = arith.constant 0.000000e+00 : f32
    %320 = vector.broadcast %cst_73 : f32 to vector<4x9xf32>
    %321 = arith.subf %320, %319 : vector<4x9xf32>
    %322 = vector.extract_strided_slice %233 {offsets = [0, 0], sizes = [9, 9], strides = [1, 1]} : vector<13x13xf32> to vector<9x9xf32>
    %323 = vector.extract_strided_slice %233 {offsets = [0, 9], sizes = [9, 4], strides = [1, 1]} : vector<13x13xf32> to vector<9x4xf32>
    %cst_74 = arith.constant dense<0.000000e+00> : vector<9x9xf32>
    %324 = tpu.matmul %323, %321, %cst_74 {dimension_numbers = #tpu.dot_dimension_numbers<[1], [0], [0], [1], [0, 0, 1, 1], [], []>} : vector<9x4xf32>, vector<4x9xf32>, vector<9x9xf32> -> vector<9x9xf32>
    %325 = arith.addf %322, %324 : vector<9x9xf32>
    %c0_75 = arith.constant 0 : index
    %c0_76 = arith.constant 0 : index
    %c512 = arith.constant 512 : index
    %326 = vector.load %arg3[%c0_75, %c0_76, %c512] : memref<2x13x896xf32, #tpu.memory_space<vmem>>, vector<1x13x13xf32>
    %327 = vector.shape_cast %326 : vector<1x13x13xf32> to vector<13x13xf32>
    %328 = vector.shape_cast %233 : vector<13x13xf32> to vector<1x13x13xf32>
    tpu.vector_store %arg3[%c0_75, %c0_76, %c512], %328 {strides = array<i32>} : memref<2x13x896xf32, #tpu.memory_space<vmem>>, vector<1x13x13xf32>,
    %c0_77 = arith.constant 0 : index
    %c0_78 = arith.constant 0 : index
    %c525 = arith.constant 525 : index
    %329 = vector.load %arg3[%c0_77, %c0_78, %c525] : memref<2x13x896xf32, #tpu.memory_space<vmem>>, vector<1x9x9xf32>
    %330 = vector.shape_cast %329 : vector<1x9x9xf32> to vector<9x9xf32>
    %331 = vector.shape_cast %325 : vector<9x9xf32> to vector<1x9x9xf32>
    tpu.vector_store %arg3[%c0_77, %c0_78, %c525], %331 {strides = array<i32>} : memref<2x13x896xf32, #tpu.memory_space<vmem>>, vector<1x9x9xf32>,
    %c0_79 = arith.constant 0 : index
    %c0_80 = arith.constant 0 : index
    %c534 = arith.constant 534 : index
    %332 = vector.load %arg3[%c0_79, %c0_80, %c534] : memref<2x13x896xf32, #tpu.memory_space<vmem>>, vector<1x4x9xf32>
    %333 = vector.shape_cast %332 : vector<1x4x9xf32> to vector<4x9xf32>
    %334 = vector.shape_cast %321 : vector<4x9xf32> to vector<1x4x9xf32>
    tpu.vector_store %arg3[%c0_79, %c0_80, %c534], %334 {strides = array<i32>} : memref<2x13x896xf32, #tpu.memory_space<vmem>>, vector<1x4x9xf32>,
    %c4_81 = arith.constant 4 : index
    %c1_82 = arith.constant 1 : index
    %c0_83 = arith.constant 0 : index
    %c0_84 = arith.constant 0 : index
    %335 = vector.load %arg1[%c4_81, %c1_82, %c0_83, %c0_84] : memref<6x2x9x13xf32, #tpu.memory_space<vmem>>, vector<1x1x9x13xf32>
    %336 = vector.shape_cast %335 : vector<1x1x9x13xf32> to vector<9x13xf32>
    %c4_85 = arith.constant 4 : index
    %c1_86 = arith.constant 1 : index
    %c0_87 = arith.constant 0 : index
    %c0_88 = arith.constant 0 : index
    %337 = vector.load %arg2[%c4_85, %c1_86, %c0_87, %c0_88] : memref<6x2x13x13xf32, #tpu.memory_space<vmem>>, vector<1x1x13x13xf32>
    %338 = vector.shape_cast %337 : vector<1x1x13x13xf32> to vector<13x13xf32>
    %cst_89 = arith.constant dense<0.000000e+00> : vector<9x13xf32>
    %339 = tpu.matmul %217, %336, %cst_89 {dimension_numbers = #tpu.dot_dimension_numbers<[1], [0], [0], [1], [0, 0, 1, 1], [], []>} : vector<9x9xf32>, vector<9x13xf32>, vector<9x13xf32> -> vector<9x13xf32>
    %cst_90 = arith.constant dense<0.000000e+00> : vector<13x13xf32>
    %340 = tpu.matmul %336, %339, %cst_90 {dimension_numbers = #tpu.dot_dimension_numbers<[0], [0], [1], [1], [0, 1, 1, 1], [], []>} : vector<9x13xf32>, vector<9x13xf32>, vector<13x13xf32> -> vector<13x13xf32>
    %341 = arith.addf %338, %340 : vector<13x13xf32>
    %342 = vector.extract_strided_slice %341 {offsets = [9, 0], sizes = [4, 13], strides = [1, 1]} : vector<13x13xf32> to vector<4x13xf32>
    %343 = vector.extract_strided_slice %342 {offsets = [0, 9], sizes = [1, 1], strides = [1, 1]} : vector<4x13xf32> to vector<1x1xf32>
    %344 = tpu.reciprocal %343 {approx = true} : vector<1x1xf32> -> vector<1x1xf32>
    %345 = arith.mulf %343, %344 : vector<1x1xf32>
    %cst_91 = arith.constant 2.000000e+00 : f32
    %346 = vector.broadcast %cst_91 : f32 to vector<1x1xf32>
    %347 = arith.subf %346, %345 : vector<1x1xf32>
    %348 = arith.mulf %344, %347 : vector<1x1xf32>
    %349 = vector.extract_strided_slice %342 {offsets = [0, 0], sizes = [1, 13], strides = [1, 1]} : vector<4x13xf32> to vector<1x13xf32>
    %350 = vector.broadcast %348 : vector<1x1xf32> to vector<1x13xf32>
    %351 = arith.mulf %349, %350 : vector<1x13xf32>
    %352 = vector.extract_strided_slice %342 {offsets = [0, 9], sizes = [4, 1], strides = [1, 1]} : vector<4x13xf32> to vector<4x1xf32>
    %c0_i32_92 = arith.constant 0 : i32
    %353 = vector.broadcast %c0_i32_92 : i32 to vector<4x1xi32>
    %354 = arith.cmpi eq, %0, %353 : vector<4x1xi32>
    %355 = vector.broadcast %352 : vector<4x1xf32> to vector<4x13xf32>
    %356 = vector.broadcast %351 : vector<1x13xf32> to vector<4x13xf32>
    %357 = arith.mulf %355, %356 : vector<4x13xf32>
    %358 = arith.subf %342, %357 : vector<4x13xf32>
    %359 = vector.shape_cast %354 : vector<4x1xi1> to vector<4x1xi1>
    %360 = vector.broadcast %359 : vector<4x1xi1> to vector<4x13xi1>
    %361 = vector.shape_cast %351 : vector<1x13xf32> to vector<1x13xf32>
    %362 = vector.broadcast %361 : vector<1x13xf32> to vector<4x13xf32>
    %363 = arith.select %360, %362, %358 : vector<4x13xi1>, vector<4x13xf32>
    %364 = vector.extract_strided_slice %363 {offsets = [1, 10], sizes = [1, 1], strides = [1, 1]} : vector<4x13xf32> to vector<1x1xf32>
    %365 = tpu.reciprocal %364 {approx = true} : vector<1x1xf32> -> vector<1x1xf32>
    %366 = arith.mulf %364, %365 : vector<1x1xf32>
    %cst_93 = arith.constant 2.000000e+00 : f32
    %367 = vector.broadcast %cst_93 : f32 to vector<1x1xf32>
    %368 = arith.subf %367, %366 : vector<1x1xf32>
    %369 = arith.mulf %365, %368 : vector<1x1xf32>
    %370 = vector.extract_strided_slice %363 {offsets = [1, 0], sizes = [1, 13], strides = [1, 1]} : vector<4x13xf32> to vector<1x13xf32>
    %371 = vector.broadcast %369 : vector<1x1xf32> to vector<1x13xf32>
    %372 = arith.mulf %370, %371 : vector<1x13xf32>
    %373 = vector.extract_strided_slice %363 {offsets = [0, 10], sizes = [4, 1], strides = [1, 1]} : vector<4x13xf32> to vector<4x1xf32>
    %c1_i32_94 = arith.constant 1 : i32
    %374 = vector.broadcast %c1_i32_94 : i32 to vector<4x1xi32>
    %375 = arith.cmpi eq, %0, %374 : vector<4x1xi32>
    %376 = vector.broadcast %373 : vector<4x1xf32> to vector<4x13xf32>
    %377 = vector.broadcast %372 : vector<1x13xf32> to vector<4x13xf32>
    %378 = arith.mulf %376, %377 : vector<4x13xf32>
    %379 = arith.subf %363, %378 : vector<4x13xf32>
    %380 = vector.shape_cast %375 : vector<4x1xi1> to vector<4x1xi1>
    %381 = vector.broadcast %380 : vector<4x1xi1> to vector<4x13xi1>
    %382 = vector.shape_cast %372 : vector<1x13xf32> to vector<1x13xf32>
    %383 = vector.broadcast %382 : vector<1x13xf32> to vector<4x13xf32>
    %384 = arith.select %381, %383, %379 : vector<4x13xi1>, vector<4x13xf32>
    %385 = vector.extract_strided_slice %384 {offsets = [2, 11], sizes = [1, 1], strides = [1, 1]} : vector<4x13xf32> to vector<1x1xf32>
    %386 = tpu.reciprocal %385 {approx = true} : vector<1x1xf32> -> vector<1x1xf32>
    %387 = arith.mulf %385, %386 : vector<1x1xf32>
    %cst_95 = arith.constant 2.000000e+00 : f32
    %388 = vector.broadcast %cst_95 : f32 to vector<1x1xf32>
    %389 = arith.subf %388, %387 : vector<1x1xf32>
    %390 = arith.mulf %386, %389 : vector<1x1xf32>
    %391 = vector.extract_strided_slice %384 {offsets = [2, 0], sizes = [1, 13], strides = [1, 1]} : vector<4x13xf32> to vector<1x13xf32>
    %392 = vector.broadcast %390 : vector<1x1xf32> to vector<1x13xf32>
    %393 = arith.mulf %391, %392 : vector<1x13xf32>
    %394 = vector.extract_strided_slice %384 {offsets = [0, 11], sizes = [4, 1], strides = [1, 1]} : vector<4x13xf32> to vector<4x1xf32>
    %c2_i32_96 = arith.constant 2 : i32
    %395 = vector.broadcast %c2_i32_96 : i32 to vector<4x1xi32>
    %396 = arith.cmpi eq, %0, %395 : vector<4x1xi32>
    %397 = vector.broadcast %394 : vector<4x1xf32> to vector<4x13xf32>
    %398 = vector.broadcast %393 : vector<1x13xf32> to vector<4x13xf32>
    %399 = arith.mulf %397, %398 : vector<4x13xf32>
    %400 = arith.subf %384, %399 : vector<4x13xf32>
    %401 = vector.shape_cast %396 : vector<4x1xi1> to vector<4x1xi1>
    %402 = vector.broadcast %401 : vector<4x1xi1> to vector<4x13xi1>
    %403 = vector.shape_cast %393 : vector<1x13xf32> to vector<1x13xf32>
    %404 = vector.broadcast %403 : vector<1x13xf32> to vector<4x13xf32>
    %405 = arith.select %402, %404, %400 : vector<4x13xi1>, vector<4x13xf32>
    %406 = vector.extract_strided_slice %405 {offsets = [3, 12], sizes = [1, 1], strides = [1, 1]} : vector<4x13xf32> to vector<1x1xf32>
    %407 = tpu.reciprocal %406 {approx = true} : vector<1x1xf32> -> vector<1x1xf32>
    %408 = arith.mulf %406, %407 : vector<1x1xf32>
    %cst_97 = arith.constant 2.000000e+00 : f32
    %409 = vector.broadcast %cst_97 : f32 to vector<1x1xf32>
    %410 = arith.subf %409, %408 : vector<1x1xf32>
    %411 = arith.mulf %407, %410 : vector<1x1xf32>
    %412 = vector.extract_strided_slice %405 {offsets = [3, 0], sizes = [1, 13], strides = [1, 1]} : vector<4x13xf32> to vector<1x13xf32>
    %413 = vector.broadcast %411 : vector<1x1xf32> to vector<1x13xf32>
    %414 = arith.mulf %412, %413 : vector<1x13xf32>
    %415 = vector.extract_strided_slice %405 {offsets = [0, 12], sizes = [4, 1], strides = [1, 1]} : vector<4x13xf32> to vector<4x1xf32>
    %c3_i32_98 = arith.constant 3 : i32
    %416 = vector.broadcast %c3_i32_98 : i32 to vector<4x1xi32>
    %417 = arith.cmpi eq, %0, %416 : vector<4x1xi32>
    %418 = vector.broadcast %415 : vector<4x1xf32> to vector<4x13xf32>
    %419 = vector.broadcast %414 : vector<1x13xf32> to vector<4x13xf32>
    %420 = arith.mulf %418, %419 : vector<4x13xf32>
    %421 = arith.subf %405, %420 : vector<4x13xf32>
    %422 = vector.shape_cast %417 : vector<4x1xi1> to vector<4x1xi1>
    %423 = vector.broadcast %422 : vector<4x1xi1> to vector<4x13xi1>
    %424 = vector.shape_cast %414 : vector<1x13xf32> to vector<1x13xf32>
    %425 = vector.broadcast %424 : vector<1x13xf32> to vector<4x13xf32>
    %426 = arith.select %423, %425, %421 : vector<4x13xi1>, vector<4x13xf32>
    %427 = vector.extract_strided_slice %426 {offsets = [0, 0], sizes = [4, 9], strides = [1, 1]} : vector<4x13xf32> to vector<4x9xf32>
    %cst_99 = arith.constant 0.000000e+00 : f32
    %428 = vector.broadcast %cst_99 : f32 to vector<4x9xf32>
    %429 = arith.subf %428, %427 : vector<4x9xf32>
    %430 = vector.extract_strided_slice %341 {offsets = [0, 0], sizes = [9, 9], strides = [1, 1]} : vector<13x13xf32> to vector<9x9xf32>
    %431 = vector.extract_strided_slice %341 {offsets = [0, 9], sizes = [9, 4], strides = [1, 1]} : vector<13x13xf32> to vector<9x4xf32>
    %cst_100 = arith.constant dense<0.000000e+00> : vector<9x9xf32>
    %432 = tpu.matmul %431, %429, %cst_100 {dimension_numbers = #tpu.dot_dimension_numbers<[1], [0], [0], [1], [0, 0, 1, 1], [], []>} : vector<9x4xf32>, vector<4x9xf32>, vector<9x9xf32> -> vector<9x9xf32>
    %433 = arith.addf %430, %432 : vector<9x9xf32>
    %c1_101 = arith.constant 1 : index
    %c0_102 = arith.constant 0 : index
    %c512_103 = arith.constant 512 : index
    %434 = vector.load %arg3[%c1_101, %c0_102, %c512_103] : memref<2x13x896xf32, #tpu.memory_space<vmem>>, vector<1x13x13xf32>
    %435 = vector.shape_cast %434 : vector<1x13x13xf32> to vector<13x13xf32>
    %436 = vector.shape_cast %341 : vector<13x13xf32> to vector<1x13x13xf32>
    tpu.vector_store %arg3[%c1_101, %c0_102, %c512_103], %436 {strides = array<i32>} : memref<2x13x896xf32, #tpu.memory_space<vmem>>, vector<1x13x13xf32>,
    %c1_104 = arith.constant 1 : index
    %c0_105 = arith.constant 0 : index
    %c525_106 = arith.constant 525 : index
    %437 = vector.load %arg3[%c1_104, %c0_105, %c525_106] : memref<2x13x896xf32, #tpu.memory_space<vmem>>, vector<1x9x9xf32>
    %438 = vector.shape_cast %437 : vector<1x9x9xf32> to vector<9x9xf32>
    %439 = vector.shape_cast %433 : vector<9x9xf32> to vector<1x9x9xf32>
    tpu.vector_store %arg3[%c1_104, %c0_105, %c525_106], %439 {strides = array<i32>} : memref<2x13x896xf32, #tpu.memory_space<vmem>>, vector<1x9x9xf32>,
    %c1_107 = arith.constant 1 : index
    %c0_108 = arith.constant 0 : index
    %c534_109 = arith.constant 534 : index
    %440 = vector.load %arg3[%c1_107, %c0_108, %c534_109] : memref<2x13x896xf32, #tpu.memory_space<vmem>>, vector<1x4x9xf32>
    %441 = vector.shape_cast %440 : vector<1x4x9xf32> to vector<4x9xf32>
    %442 = vector.shape_cast %429 : vector<4x9xf32> to vector<1x4x9xf32>
    tpu.vector_store %arg3[%c1_107, %c0_108, %c534_109], %442 {strides = array<i32>} : memref<2x13x896xf32, #tpu.memory_space<vmem>>, vector<1x4x9xf32>,
    %c3 = arith.constant 3 : index
    %c0_110 = arith.constant 0 : index
    %c0_111 = arith.constant 0 : index
    %c0_112 = arith.constant 0 : index
    %443 = vector.load %arg1[%c3, %c0_110, %c0_111, %c0_112] : memref<6x2x9x13xf32, #tpu.memory_space<vmem>>, vector<1x1x9x13xf32>
    %444 = vector.shape_cast %443 : vector<1x1x9x13xf32> to vector<9x13xf32>
    %c3_113 = arith.constant 3 : index
    %c0_114 = arith.constant 0 : index
    %c0_115 = arith.constant 0 : index
    %c0_116 = arith.constant 0 : index
    %445 = vector.load %arg2[%c3_113, %c0_114, %c0_115, %c0_116] : memref<6x2x13x13xf32, #tpu.memory_space<vmem>>, vector<1x1x13x13xf32>
    %446 = vector.shape_cast %445 : vector<1x1x13x13xf32> to vector<13x13xf32>
    %cst_117 = arith.constant dense<0.000000e+00> : vector<9x13xf32>
    %447 = tpu.matmul %325, %444, %cst_117 {dimension_numbers = #tpu.dot_dimension_numbers<[1], [0], [0], [1], [0, 0, 1, 1], [], []>} : vector<9x9xf32>, vector<9x13xf32>, vector<9x13xf32> -> vector<9x13xf32>
    %cst_118 = arith.constant dense<0.000000e+00> : vector<13x13xf32>
    %448 = tpu.matmul %444, %447, %cst_118 {dimension_numbers = #tpu.dot_dimension_numbers<[0], [0], [1], [1], [0, 1, 1, 1], [], []>} : vector<9x13xf32>, vector<9x13xf32>, vector<13x13xf32> -> vector<13x13xf32>
    %449 = arith.addf %446, %448 : vector<13x13xf32>
    %450 = vector.extract_strided_slice %449 {offsets = [9, 0], sizes = [4, 13], strides = [1, 1]} : vector<13x13xf32> to vector<4x13xf32>
    %451 = vector.extract_strided_slice %450 {offsets = [0, 9], sizes = [1, 1], strides = [1, 1]} : vector<4x13xf32> to vector<1x1xf32>
    %452 = tpu.reciprocal %451 {approx = true} : vector<1x1xf32> -> vector<1x1xf32>
    %453 = arith.mulf %451, %452 : vector<1x1xf32>
    %cst_119 = arith.constant 2.000000e+00 : f32
    %454 = vector.broadcast %cst_119 : f32 to vector<1x1xf32>
    %455 = arith.subf %454, %453 : vector<1x1xf32>
    %456 = arith.mulf %452, %455 : vector<1x1xf32>
    %457 = vector.extract_strided_slice %450 {offsets = [0, 0], sizes = [1, 13], strides = [1, 1]} : vector<4x13xf32> to vector<1x13xf32>
    %458 = vector.broadcast %456 : vector<1x1xf32> to vector<1x13xf32>
    %459 = arith.mulf %457, %458 : vector<1x13xf32>
    %460 = vector.extract_strided_slice %450 {offsets = [0, 9], sizes = [4, 1], strides = [1, 1]} : vector<4x13xf32> to vector<4x1xf32>
    %c0_i32_120 = arith.constant 0 : i32
    %461 = vector.broadcast %c0_i32_120 : i32 to vector<4x1xi32>
    %462 = arith.cmpi eq, %0, %461 : vector<4x1xi32>
    %463 = vector.broadcast %460 : vector<4x1xf32> to vector<4x13xf32>
    %464 = vector.broadcast %459 : vector<1x13xf32> to vector<4x13xf32>
    %465 = arith.mulf %463, %464 : vector<4x13xf32>
    %466 = arith.subf %450, %465 : vector<4x13xf32>
    %467 = vector.shape_cast %462 : vector<4x1xi1> to vector<4x1xi1>
    %468 = vector.broadcast %467 : vector<4x1xi1> to vector<4x13xi1>
    %469 = vector.shape_cast %459 : vector<1x13xf32> to vector<1x13xf32>
    %470 = vector.broadcast %469 : vector<1x13xf32> to vector<4x13xf32>
    %471 = arith.select %468, %470, %466 : vector<4x13xi1>, vector<4x13xf32>
    %472 = vector.extract_strided_slice %471 {offsets = [1, 10], sizes = [1, 1], strides = [1, 1]} : vector<4x13xf32> to vector<1x1xf32>
    %473 = tpu.reciprocal %472 {approx = true} : vector<1x1xf32> -> vector<1x1xf32>
    %474 = arith.mulf %472, %473 : vector<1x1xf32>
    %cst_121 = arith.constant 2.000000e+00 : f32
    %475 = vector.broadcast %cst_121 : f32 to vector<1x1xf32>
    %476 = arith.subf %475, %474 : vector<1x1xf32>
    %477 = arith.mulf %473, %476 : vector<1x1xf32>
    %478 = vector.extract_strided_slice %471 {offsets = [1, 0], sizes = [1, 13], strides = [1, 1]} : vector<4x13xf32> to vector<1x13xf32>
    %479 = vector.broadcast %477 : vector<1x1xf32> to vector<1x13xf32>
    %480 = arith.mulf %478, %479 : vector<1x13xf32>
    %481 = vector.extract_strided_slice %471 {offsets = [0, 10], sizes = [4, 1], strides = [1, 1]} : vector<4x13xf32> to vector<4x1xf32>
    %c1_i32_122 = arith.constant 1 : i32
    %482 = vector.broadcast %c1_i32_122 : i32 to vector<4x1xi32>
    %483 = arith.cmpi eq, %0, %482 : vector<4x1xi32>
    %484 = vector.broadcast %481 : vector<4x1xf32> to vector<4x13xf32>
    %485 = vector.broadcast %480 : vector<1x13xf32> to vector<4x13xf32>
    %486 = arith.mulf %484, %485 : vector<4x13xf32>
    %487 = arith.subf %471, %486 : vector<4x13xf32>
    %488 = vector.shape_cast %483 : vector<4x1xi1> to vector<4x1xi1>
    %489 = vector.broadcast %488 : vector<4x1xi1> to vector<4x13xi1>
    %490 = vector.shape_cast %480 : vector<1x13xf32> to vector<1x13xf32>
    %491 = vector.broadcast %490 : vector<1x13xf32> to vector<4x13xf32>
    %492 = arith.select %489, %491, %487 : vector<4x13xi1>, vector<4x13xf32>
    %493 = vector.extract_strided_slice %492 {offsets = [2, 11], sizes = [1, 1], strides = [1, 1]} : vector<4x13xf32> to vector<1x1xf32>
    %494 = tpu.reciprocal %493 {approx = true} : vector<1x1xf32> -> vector<1x1xf32>
    %495 = arith.mulf %493, %494 : vector<1x1xf32>
    %cst_123 = arith.constant 2.000000e+00 : f32
    %496 = vector.broadcast %cst_123 : f32 to vector<1x1xf32>
    %497 = arith.subf %496, %495 : vector<1x1xf32>
    %498 = arith.mulf %494, %497 : vector<1x1xf32>
    %499 = vector.extract_strided_slice %492 {offsets = [2, 0], sizes = [1, 13], strides = [1, 1]} : vector<4x13xf32> to vector<1x13xf32>
    %500 = vector.broadcast %498 : vector<1x1xf32> to vector<1x13xf32>
    %501 = arith.mulf %499, %500 : vector<1x13xf32>
    %502 = vector.extract_strided_slice %492 {offsets = [0, 11], sizes = [4, 1], strides = [1, 1]} : vector<4x13xf32> to vector<4x1xf32>
    %c2_i32_124 = arith.constant 2 : i32
    %503 = vector.broadcast %c2_i32_124 : i32 to vector<4x1xi32>
    %504 = arith.cmpi eq, %0, %503 : vector<4x1xi32>
    %505 = vector.broadcast %502 : vector<4x1xf32> to vector<4x13xf32>
    %506 = vector.broadcast %501 : vector<1x13xf32> to vector<4x13xf32>
    %507 = arith.mulf %505, %506 : vector<4x13xf32>
    %508 = arith.subf %492, %507 : vector<4x13xf32>
    %509 = vector.shape_cast %504 : vector<4x1xi1> to vector<4x1xi1>
    %510 = vector.broadcast %509 : vector<4x1xi1> to vector<4x13xi1>
    %511 = vector.shape_cast %501 : vector<1x13xf32> to vector<1x13xf32>
    %512 = vector.broadcast %511 : vector<1x13xf32> to vector<4x13xf32>
    %513 = arith.select %510, %512, %508 : vector<4x13xi1>, vector<4x13xf32>
    %514 = vector.extract_strided_slice %513 {offsets = [3, 12], sizes = [1, 1], strides = [1, 1]} : vector<4x13xf32> to vector<1x1xf32>
    %515 = tpu.reciprocal %514 {approx = true} : vector<1x1xf32> -> vector<1x1xf32>
    %516 = arith.mulf %514, %515 : vector<1x1xf32>
    %cst_125 = arith.constant 2.000000e+00 : f32
    %517 = vector.broadcast %cst_125 : f32 to vector<1x1xf32>
    %518 = arith.subf %517, %516 : vector<1x1xf32>
    %519 = arith.mulf %515, %518 : vector<1x1xf32>
    %520 = vector.extract_strided_slice %513 {offsets = [3, 0], sizes = [1, 13], strides = [1, 1]} : vector<4x13xf32> to vector<1x13xf32>
    %521 = vector.broadcast %519 : vector<1x1xf32> to vector<1x13xf32>
    %522 = arith.mulf %520, %521 : vector<1x13xf32>
    %523 = vector.extract_strided_slice %513 {offsets = [0, 12], sizes = [4, 1], strides = [1, 1]} : vector<4x13xf32> to vector<4x1xf32>
    %c3_i32_126 = arith.constant 3 : i32
    %524 = vector.broadcast %c3_i32_126 : i32 to vector<4x1xi32>
    %525 = arith.cmpi eq, %0, %524 : vector<4x1xi32>
    %526 = vector.broadcast %523 : vector<4x1xf32> to vector<4x13xf32>
    %527 = vector.broadcast %522 : vector<1x13xf32> to vector<4x13xf32>
    %528 = arith.mulf %526, %527 : vector<4x13xf32>
    %529 = arith.subf %513, %528 : vector<4x13xf32>
    %530 = vector.shape_cast %525 : vector<4x1xi1> to vector<4x1xi1>
    %531 = vector.broadcast %530 : vector<4x1xi1> to vector<4x13xi1>
    %532 = vector.shape_cast %522 : vector<1x13xf32> to vector<1x13xf32>
    %533 = vector.broadcast %532 : vector<1x13xf32> to vector<4x13xf32>
    %534 = arith.select %531, %533, %529 : vector<4x13xi1>, vector<4x13xf32>
    %535 = vector.extract_strided_slice %534 {offsets = [0, 0], sizes = [4, 9], strides = [1, 1]} : vector<4x13xf32> to vector<4x9xf32>
    %cst_127 = arith.constant 0.000000e+00 : f32
    %536 = vector.broadcast %cst_127 : f32 to vector<4x9xf32>
    %537 = arith.subf %536, %535 : vector<4x9xf32>
    %538 = vector.extract_strided_slice %449 {offsets = [0, 0], sizes = [9, 9], strides = [1, 1]} : vector<13x13xf32> to vector<9x9xf32>
    %539 = vector.extract_strided_slice %449 {offsets = [0, 9], sizes = [9, 4], strides = [1, 1]} : vector<13x13xf32> to vector<9x4xf32>
    %cst_128 = arith.constant dense<0.000000e+00> : vector<9x9xf32>
    %540 = tpu.matmul %539, %537, %cst_128 {dimension_numbers = #tpu.dot_dimension_numbers<[1], [0], [0], [1], [0, 0, 1, 1], [], []>} : vector<9x4xf32>, vector<4x9xf32>, vector<9x9xf32> -> vector<9x9xf32>
    %541 = arith.addf %538, %540 : vector<9x9xf32>
    %c0_129 = arith.constant 0 : index
    %c0_130 = arith.constant 0 : index
    %c384 = arith.constant 384 : index
    %542 = vector.load %arg3[%c0_129, %c0_130, %c384] : memref<2x13x896xf32, #tpu.memory_space<vmem>>, vector<1x13x13xf32>
    %543 = vector.shape_cast %542 : vector<1x13x13xf32> to vector<13x13xf32>
    %544 = vector.shape_cast %449 : vector<13x13xf32> to vector<1x13x13xf32>
    tpu.vector_store %arg3[%c0_129, %c0_130, %c384], %544 {strides = array<i32>} : memref<2x13x896xf32, #tpu.memory_space<vmem>>, vector<1x13x13xf32>,
    %c0_131 = arith.constant 0 : index
    %c0_132 = arith.constant 0 : index
    %c397 = arith.constant 397 : index
    %545 = vector.load %arg3[%c0_131, %c0_132, %c397] : memref<2x13x896xf32, #tpu.memory_space<vmem>>, vector<1x9x9xf32>
    %546 = vector.shape_cast %545 : vector<1x9x9xf32> to vector<9x9xf32>
    %547 = vector.shape_cast %541 : vector<9x9xf32> to vector<1x9x9xf32>
    tpu.vector_store %arg3[%c0_131, %c0_132, %c397], %547 {strides = array<i32>} : memref<2x13x896xf32, #tpu.memory_space<vmem>>, vector<1x9x9xf32>,
    %c0_133 = arith.constant 0 : index
    %c0_134 = arith.constant 0 : index
    %c406 = arith.constant 406 : index
    %548 = vector.load %arg3[%c0_133, %c0_134, %c406] : memref<2x13x896xf32, #tpu.memory_space<vmem>>, vector<1x4x9xf32>
    %549 = vector.shape_cast %548 : vector<1x4x9xf32> to vector<4x9xf32>
    %550 = vector.shape_cast %537 : vector<4x9xf32> to vector<1x4x9xf32>
    tpu.vector_store %arg3[%c0_133, %c0_134, %c406], %550 {strides = array<i32>} : memref<2x13x896xf32, #tpu.memory_space<vmem>>, vector<1x4x9xf32>,
    %c3_135 = arith.constant 3 : index
    %c1_136 = arith.constant 1 : index
    %c0_137 = arith.constant 0 : index
    %c0_138 = arith.constant 0 : index
    %551 = vector.load %arg1[%c3_135, %c1_136, %c0_137, %c0_138] : memref<6x2x9x13xf32, #tpu.memory_space<vmem>>, vector<1x1x9x13xf32>
    %552 = vector.shape_cast %551 : vector<1x1x9x13xf32> to vector<9x13xf32>
    %c3_139 = arith.constant 3 : index
    %c1_140 = arith.constant 1 : index
    %c0_141 = arith.constant 0 : index
    %c0_142 = arith.constant 0 : index
    %553 = vector.load %arg2[%c3_139, %c1_140, %c0_141, %c0_142] : memref<6x2x13x13xf32, #tpu.memory_space<vmem>>, vector<1x1x13x13xf32>
    %554 = vector.shape_cast %553 : vector<1x1x13x13xf32> to vector<13x13xf32>
    %cst_143 = arith.constant dense<0.000000e+00> : vector<9x13xf32>
    %555 = tpu.matmul %433, %552, %cst_143 {dimension_numbers = #tpu.dot_dimension_numbers<[1], [0], [0], [1], [0, 0, 1, 1], [], []>} : vector<9x9xf32>, vector<9x13xf32>, vector<9x13xf32> -> vector<9x13xf32>
    %cst_144 = arith.constant dense<0.000000e+00> : vector<13x13xf32>
    %556 = tpu.matmul %552, %555, %cst_144 {dimension_numbers = #tpu.dot_dimension_numbers<[0], [0], [1], [1], [0, 1, 1, 1], [], []>} : vector<9x13xf32>, vector<9x13xf32>, vector<13x13xf32> -> vector<13x13xf32>
    %557 = arith.addf %554, %556 : vector<13x13xf32>
    %558 = vector.extract_strided_slice %557 {offsets = [9, 0], sizes = [4, 13], strides = [1, 1]} : vector<13x13xf32> to vector<4x13xf32>
    %559 = vector.extract_strided_slice %558 {offsets = [0, 9], sizes = [1, 1], strides = [1, 1]} : vector<4x13xf32> to vector<1x1xf32>
    %560 = tpu.reciprocal %559 {approx = true} : vector<1x1xf32> -> vector<1x1xf32>
    %561 = arith.mulf %559, %560 : vector<1x1xf32>
    %cst_145 = arith.constant 2.000000e+00 : f32
    %562 = vector.broadcast %cst_145 : f32 to vector<1x1xf32>
    %563 = arith.subf %562, %561 : vector<1x1xf32>
    %564 = arith.mulf %560, %563 : vector<1x1xf32>
    %565 = vector.extract_strided_slice %558 {offsets = [0, 0], sizes = [1, 13], strides = [1, 1]} : vector<4x13xf32> to vector<1x13xf32>
    %566 = vector.broadcast %564 : vector<1x1xf32> to vector<1x13xf32>
    %567 = arith.mulf %565, %566 : vector<1x13xf32>
    %568 = vector.extract_strided_slice %558 {offsets = [0, 9], sizes = [4, 1], strides = [1, 1]} : vector<4x13xf32> to vector<4x1xf32>
    %c0_i32_146 = arith.constant 0 : i32
    %569 = vector.broadcast %c0_i32_146 : i32 to vector<4x1xi32>
    %570 = arith.cmpi eq, %0, %569 : vector<4x1xi32>
    %571 = vector.broadcast %568 : vector<4x1xf32> to vector<4x13xf32>
    %572 = vector.broadcast %567 : vector<1x13xf32> to vector<4x13xf32>
    %573 = arith.mulf %571, %572 : vector<4x13xf32>
    %574 = arith.subf %558, %573 : vector<4x13xf32>
    %575 = vector.shape_cast %570 : vector<4x1xi1> to vector<4x1xi1>
    %576 = vector.broadcast %575 : vector<4x1xi1> to vector<4x13xi1>
    %577 = vector.shape_cast %567 : vector<1x13xf32> to vector<1x13xf32>
    %578 = vector.broadcast %577 : vector<1x13xf32> to vector<4x13xf32>
    %579 = arith.select %576, %578, %574 : vector<4x13xi1>, vector<4x13xf32>
    %580 = vector.extract_strided_slice %579 {offsets = [1, 10], sizes = [1, 1], strides = [1, 1]} : vector<4x13xf32> to vector<1x1xf32>
    %581 = tpu.reciprocal %580 {approx = true} : vector<1x1xf32> -> vector<1x1xf32>
    %582 = arith.mulf %580, %581 : vector<1x1xf32>
    %cst_147 = arith.constant 2.000000e+00 : f32
    %583 = vector.broadcast %cst_147 : f32 to vector<1x1xf32>
    %584 = arith.subf %583, %582 : vector<1x1xf32>
    %585 = arith.mulf %581, %584 : vector<1x1xf32>
    %586 = vector.extract_strided_slice %579 {offsets = [1, 0], sizes = [1, 13], strides = [1, 1]} : vector<4x13xf32> to vector<1x13xf32>
    %587 = vector.broadcast %585 : vector<1x1xf32> to vector<1x13xf32>
    %588 = arith.mulf %586, %587 : vector<1x13xf32>
    %589 = vector.extract_strided_slice %579 {offsets = [0, 10], sizes = [4, 1], strides = [1, 1]} : vector<4x13xf32> to vector<4x1xf32>
    %c1_i32_148 = arith.constant 1 : i32
    %590 = vector.broadcast %c1_i32_148 : i32 to vector<4x1xi32>
    %591 = arith.cmpi eq, %0, %590 : vector<4x1xi32>
    %592 = vector.broadcast %589 : vector<4x1xf32> to vector<4x13xf32>
    %593 = vector.broadcast %588 : vector<1x13xf32> to vector<4x13xf32>
    %594 = arith.mulf %592, %593 : vector<4x13xf32>
    %595 = arith.subf %579, %594 : vector<4x13xf32>
    %596 = vector.shape_cast %591 : vector<4x1xi1> to vector<4x1xi1>
    %597 = vector.broadcast %596 : vector<4x1xi1> to vector<4x13xi1>
    %598 = vector.shape_cast %588 : vector<1x13xf32> to vector<1x13xf32>
    %599 = vector.broadcast %598 : vector<1x13xf32> to vector<4x13xf32>
    %600 = arith.select %597, %599, %595 : vector<4x13xi1>, vector<4x13xf32>
    %601 = vector.extract_strided_slice %600 {offsets = [2, 11], sizes = [1, 1], strides = [1, 1]} : vector<4x13xf32> to vector<1x1xf32>
    %602 = tpu.reciprocal %601 {approx = true} : vector<1x1xf32> -> vector<1x1xf32>
    %603 = arith.mulf %601, %602 : vector<1x1xf32>
    %cst_149 = arith.constant 2.000000e+00 : f32
    %604 = vector.broadcast %cst_149 : f32 to vector<1x1xf32>
    %605 = arith.subf %604, %603 : vector<1x1xf32>
    %606 = arith.mulf %602, %605 : vector<1x1xf32>
    %607 = vector.extract_strided_slice %600 {offsets = [2, 0], sizes = [1, 13], strides = [1, 1]} : vector<4x13xf32> to vector<1x13xf32>
    %608 = vector.broadcast %606 : vector<1x1xf32> to vector<1x13xf32>
    %609 = arith.mulf %607, %608 : vector<1x13xf32>
    %610 = vector.extract_strided_slice %600 {offsets = [0, 11], sizes = [4, 1], strides = [1, 1]} : vector<4x13xf32> to vector<4x1xf32>
    %c2_i32_150 = arith.constant 2 : i32
    %611 = vector.broadcast %c2_i32_150 : i32 to vector<4x1xi32>
    %612 = arith.cmpi eq, %0, %611 : vector<4x1xi32>
    %613 = vector.broadcast %610 : vector<4x1xf32> to vector<4x13xf32>
    %614 = vector.broadcast %609 : vector<1x13xf32> to vector<4x13xf32>
    %615 = arith.mulf %613, %614 : vector<4x13xf32>
    %616 = arith.subf %600, %615 : vector<4x13xf32>
    %617 = vector.shape_cast %612 : vector<4x1xi1> to vector<4x1xi1>
    %618 = vector.broadcast %617 : vector<4x1xi1> to vector<4x13xi1>
    %619 = vector.shape_cast %609 : vector<1x13xf32> to vector<1x13xf32>
    %620 = vector.broadcast %619 : vector<1x13xf32> to vector<4x13xf32>
    %621 = arith.select %618, %620, %616 : vector<4x13xi1>, vector<4x13xf32>
    %622 = vector.extract_strided_slice %621 {offsets = [3, 12], sizes = [1, 1], strides = [1, 1]} : vector<4x13xf32> to vector<1x1xf32>
    %623 = tpu.reciprocal %622 {approx = true} : vector<1x1xf32> -> vector<1x1xf32>
    %624 = arith.mulf %622, %623 : vector<1x1xf32>
    %cst_151 = arith.constant 2.000000e+00 : f32
    %625 = vector.broadcast %cst_151 : f32 to vector<1x1xf32>
    %626 = arith.subf %625, %624 : vector<1x1xf32>
    %627 = arith.mulf %623, %626 : vector<1x1xf32>
    %628 = vector.extract_strided_slice %621 {offsets = [3, 0], sizes = [1, 13], strides = [1, 1]} : vector<4x13xf32> to vector<1x13xf32>
    %629 = vector.broadcast %627 : vector<1x1xf32> to vector<1x13xf32>
    %630 = arith.mulf %628, %629 : vector<1x13xf32>
    %631 = vector.extract_strided_slice %621 {offsets = [0, 12], sizes = [4, 1], strides = [1, 1]} : vector<4x13xf32> to vector<4x1xf32>
    %c3_i32_152 = arith.constant 3 : i32
    %632 = vector.broadcast %c3_i32_152 : i32 to vector<4x1xi32>
    %633 = arith.cmpi eq, %0, %632 : vector<4x1xi32>
    %634 = vector.broadcast %631 : vector<4x1xf32> to vector<4x13xf32>
    %635 = vector.broadcast %630 : vector<1x13xf32> to vector<4x13xf32>
    %636 = arith.mulf %634, %635 : vector<4x13xf32>
    %637 = arith.subf %621, %636 : vector<4x13xf32>
    %638 = vector.shape_cast %633 : vector<4x1xi1> to vector<4x1xi1>
    %639 = vector.broadcast %638 : vector<4x1xi1> to vector<4x13xi1>
    %640 = vector.shape_cast %630 : vector<1x13xf32> to vector<1x13xf32>
    %641 = vector.broadcast %640 : vector<1x13xf32> to vector<4x13xf32>
    %642 = arith.select %639, %641, %637 : vector<4x13xi1>, vector<4x13xf32>
    %643 = vector.extract_strided_slice %642 {offsets = [0, 0], sizes = [4, 9], strides = [1, 1]} : vector<4x13xf32> to vector<4x9xf32>
    %cst_153 = arith.constant 0.000000e+00 : f32
    %644 = vector.broadcast %cst_153 : f32 to vector<4x9xf32>
    %645 = arith.subf %644, %643 : vector<4x9xf32>
    %646 = vector.extract_strided_slice %557 {offsets = [0, 0], sizes = [9, 9], strides = [1, 1]} : vector<13x13xf32> to vector<9x9xf32>
    %647 = vector.extract_strided_slice %557 {offsets = [0, 9], sizes = [9, 4], strides = [1, 1]} : vector<13x13xf32> to vector<9x4xf32>
    %cst_154 = arith.constant dense<0.000000e+00> : vector<9x9xf32>
    %648 = tpu.matmul %647, %645, %cst_154 {dimension_numbers = #tpu.dot_dimension_numbers<[1], [0], [0], [1], [0, 0, 1, 1], [], []>} : vector<9x4xf32>, vector<4x9xf32>, vector<9x9xf32> -> vector<9x9xf32>
    %649 = arith.addf %646, %648 : vector<9x9xf32>
    %c1_155 = arith.constant 1 : index
    %c0_156 = arith.constant 0 : index
    %c384_157 = arith.constant 384 : index
    %650 = vector.load %arg3[%c1_155, %c0_156, %c384_157] : memref<2x13x896xf32, #tpu.memory_space<vmem>>, vector<1x13x13xf32>
    %651 = vector.shape_cast %650 : vector<1x13x13xf32> to vector<13x13xf32>
    %652 = vector.shape_cast %557 : vector<13x13xf32> to vector<1x13x13xf32>
    tpu.vector_store %arg3[%c1_155, %c0_156, %c384_157], %652 {strides = array<i32>} : memref<2x13x896xf32, #tpu.memory_space<vmem>>, vector<1x13x13xf32>,
    %c1_158 = arith.constant 1 : index
    %c0_159 = arith.constant 0 : index
    %c397_160 = arith.constant 397 : index
    %653 = vector.load %arg3[%c1_158, %c0_159, %c397_160] : memref<2x13x896xf32, #tpu.memory_space<vmem>>, vector<1x9x9xf32>
    %654 = vector.shape_cast %653 : vector<1x9x9xf32> to vector<9x9xf32>
    %655 = vector.shape_cast %649 : vector<9x9xf32> to vector<1x9x9xf32>
    tpu.vector_store %arg3[%c1_158, %c0_159, %c397_160], %655 {strides = array<i32>} : memref<2x13x896xf32, #tpu.memory_space<vmem>>, vector<1x9x9xf32>,
    %c1_161 = arith.constant 1 : index
    %c0_162 = arith.constant 0 : index
    %c406_163 = arith.constant 406 : index
    %656 = vector.load %arg3[%c1_161, %c0_162, %c406_163] : memref<2x13x896xf32, #tpu.memory_space<vmem>>, vector<1x4x9xf32>
    %657 = vector.shape_cast %656 : vector<1x4x9xf32> to vector<4x9xf32>
    %658 = vector.shape_cast %645 : vector<4x9xf32> to vector<1x4x9xf32>
    tpu.vector_store %arg3[%c1_161, %c0_162, %c406_163], %658 {strides = array<i32>} : memref<2x13x896xf32, #tpu.memory_space<vmem>>, vector<1x4x9xf32>,
    %c2 = arith.constant 2 : index
    %c0_164 = arith.constant 0 : index
    %c0_165 = arith.constant 0 : index
    %c0_166 = arith.constant 0 : index
    %659 = vector.load %arg1[%c2, %c0_164, %c0_165, %c0_166] : memref<6x2x9x13xf32, #tpu.memory_space<vmem>>, vector<1x1x9x13xf32>
    %660 = vector.shape_cast %659 : vector<1x1x9x13xf32> to vector<9x13xf32>
    %c2_167 = arith.constant 2 : index
    %c0_168 = arith.constant 0 : index
    %c0_169 = arith.constant 0 : index
    %c0_170 = arith.constant 0 : index
    %661 = vector.load %arg2[%c2_167, %c0_168, %c0_169, %c0_170] : memref<6x2x13x13xf32, #tpu.memory_space<vmem>>, vector<1x1x13x13xf32>
    %662 = vector.shape_cast %661 : vector<1x1x13x13xf32> to vector<13x13xf32>
    %cst_171 = arith.constant dense<0.000000e+00> : vector<9x13xf32>
    %663 = tpu.matmul %541, %660, %cst_171 {dimension_numbers = #tpu.dot_dimension_numbers<[1], [0], [0], [1], [0, 0, 1, 1], [], []>} : vector<9x9xf32>, vector<9x13xf32>, vector<9x13xf32> -> vector<9x13xf32>
    %cst_172 = arith.constant dense<0.000000e+00> : vector<13x13xf32>
    %664 = tpu.matmul %660, %663, %cst_172 {dimension_numbers = #tpu.dot_dimension_numbers<[0], [0], [1], [1], [0, 1, 1, 1], [], []>} : vector<9x13xf32>, vector<9x13xf32>, vector<13x13xf32> -> vector<13x13xf32>
    %665 = arith.addf %662, %664 : vector<13x13xf32>
    %666 = vector.extract_strided_slice %665 {offsets = [9, 0], sizes = [4, 13], strides = [1, 1]} : vector<13x13xf32> to vector<4x13xf32>
    %667 = vector.extract_strided_slice %666 {offsets = [0, 9], sizes = [1, 1], strides = [1, 1]} : vector<4x13xf32> to vector<1x1xf32>
    %668 = tpu.reciprocal %667 {approx = true} : vector<1x1xf32> -> vector<1x1xf32>
    %669 = arith.mulf %667, %668 : vector<1x1xf32>
    %cst_173 = arith.constant 2.000000e+00 : f32
    %670 = vector.broadcast %cst_173 : f32 to vector<1x1xf32>
    %671 = arith.subf %670, %669 : vector<1x1xf32>
    %672 = arith.mulf %668, %671 : vector<1x1xf32>
    %673 = vector.extract_strided_slice %666 {offsets = [0, 0], sizes = [1, 13], strides = [1, 1]} : vector<4x13xf32> to vector<1x13xf32>
    %674 = vector.broadcast %672 : vector<1x1xf32> to vector<1x13xf32>
    %675 = arith.mulf %673, %674 : vector<1x13xf32>
    %676 = vector.extract_strided_slice %666 {offsets = [0, 9], sizes = [4, 1], strides = [1, 1]} : vector<4x13xf32> to vector<4x1xf32>
    %c0_i32_174 = arith.constant 0 : i32
    %677 = vector.broadcast %c0_i32_174 : i32 to vector<4x1xi32>
    %678 = arith.cmpi eq, %0, %677 : vector<4x1xi32>
    %679 = vector.broadcast %676 : vector<4x1xf32> to vector<4x13xf32>
    %680 = vector.broadcast %675 : vector<1x13xf32> to vector<4x13xf32>
    %681 = arith.mulf %679, %680 : vector<4x13xf32>
    %682 = arith.subf %666, %681 : vector<4x13xf32>
    %683 = vector.shape_cast %678 : vector<4x1xi1> to vector<4x1xi1>
    %684 = vector.broadcast %683 : vector<4x1xi1> to vector<4x13xi1>
    %685 = vector.shape_cast %675 : vector<1x13xf32> to vector<1x13xf32>
    %686 = vector.broadcast %685 : vector<1x13xf32> to vector<4x13xf32>
    %687 = arith.select %684, %686, %682 : vector<4x13xi1>, vector<4x13xf32>
    %688 = vector.extract_strided_slice %687 {offsets = [1, 10], sizes = [1, 1], strides = [1, 1]} : vector<4x13xf32> to vector<1x1xf32>
    %689 = tpu.reciprocal %688 {approx = true} : vector<1x1xf32> -> vector<1x1xf32>
    %690 = arith.mulf %688, %689 : vector<1x1xf32>
    %cst_175 = arith.constant 2.000000e+00 : f32
    %691 = vector.broadcast %cst_175 : f32 to vector<1x1xf32>
    %692 = arith.subf %691, %690 : vector<1x1xf32>
    %693 = arith.mulf %689, %692 : vector<1x1xf32>
    %694 = vector.extract_strided_slice %687 {offsets = [1, 0], sizes = [1, 13], strides = [1, 1]} : vector<4x13xf32> to vector<1x13xf32>
    %695 = vector.broadcast %693 : vector<1x1xf32> to vector<1x13xf32>
    %696 = arith.mulf %694, %695 : vector<1x13xf32>
    %697 = vector.extract_strided_slice %687 {offsets = [0, 10], sizes = [4, 1], strides = [1, 1]} : vector<4x13xf32> to vector<4x1xf32>
    %c1_i32_176 = arith.constant 1 : i32
    %698 = vector.broadcast %c1_i32_176 : i32 to vector<4x1xi32>
    %699 = arith.cmpi eq, %0, %698 : vector<4x1xi32>
    %700 = vector.broadcast %697 : vector<4x1xf32> to vector<4x13xf32>
    %701 = vector.broadcast %696 : vector<1x13xf32> to vector<4x13xf32>
    %702 = arith.mulf %700, %701 : vector<4x13xf32>
    %703 = arith.subf %687, %702 : vector<4x13xf32>
    %704 = vector.shape_cast %699 : vector<4x1xi1> to vector<4x1xi1>
    %705 = vector.broadcast %704 : vector<4x1xi1> to vector<4x13xi1>
    %706 = vector.shape_cast %696 : vector<1x13xf32> to vector<1x13xf32>
    %707 = vector.broadcast %706 : vector<1x13xf32> to vector<4x13xf32>
    %708 = arith.select %705, %707, %703 : vector<4x13xi1>, vector<4x13xf32>
    %709 = vector.extract_strided_slice %708 {offsets = [2, 11], sizes = [1, 1], strides = [1, 1]} : vector<4x13xf32> to vector<1x1xf32>
    %710 = tpu.reciprocal %709 {approx = true} : vector<1x1xf32> -> vector<1x1xf32>
    %711 = arith.mulf %709, %710 : vector<1x1xf32>
    %cst_177 = arith.constant 2.000000e+00 : f32
    %712 = vector.broadcast %cst_177 : f32 to vector<1x1xf32>
    %713 = arith.subf %712, %711 : vector<1x1xf32>
    %714 = arith.mulf %710, %713 : vector<1x1xf32>
    %715 = vector.extract_strided_slice %708 {offsets = [2, 0], sizes = [1, 13], strides = [1, 1]} : vector<4x13xf32> to vector<1x13xf32>
    %716 = vector.broadcast %714 : vector<1x1xf32> to vector<1x13xf32>
    %717 = arith.mulf %715, %716 : vector<1x13xf32>
    %718 = vector.extract_strided_slice %708 {offsets = [0, 11], sizes = [4, 1], strides = [1, 1]} : vector<4x13xf32> to vector<4x1xf32>
    %c2_i32_178 = arith.constant 2 : i32
    %719 = vector.broadcast %c2_i32_178 : i32 to vector<4x1xi32>
    %720 = arith.cmpi eq, %0, %719 : vector<4x1xi32>
    %721 = vector.broadcast %718 : vector<4x1xf32> to vector<4x13xf32>
    %722 = vector.broadcast %717 : vector<1x13xf32> to vector<4x13xf32>
    %723 = arith.mulf %721, %722 : vector<4x13xf32>
    %724 = arith.subf %708, %723 : vector<4x13xf32>
    %725 = vector.shape_cast %720 : vector<4x1xi1> to vector<4x1xi1>
    %726 = vector.broadcast %725 : vector<4x1xi1> to vector<4x13xi1>
    %727 = vector.shape_cast %717 : vector<1x13xf32> to vector<1x13xf32>
    %728 = vector.broadcast %727 : vector<1x13xf32> to vector<4x13xf32>
    %729 = arith.select %726, %728, %724 : vector<4x13xi1>, vector<4x13xf32>
    %730 = vector.extract_strided_slice %729 {offsets = [3, 12], sizes = [1, 1], strides = [1, 1]} : vector<4x13xf32> to vector<1x1xf32>
    %731 = tpu.reciprocal %730 {approx = true} : vector<1x1xf32> -> vector<1x1xf32>
    %732 = arith.mulf %730, %731 : vector<1x1xf32>
    %cst_179 = arith.constant 2.000000e+00 : f32
    %733 = vector.broadcast %cst_179 : f32 to vector<1x1xf32>
    %734 = arith.subf %733, %732 : vector<1x1xf32>
    %735 = arith.mulf %731, %734 : vector<1x1xf32>
    %736 = vector.extract_strided_slice %729 {offsets = [3, 0], sizes = [1, 13], strides = [1, 1]} : vector<4x13xf32> to vector<1x13xf32>
    %737 = vector.broadcast %735 : vector<1x1xf32> to vector<1x13xf32>
    %738 = arith.mulf %736, %737 : vector<1x13xf32>
    %739 = vector.extract_strided_slice %729 {offsets = [0, 12], sizes = [4, 1], strides = [1, 1]} : vector<4x13xf32> to vector<4x1xf32>
    %c3_i32_180 = arith.constant 3 : i32
    %740 = vector.broadcast %c3_i32_180 : i32 to vector<4x1xi32>
    %741 = arith.cmpi eq, %0, %740 : vector<4x1xi32>
    %742 = vector.broadcast %739 : vector<4x1xf32> to vector<4x13xf32>
    %743 = vector.broadcast %738 : vector<1x13xf32> to vector<4x13xf32>
    %744 = arith.mulf %742, %743 : vector<4x13xf32>
    %745 = arith.subf %729, %744 : vector<4x13xf32>
    %746 = vector.shape_cast %741 : vector<4x1xi1> to vector<4x1xi1>
    %747 = vector.broadcast %746 : vector<4x1xi1> to vector<4x13xi1>
    %748 = vector.shape_cast %738 : vector<1x13xf32> to vector<1x13xf32>
    %749 = vector.broadcast %748 : vector<1x13xf32> to vector<4x13xf32>
    %750 = arith.select %747, %749, %745 : vector<4x13xi1>, vector<4x13xf32>
    %751 = vector.extract_strided_slice %750 {offsets = [0, 0], sizes = [4, 9], strides = [1, 1]} : vector<4x13xf32> to vector<4x9xf32>
    %cst_181 = arith.constant 0.000000e+00 : f32
    %752 = vector.broadcast %cst_181 : f32 to vector<4x9xf32>
    %753 = arith.subf %752, %751 : vector<4x9xf32>
    %754 = vector.extract_strided_slice %665 {offsets = [0, 0], sizes = [9, 9], strides = [1, 1]} : vector<13x13xf32> to vector<9x9xf32>
    %755 = vector.extract_strided_slice %665 {offsets = [0, 9], sizes = [9, 4], strides = [1, 1]} : vector<13x13xf32> to vector<9x4xf32>
    %cst_182 = arith.constant dense<0.000000e+00> : vector<9x9xf32>
    %756 = tpu.matmul %755, %753, %cst_182 {dimension_numbers = #tpu.dot_dimension_numbers<[1], [0], [0], [1], [0, 0, 1, 1], [], []>} : vector<9x4xf32>, vector<4x9xf32>, vector<9x9xf32> -> vector<9x9xf32>
    %757 = arith.addf %754, %756 : vector<9x9xf32>
    %c0_183 = arith.constant 0 : index
    %c0_184 = arith.constant 0 : index
    %c256 = arith.constant 256 : index
    %758 = vector.load %arg3[%c0_183, %c0_184, %c256] : memref<2x13x896xf32, #tpu.memory_space<vmem>>, vector<1x13x13xf32>
    %759 = vector.shape_cast %758 : vector<1x13x13xf32> to vector<13x13xf32>
    %760 = vector.shape_cast %665 : vector<13x13xf32> to vector<1x13x13xf32>
    tpu.vector_store %arg3[%c0_183, %c0_184, %c256], %760 {strides = array<i32>} : memref<2x13x896xf32, #tpu.memory_space<vmem>>, vector<1x13x13xf32>,
    %c0_185 = arith.constant 0 : index
    %c0_186 = arith.constant 0 : index
    %c269 = arith.constant 269 : index
    %761 = vector.load %arg3[%c0_185, %c0_186, %c269] : memref<2x13x896xf32, #tpu.memory_space<vmem>>, vector<1x9x9xf32>
    %762 = vector.shape_cast %761 : vector<1x9x9xf32> to vector<9x9xf32>
    %763 = vector.shape_cast %757 : vector<9x9xf32> to vector<1x9x9xf32>
    tpu.vector_store %arg3[%c0_185, %c0_186, %c269], %763 {strides = array<i32>} : memref<2x13x896xf32, #tpu.memory_space<vmem>>, vector<1x9x9xf32>,
    %c0_187 = arith.constant 0 : index
    %c0_188 = arith.constant 0 : index
    %c278 = arith.constant 278 : index
    %764 = vector.load %arg3[%c0_187, %c0_188, %c278] : memref<2x13x896xf32, #tpu.memory_space<vmem>>, vector<1x4x9xf32>
    %765 = vector.shape_cast %764 : vector<1x4x9xf32> to vector<4x9xf32>
    %766 = vector.shape_cast %753 : vector<4x9xf32> to vector<1x4x9xf32>
    tpu.vector_store %arg3[%c0_187, %c0_188, %c278], %766 {strides = array<i32>} : memref<2x13x896xf32, #tpu.memory_space<vmem>>, vector<1x4x9xf32>,
    %c2_189 = arith.constant 2 : index
    %c1_190 = arith.constant 1 : index
    %c0_191 = arith.constant 0 : index
    %c0_192 = arith.constant 0 : index
    %767 = vector.load %arg1[%c2_189, %c1_190, %c0_191, %c0_192] : memref<6x2x9x13xf32, #tpu.memory_space<vmem>>, vector<1x1x9x13xf32>
    %768 = vector.shape_cast %767 : vector<1x1x9x13xf32> to vector<9x13xf32>
    %c2_193 = arith.constant 2 : index
    %c1_194 = arith.constant 1 : index
    %c0_195 = arith.constant 0 : index
    %c0_196 = arith.constant 0 : index
    %769 = vector.load %arg2[%c2_193, %c1_194, %c0_195, %c0_196] : memref<6x2x13x13xf32, #tpu.memory_space<vmem>>, vector<1x1x13x13xf32>
    %770 = vector.shape_cast %769 : vector<1x1x13x13xf32> to vector<13x13xf32>
    %cst_197 = arith.constant dense<0.000000e+00> : vector<9x13xf32>
    %771 = tpu.matmul %649, %768, %cst_197 {dimension_numbers = #tpu.dot_dimension_numbers<[1], [0], [0], [1], [0, 0, 1, 1], [], []>} : vector<9x9xf32>, vector<9x13xf32>, vector<9x13xf32> -> vector<9x13xf32>
    %cst_198 = arith.constant dense<0.000000e+00> : vector<13x13xf32>
    %772 = tpu.matmul %768, %771, %cst_198 {dimension_numbers = #tpu.dot_dimension_numbers<[0], [0], [1], [1], [0, 1, 1, 1], [], []>} : vector<9x13xf32>, vector<9x13xf32>, vector<13x13xf32> -> vector<13x13xf32>
    %773 = arith.addf %770, %772 : vector<13x13xf32>
    %774 = vector.extract_strided_slice %773 {offsets = [9, 0], sizes = [4, 13], strides = [1, 1]} : vector<13x13xf32> to vector<4x13xf32>
    %775 = vector.extract_strided_slice %774 {offsets = [0, 9], sizes = [1, 1], strides = [1, 1]} : vector<4x13xf32> to vector<1x1xf32>
    %776 = tpu.reciprocal %775 {approx = true} : vector<1x1xf32> -> vector<1x1xf32>
    %777 = arith.mulf %775, %776 : vector<1x1xf32>
    %cst_199 = arith.constant 2.000000e+00 : f32
    %778 = vector.broadcast %cst_199 : f32 to vector<1x1xf32>
    %779 = arith.subf %778, %777 : vector<1x1xf32>
    %780 = arith.mulf %776, %779 : vector<1x1xf32>
    %781 = vector.extract_strided_slice %774 {offsets = [0, 0], sizes = [1, 13], strides = [1, 1]} : vector<4x13xf32> to vector<1x13xf32>
    %782 = vector.broadcast %780 : vector<1x1xf32> to vector<1x13xf32>
    %783 = arith.mulf %781, %782 : vector<1x13xf32>
    %784 = vector.extract_strided_slice %774 {offsets = [0, 9], sizes = [4, 1], strides = [1, 1]} : vector<4x13xf32> to vector<4x1xf32>
    %c0_i32_200 = arith.constant 0 : i32
    %785 = vector.broadcast %c0_i32_200 : i32 to vector<4x1xi32>
    %786 = arith.cmpi eq, %0, %785 : vector<4x1xi32>
    %787 = vector.broadcast %784 : vector<4x1xf32> to vector<4x13xf32>
    %788 = vector.broadcast %783 : vector<1x13xf32> to vector<4x13xf32>
    %789 = arith.mulf %787, %788 : vector<4x13xf32>
    %790 = arith.subf %774, %789 : vector<4x13xf32>
    %791 = vector.shape_cast %786 : vector<4x1xi1> to vector<4x1xi1>
    %792 = vector.broadcast %791 : vector<4x1xi1> to vector<4x13xi1>
    %793 = vector.shape_cast %783 : vector<1x13xf32> to vector<1x13xf32>
    %794 = vector.broadcast %793 : vector<1x13xf32> to vector<4x13xf32>
    %795 = arith.select %792, %794, %790 : vector<4x13xi1>, vector<4x13xf32>
    %796 = vector.extract_strided_slice %795 {offsets = [1, 10], sizes = [1, 1], strides = [1, 1]} : vector<4x13xf32> to vector<1x1xf32>
    %797 = tpu.reciprocal %796 {approx = true} : vector<1x1xf32> -> vector<1x1xf32>
    %798 = arith.mulf %796, %797 : vector<1x1xf32>
    %cst_201 = arith.constant 2.000000e+00 : f32
    %799 = vector.broadcast %cst_201 : f32 to vector<1x1xf32>
    %800 = arith.subf %799, %798 : vector<1x1xf32>
    %801 = arith.mulf %797, %800 : vector<1x1xf32>
    %802 = vector.extract_strided_slice %795 {offsets = [1, 0], sizes = [1, 13], strides = [1, 1]} : vector<4x13xf32> to vector<1x13xf32>
    %803 = vector.broadcast %801 : vector<1x1xf32> to vector<1x13xf32>
    %804 = arith.mulf %802, %803 : vector<1x13xf32>
    %805 = vector.extract_strided_slice %795 {offsets = [0, 10], sizes = [4, 1], strides = [1, 1]} : vector<4x13xf32> to vector<4x1xf32>
    %c1_i32_202 = arith.constant 1 : i32
    %806 = vector.broadcast %c1_i32_202 : i32 to vector<4x1xi32>
    %807 = arith.cmpi eq, %0, %806 : vector<4x1xi32>
    %808 = vector.broadcast %805 : vector<4x1xf32> to vector<4x13xf32>
    %809 = vector.broadcast %804 : vector<1x13xf32> to vector<4x13xf32>
    %810 = arith.mulf %808, %809 : vector<4x13xf32>
    %811 = arith.subf %795, %810 : vector<4x13xf32>
    %812 = vector.shape_cast %807 : vector<4x1xi1> to vector<4x1xi1>
    %813 = vector.broadcast %812 : vector<4x1xi1> to vector<4x13xi1>
    %814 = vector.shape_cast %804 : vector<1x13xf32> to vector<1x13xf32>
    %815 = vector.broadcast %814 : vector<1x13xf32> to vector<4x13xf32>
    %816 = arith.select %813, %815, %811 : vector<4x13xi1>, vector<4x13xf32>
    %817 = vector.extract_strided_slice %816 {offsets = [2, 11], sizes = [1, 1], strides = [1, 1]} : vector<4x13xf32> to vector<1x1xf32>
    %818 = tpu.reciprocal %817 {approx = true} : vector<1x1xf32> -> vector<1x1xf32>
    %819 = arith.mulf %817, %818 : vector<1x1xf32>
    %cst_203 = arith.constant 2.000000e+00 : f32
    %820 = vector.broadcast %cst_203 : f32 to vector<1x1xf32>
    %821 = arith.subf %820, %819 : vector<1x1xf32>
    %822 = arith.mulf %818, %821 : vector<1x1xf32>
    %823 = vector.extract_strided_slice %816 {offsets = [2, 0], sizes = [1, 13], strides = [1, 1]} : vector<4x13xf32> to vector<1x13xf32>
    %824 = vector.broadcast %822 : vector<1x1xf32> to vector<1x13xf32>
    %825 = arith.mulf %823, %824 : vector<1x13xf32>
    %826 = vector.extract_strided_slice %816 {offsets = [0, 11], sizes = [4, 1], strides = [1, 1]} : vector<4x13xf32> to vector<4x1xf32>
    %c2_i32_204 = arith.constant 2 : i32
    %827 = vector.broadcast %c2_i32_204 : i32 to vector<4x1xi32>
    %828 = arith.cmpi eq, %0, %827 : vector<4x1xi32>
    %829 = vector.broadcast %826 : vector<4x1xf32> to vector<4x13xf32>
    %830 = vector.broadcast %825 : vector<1x13xf32> to vector<4x13xf32>
    %831 = arith.mulf %829, %830 : vector<4x13xf32>
    %832 = arith.subf %816, %831 : vector<4x13xf32>
    %833 = vector.shape_cast %828 : vector<4x1xi1> to vector<4x1xi1>
    %834 = vector.broadcast %833 : vector<4x1xi1> to vector<4x13xi1>
    %835 = vector.shape_cast %825 : vector<1x13xf32> to vector<1x13xf32>
    %836 = vector.broadcast %835 : vector<1x13xf32> to vector<4x13xf32>
    %837 = arith.select %834, %836, %832 : vector<4x13xi1>, vector<4x13xf32>
    %838 = vector.extract_strided_slice %837 {offsets = [3, 12], sizes = [1, 1], strides = [1, 1]} : vector<4x13xf32> to vector<1x1xf32>
    %839 = tpu.reciprocal %838 {approx = true} : vector<1x1xf32> -> vector<1x1xf32>
    %840 = arith.mulf %838, %839 : vector<1x1xf32>
    %cst_205 = arith.constant 2.000000e+00 : f32
    %841 = vector.broadcast %cst_205 : f32 to vector<1x1xf32>
    %842 = arith.subf %841, %840 : vector<1x1xf32>
    %843 = arith.mulf %839, %842 : vector<1x1xf32>
    %844 = vector.extract_strided_slice %837 {offsets = [3, 0], sizes = [1, 13], strides = [1, 1]} : vector<4x13xf32> to vector<1x13xf32>
    %845 = vector.broadcast %843 : vector<1x1xf32> to vector<1x13xf32>
    %846 = arith.mulf %844, %845 : vector<1x13xf32>
    %847 = vector.extract_strided_slice %837 {offsets = [0, 12], sizes = [4, 1], strides = [1, 1]} : vector<4x13xf32> to vector<4x1xf32>
    %c3_i32_206 = arith.constant 3 : i32
    %848 = vector.broadcast %c3_i32_206 : i32 to vector<4x1xi32>
    %849 = arith.cmpi eq, %0, %848 : vector<4x1xi32>
    %850 = vector.broadcast %847 : vector<4x1xf32> to vector<4x13xf32>
    %851 = vector.broadcast %846 : vector<1x13xf32> to vector<4x13xf32>
    %852 = arith.mulf %850, %851 : vector<4x13xf32>
    %853 = arith.subf %837, %852 : vector<4x13xf32>
    %854 = vector.shape_cast %849 : vector<4x1xi1> to vector<4x1xi1>
    %855 = vector.broadcast %854 : vector<4x1xi1> to vector<4x13xi1>
    %856 = vector.shape_cast %846 : vector<1x13xf32> to vector<1x13xf32>
    %857 = vector.broadcast %856 : vector<1x13xf32> to vector<4x13xf32>
    %858 = arith.select %855, %857, %853 : vector<4x13xi1>, vector<4x13xf32>
    %859 = vector.extract_strided_slice %858 {offsets = [0, 0], sizes = [4, 9], strides = [1, 1]} : vector<4x13xf32> to vector<4x9xf32>
    %cst_207 = arith.constant 0.000000e+00 : f32
    %860 = vector.broadcast %cst_207 : f32 to vector<4x9xf32>
    %861 = arith.subf %860, %859 : vector<4x9xf32>
    %862 = vector.extract_strided_slice %773 {offsets = [0, 0], sizes = [9, 9], strides = [1, 1]} : vector<13x13xf32> to vector<9x9xf32>
    %863 = vector.extract_strided_slice %773 {offsets = [0, 9], sizes = [9, 4], strides = [1, 1]} : vector<13x13xf32> to vector<9x4xf32>
    %cst_208 = arith.constant dense<0.000000e+00> : vector<9x9xf32>
    %864 = tpu.matmul %863, %861, %cst_208 {dimension_numbers = #tpu.dot_dimension_numbers<[1], [0], [0], [1], [0, 0, 1, 1], [], []>} : vector<9x4xf32>, vector<4x9xf32>, vector<9x9xf32> -> vector<9x9xf32>
    %865 = arith.addf %862, %864 : vector<9x9xf32>
    %c1_209 = arith.constant 1 : index
    %c0_210 = arith.constant 0 : index
    %c256_211 = arith.constant 256 : index
    %866 = vector.load %arg3[%c1_209, %c0_210, %c256_211] : memref<2x13x896xf32, #tpu.memory_space<vmem>>, vector<1x13x13xf32>
    %867 = vector.shape_cast %866 : vector<1x13x13xf32> to vector<13x13xf32>
    %868 = vector.shape_cast %773 : vector<13x13xf32> to vector<1x13x13xf32>
    tpu.vector_store %arg3[%c1_209, %c0_210, %c256_211], %868 {strides = array<i32>} : memref<2x13x896xf32, #tpu.memory_space<vmem>>, vector<1x13x13xf32>,
    %c1_212 = arith.constant 1 : index
    %c0_213 = arith.constant 0 : index
    %c269_214 = arith.constant 269 : index
    %869 = vector.load %arg3[%c1_212, %c0_213, %c269_214] : memref<2x13x896xf32, #tpu.memory_space<vmem>>, vector<1x9x9xf32>
    %870 = vector.shape_cast %869 : vector<1x9x9xf32> to vector<9x9xf32>
    %871 = vector.shape_cast %865 : vector<9x9xf32> to vector<1x9x9xf32>
    tpu.vector_store %arg3[%c1_212, %c0_213, %c269_214], %871 {strides = array<i32>} : memref<2x13x896xf32, #tpu.memory_space<vmem>>, vector<1x9x9xf32>,
    %c1_215 = arith.constant 1 : index
    %c0_216 = arith.constant 0 : index
    %c278_217 = arith.constant 278 : index
    %872 = vector.load %arg3[%c1_215, %c0_216, %c278_217] : memref<2x13x896xf32, #tpu.memory_space<vmem>>, vector<1x4x9xf32>
    %873 = vector.shape_cast %872 : vector<1x4x9xf32> to vector<4x9xf32>
    %874 = vector.shape_cast %861 : vector<4x9xf32> to vector<1x4x9xf32>
    tpu.vector_store %arg3[%c1_215, %c0_216, %c278_217], %874 {strides = array<i32>} : memref<2x13x896xf32, #tpu.memory_space<vmem>>, vector<1x4x9xf32>,
    %c1_218 = arith.constant 1 : index
    %c0_219 = arith.constant 0 : index
    %c0_220 = arith.constant 0 : index
    %c0_221 = arith.constant 0 : index
    %875 = vector.load %arg1[%c1_218, %c0_219, %c0_220, %c0_221] : memref<6x2x9x13xf32, #tpu.memory_space<vmem>>, vector<1x1x9x13xf32>
    %876 = vector.shape_cast %875 : vector<1x1x9x13xf32> to vector<9x13xf32>
    %c1_222 = arith.constant 1 : index
    %c0_223 = arith.constant 0 : index
    %c0_224 = arith.constant 0 : index
    %c0_225 = arith.constant 0 : index
    %877 = vector.load %arg2[%c1_222, %c0_223, %c0_224, %c0_225] : memref<6x2x13x13xf32, #tpu.memory_space<vmem>>, vector<1x1x13x13xf32>
    %878 = vector.shape_cast %877 : vector<1x1x13x13xf32> to vector<13x13xf32>
    %cst_226 = arith.constant dense<0.000000e+00> : vector<9x13xf32>
    %879 = tpu.matmul %757, %876, %cst_226 {dimension_numbers = #tpu.dot_dimension_numbers<[1], [0], [0], [1], [0, 0, 1, 1], [], []>} : vector<9x9xf32>, vector<9x13xf32>, vector<9x13xf32> -> vector<9x13xf32>
    %cst_227 = arith.constant dense<0.000000e+00> : vector<13x13xf32>
    %880 = tpu.matmul %876, %879, %cst_227 {dimension_numbers = #tpu.dot_dimension_numbers<[0], [0], [1], [1], [0, 1, 1, 1], [], []>} : vector<9x13xf32>, vector<9x13xf32>, vector<13x13xf32> -> vector<13x13xf32>
    %881 = arith.addf %878, %880 : vector<13x13xf32>
    %882 = vector.extract_strided_slice %881 {offsets = [9, 0], sizes = [4, 13], strides = [1, 1]} : vector<13x13xf32> to vector<4x13xf32>
    %883 = vector.extract_strided_slice %882 {offsets = [0, 9], sizes = [1, 1], strides = [1, 1]} : vector<4x13xf32> to vector<1x1xf32>
    %884 = tpu.reciprocal %883 {approx = true} : vector<1x1xf32> -> vector<1x1xf32>
    %885 = arith.mulf %883, %884 : vector<1x1xf32>
    %cst_228 = arith.constant 2.000000e+00 : f32
    %886 = vector.broadcast %cst_228 : f32 to vector<1x1xf32>
    %887 = arith.subf %886, %885 : vector<1x1xf32>
    %888 = arith.mulf %884, %887 : vector<1x1xf32>
    %889 = vector.extract_strided_slice %882 {offsets = [0, 0], sizes = [1, 13], strides = [1, 1]} : vector<4x13xf32> to vector<1x13xf32>
    %890 = vector.broadcast %888 : vector<1x1xf32> to vector<1x13xf32>
    %891 = arith.mulf %889, %890 : vector<1x13xf32>
    %892 = vector.extract_strided_slice %882 {offsets = [0, 9], sizes = [4, 1], strides = [1, 1]} : vector<4x13xf32> to vector<4x1xf32>
    %c0_i32_229 = arith.constant 0 : i32
    %893 = vector.broadcast %c0_i32_229 : i32 to vector<4x1xi32>
    %894 = arith.cmpi eq, %0, %893 : vector<4x1xi32>
    %895 = vector.broadcast %892 : vector<4x1xf32> to vector<4x13xf32>
    %896 = vector.broadcast %891 : vector<1x13xf32> to vector<4x13xf32>
    %897 = arith.mulf %895, %896 : vector<4x13xf32>
    %898 = arith.subf %882, %897 : vector<4x13xf32>
    %899 = vector.shape_cast %894 : vector<4x1xi1> to vector<4x1xi1>
    %900 = vector.broadcast %899 : vector<4x1xi1> to vector<4x13xi1>
    %901 = vector.shape_cast %891 : vector<1x13xf32> to vector<1x13xf32>
    %902 = vector.broadcast %901 : vector<1x13xf32> to vector<4x13xf32>
    %903 = arith.select %900, %902, %898 : vector<4x13xi1>, vector<4x13xf32>
    %904 = vector.extract_strided_slice %903 {offsets = [1, 10], sizes = [1, 1], strides = [1, 1]} : vector<4x13xf32> to vector<1x1xf32>
    %905 = tpu.reciprocal %904 {approx = true} : vector<1x1xf32> -> vector<1x1xf32>
    %906 = arith.mulf %904, %905 : vector<1x1xf32>
    %cst_230 = arith.constant 2.000000e+00 : f32
    %907 = vector.broadcast %cst_230 : f32 to vector<1x1xf32>
    %908 = arith.subf %907, %906 : vector<1x1xf32>
    %909 = arith.mulf %905, %908 : vector<1x1xf32>
    %910 = vector.extract_strided_slice %903 {offsets = [1, 0], sizes = [1, 13], strides = [1, 1]} : vector<4x13xf32> to vector<1x13xf32>
    %911 = vector.broadcast %909 : vector<1x1xf32> to vector<1x13xf32>
    %912 = arith.mulf %910, %911 : vector<1x13xf32>
    %913 = vector.extract_strided_slice %903 {offsets = [0, 10], sizes = [4, 1], strides = [1, 1]} : vector<4x13xf32> to vector<4x1xf32>
    %c1_i32_231 = arith.constant 1 : i32
    %914 = vector.broadcast %c1_i32_231 : i32 to vector<4x1xi32>
    %915 = arith.cmpi eq, %0, %914 : vector<4x1xi32>
    %916 = vector.broadcast %913 : vector<4x1xf32> to vector<4x13xf32>
    %917 = vector.broadcast %912 : vector<1x13xf32> to vector<4x13xf32>
    %918 = arith.mulf %916, %917 : vector<4x13xf32>
    %919 = arith.subf %903, %918 : vector<4x13xf32>
    %920 = vector.shape_cast %915 : vector<4x1xi1> to vector<4x1xi1>
    %921 = vector.broadcast %920 : vector<4x1xi1> to vector<4x13xi1>
    %922 = vector.shape_cast %912 : vector<1x13xf32> to vector<1x13xf32>
    %923 = vector.broadcast %922 : vector<1x13xf32> to vector<4x13xf32>
    %924 = arith.select %921, %923, %919 : vector<4x13xi1>, vector<4x13xf32>
    %925 = vector.extract_strided_slice %924 {offsets = [2, 11], sizes = [1, 1], strides = [1, 1]} : vector<4x13xf32> to vector<1x1xf32>
    %926 = tpu.reciprocal %925 {approx = true} : vector<1x1xf32> -> vector<1x1xf32>
    %927 = arith.mulf %925, %926 : vector<1x1xf32>
    %cst_232 = arith.constant 2.000000e+00 : f32
    %928 = vector.broadcast %cst_232 : f32 to vector<1x1xf32>
    %929 = arith.subf %928, %927 : vector<1x1xf32>
    %930 = arith.mulf %926, %929 : vector<1x1xf32>
    %931 = vector.extract_strided_slice %924 {offsets = [2, 0], sizes = [1, 13], strides = [1, 1]} : vector<4x13xf32> to vector<1x13xf32>
    %932 = vector.broadcast %930 : vector<1x1xf32> to vector<1x13xf32>
    %933 = arith.mulf %931, %932 : vector<1x13xf32>
    %934 = vector.extract_strided_slice %924 {offsets = [0, 11], sizes = [4, 1], strides = [1, 1]} : vector<4x13xf32> to vector<4x1xf32>
    %c2_i32_233 = arith.constant 2 : i32
    %935 = vector.broadcast %c2_i32_233 : i32 to vector<4x1xi32>
    %936 = arith.cmpi eq, %0, %935 : vector<4x1xi32>
    %937 = vector.broadcast %934 : vector<4x1xf32> to vector<4x13xf32>
    %938 = vector.broadcast %933 : vector<1x13xf32> to vector<4x13xf32>
    %939 = arith.mulf %937, %938 : vector<4x13xf32>
    %940 = arith.subf %924, %939 : vector<4x13xf32>
    %941 = vector.shape_cast %936 : vector<4x1xi1> to vector<4x1xi1>
    %942 = vector.broadcast %941 : vector<4x1xi1> to vector<4x13xi1>
    %943 = vector.shape_cast %933 : vector<1x13xf32> to vector<1x13xf32>
    %944 = vector.broadcast %943 : vector<1x13xf32> to vector<4x13xf32>
    %945 = arith.select %942, %944, %940 : vector<4x13xi1>, vector<4x13xf32>
    %946 = vector.extract_strided_slice %945 {offsets = [3, 12], sizes = [1, 1], strides = [1, 1]} : vector<4x13xf32> to vector<1x1xf32>
    %947 = tpu.reciprocal %946 {approx = true} : vector<1x1xf32> -> vector<1x1xf32>
    %948 = arith.mulf %946, %947 : vector<1x1xf32>
    %cst_234 = arith.constant 2.000000e+00 : f32
    %949 = vector.broadcast %cst_234 : f32 to vector<1x1xf32>
    %950 = arith.subf %949, %948 : vector<1x1xf32>
    %951 = arith.mulf %947, %950 : vector<1x1xf32>
    %952 = vector.extract_strided_slice %945 {offsets = [3, 0], sizes = [1, 13], strides = [1, 1]} : vector<4x13xf32> to vector<1x13xf32>
    %953 = vector.broadcast %951 : vector<1x1xf32> to vector<1x13xf32>
    %954 = arith.mulf %952, %953 : vector<1x13xf32>
    %955 = vector.extract_strided_slice %945 {offsets = [0, 12], sizes = [4, 1], strides = [1, 1]} : vector<4x13xf32> to vector<4x1xf32>
    %c3_i32_235 = arith.constant 3 : i32
    %956 = vector.broadcast %c3_i32_235 : i32 to vector<4x1xi32>
    %957 = arith.cmpi eq, %0, %956 : vector<4x1xi32>
    %958 = vector.broadcast %955 : vector<4x1xf32> to vector<4x13xf32>
    %959 = vector.broadcast %954 : vector<1x13xf32> to vector<4x13xf32>
    %960 = arith.mulf %958, %959 : vector<4x13xf32>
    %961 = arith.subf %945, %960 : vector<4x13xf32>
    %962 = vector.shape_cast %957 : vector<4x1xi1> to vector<4x1xi1>
    %963 = vector.broadcast %962 : vector<4x1xi1> to vector<4x13xi1>
    %964 = vector.shape_cast %954 : vector<1x13xf32> to vector<1x13xf32>
    %965 = vector.broadcast %964 : vector<1x13xf32> to vector<4x13xf32>
    %966 = arith.select %963, %965, %961 : vector<4x13xi1>, vector<4x13xf32>
    %967 = vector.extract_strided_slice %966 {offsets = [0, 0], sizes = [4, 9], strides = [1, 1]} : vector<4x13xf32> to vector<4x9xf32>
    %cst_236 = arith.constant 0.000000e+00 : f32
    %968 = vector.broadcast %cst_236 : f32 to vector<4x9xf32>
    %969 = arith.subf %968, %967 : vector<4x9xf32>
    %970 = vector.extract_strided_slice %881 {offsets = [0, 0], sizes = [9, 9], strides = [1, 1]} : vector<13x13xf32> to vector<9x9xf32>
    %971 = vector.extract_strided_slice %881 {offsets = [0, 9], sizes = [9, 4], strides = [1, 1]} : vector<13x13xf32> to vector<9x4xf32>
    %cst_237 = arith.constant dense<0.000000e+00> : vector<9x9xf32>
    %972 = tpu.matmul %971, %969, %cst_237 {dimension_numbers = #tpu.dot_dimension_numbers<[1], [0], [0], [1], [0, 0, 1, 1], [], []>} : vector<9x4xf32>, vector<4x9xf32>, vector<9x9xf32> -> vector<9x9xf32>
    %973 = arith.addf %970, %972 : vector<9x9xf32>
    %c0_238 = arith.constant 0 : index
    %c0_239 = arith.constant 0 : index
    %c128 = arith.constant 128 : index
    %974 = vector.load %arg3[%c0_238, %c0_239, %c128] : memref<2x13x896xf32, #tpu.memory_space<vmem>>, vector<1x13x13xf32>
    %975 = vector.shape_cast %974 : vector<1x13x13xf32> to vector<13x13xf32>
    %976 = vector.shape_cast %881 : vector<13x13xf32> to vector<1x13x13xf32>
    tpu.vector_store %arg3[%c0_238, %c0_239, %c128], %976 {strides = array<i32>} : memref<2x13x896xf32, #tpu.memory_space<vmem>>, vector<1x13x13xf32>,
    %c0_240 = arith.constant 0 : index
    %c0_241 = arith.constant 0 : index
    %c141 = arith.constant 141 : index
    %977 = vector.load %arg3[%c0_240, %c0_241, %c141] : memref<2x13x896xf32, #tpu.memory_space<vmem>>, vector<1x9x9xf32>
    %978 = vector.shape_cast %977 : vector<1x9x9xf32> to vector<9x9xf32>
    %979 = vector.shape_cast %973 : vector<9x9xf32> to vector<1x9x9xf32>
    tpu.vector_store %arg3[%c0_240, %c0_241, %c141], %979 {strides = array<i32>} : memref<2x13x896xf32, #tpu.memory_space<vmem>>, vector<1x9x9xf32>,
    %c0_242 = arith.constant 0 : index
    %c0_243 = arith.constant 0 : index
    %c150 = arith.constant 150 : index
    %980 = vector.load %arg3[%c0_242, %c0_243, %c150] : memref<2x13x896xf32, #tpu.memory_space<vmem>>, vector<1x4x9xf32>
    %981 = vector.shape_cast %980 : vector<1x4x9xf32> to vector<4x9xf32>
    %982 = vector.shape_cast %969 : vector<4x9xf32> to vector<1x4x9xf32>
    tpu.vector_store %arg3[%c0_242, %c0_243, %c150], %982 {strides = array<i32>} : memref<2x13x896xf32, #tpu.memory_space<vmem>>, vector<1x4x9xf32>,
    %c1_244 = arith.constant 1 : index
    %c1_245 = arith.constant 1 : index
    %c0_246 = arith.constant 0 : index
    %c0_247 = arith.constant 0 : index
    %983 = vector.load %arg1[%c1_244, %c1_245, %c0_246, %c0_247] : memref<6x2x9x13xf32, #tpu.memory_space<vmem>>, vector<1x1x9x13xf32>
    %984 = vector.shape_cast %983 : vector<1x1x9x13xf32> to vector<9x13xf32>
    %c1_248 = arith.constant 1 : index
    %c1_249 = arith.constant 1 : index
    %c0_250 = arith.constant 0 : index
    %c0_251 = arith.constant 0 : index
    %985 = vector.load %arg2[%c1_248, %c1_249, %c0_250, %c0_251] : memref<6x2x13x13xf32, #tpu.memory_space<vmem>>, vector<1x1x13x13xf32>
    %986 = vector.shape_cast %985 : vector<1x1x13x13xf32> to vector<13x13xf32>
    %cst_252 = arith.constant dense<0.000000e+00> : vector<9x13xf32>
    %987 = tpu.matmul %865, %984, %cst_252 {dimension_numbers = #tpu.dot_dimension_numbers<[1], [0], [0], [1], [0, 0, 1, 1], [], []>} : vector<9x9xf32>, vector<9x13xf32>, vector<9x13xf32> -> vector<9x13xf32>
    %cst_253 = arith.constant dense<0.000000e+00> : vector<13x13xf32>
    %988 = tpu.matmul %984, %987, %cst_253 {dimension_numbers = #tpu.dot_dimension_numbers<[0], [0], [1], [1], [0, 1, 1, 1], [], []>} : vector<9x13xf32>, vector<9x13xf32>, vector<13x13xf32> -> vector<13x13xf32>
    %989 = arith.addf %986, %988 : vector<13x13xf32>
    %990 = vector.extract_strided_slice %989 {offsets = [9, 0], sizes = [4, 13], strides = [1, 1]} : vector<13x13xf32> to vector<4x13xf32>
    %991 = vector.extract_strided_slice %990 {offsets = [0, 9], sizes = [1, 1], strides = [1, 1]} : vector<4x13xf32> to vector<1x1xf32>
    %992 = tpu.reciprocal %991 {approx = true} : vector<1x1xf32> -> vector<1x1xf32>
    %993 = arith.mulf %991, %992 : vector<1x1xf32>
    %cst_254 = arith.constant 2.000000e+00 : f32
    %994 = vector.broadcast %cst_254 : f32 to vector<1x1xf32>
    %995 = arith.subf %994, %993 : vector<1x1xf32>
    %996 = arith.mulf %992, %995 : vector<1x1xf32>
    %997 = vector.extract_strided_slice %990 {offsets = [0, 0], sizes = [1, 13], strides = [1, 1]} : vector<4x13xf32> to vector<1x13xf32>
    %998 = vector.broadcast %996 : vector<1x1xf32> to vector<1x13xf32>
    %999 = arith.mulf %997, %998 : vector<1x13xf32>
    %1000 = vector.extract_strided_slice %990 {offsets = [0, 9], sizes = [4, 1], strides = [1, 1]} : vector<4x13xf32> to vector<4x1xf32>
    %c0_i32_255 = arith.constant 0 : i32
    %1001 = vector.broadcast %c0_i32_255 : i32 to vector<4x1xi32>
    %1002 = arith.cmpi eq, %0, %1001 : vector<4x1xi32>
    %1003 = vector.broadcast %1000 : vector<4x1xf32> to vector<4x13xf32>
    %1004 = vector.broadcast %999 : vector<1x13xf32> to vector<4x13xf32>
    %1005 = arith.mulf %1003, %1004 : vector<4x13xf32>
    %1006 = arith.subf %990, %1005 : vector<4x13xf32>
    %1007 = vector.shape_cast %1002 : vector<4x1xi1> to vector<4x1xi1>
    %1008 = vector.broadcast %1007 : vector<4x1xi1> to vector<4x13xi1>
    %1009 = vector.shape_cast %999 : vector<1x13xf32> to vector<1x13xf32>
    %1010 = vector.broadcast %1009 : vector<1x13xf32> to vector<4x13xf32>
    %1011 = arith.select %1008, %1010, %1006 : vector<4x13xi1>, vector<4x13xf32>
    %1012 = vector.extract_strided_slice %1011 {offsets = [1, 10], sizes = [1, 1], strides = [1, 1]} : vector<4x13xf32> to vector<1x1xf32>
    %1013 = tpu.reciprocal %1012 {approx = true} : vector<1x1xf32> -> vector<1x1xf32>
    %1014 = arith.mulf %1012, %1013 : vector<1x1xf32>
    %cst_256 = arith.constant 2.000000e+00 : f32
    %1015 = vector.broadcast %cst_256 : f32 to vector<1x1xf32>
    %1016 = arith.subf %1015, %1014 : vector<1x1xf32>
    %1017 = arith.mulf %1013, %1016 : vector<1x1xf32>
    %1018 = vector.extract_strided_slice %1011 {offsets = [1, 0], sizes = [1, 13], strides = [1, 1]} : vector<4x13xf32> to vector<1x13xf32>
    %1019 = vector.broadcast %1017 : vector<1x1xf32> to vector<1x13xf32>
    %1020 = arith.mulf %1018, %1019 : vector<1x13xf32>
    %1021 = vector.extract_strided_slice %1011 {offsets = [0, 10], sizes = [4, 1], strides = [1, 1]} : vector<4x13xf32> to vector<4x1xf32>
    %c1_i32_257 = arith.constant 1 : i32
    %1022 = vector.broadcast %c1_i32_257 : i32 to vector<4x1xi32>
    %1023 = arith.cmpi eq, %0, %1022 : vector<4x1xi32>
    %1024 = vector.broadcast %1021 : vector<4x1xf32> to vector<4x13xf32>
    %1025 = vector.broadcast %1020 : vector<1x13xf32> to vector<4x13xf32>
    %1026 = arith.mulf %1024, %1025 : vector<4x13xf32>
    %1027 = arith.subf %1011, %1026 : vector<4x13xf32>
    %1028 = vector.shape_cast %1023 : vector<4x1xi1> to vector<4x1xi1>
    %1029 = vector.broadcast %1028 : vector<4x1xi1> to vector<4x13xi1>
    %1030 = vector.shape_cast %1020 : vector<1x13xf32> to vector<1x13xf32>
    %1031 = vector.broadcast %1030 : vector<1x13xf32> to vector<4x13xf32>
    %1032 = arith.select %1029, %1031, %1027 : vector<4x13xi1>, vector<4x13xf32>
    %1033 = vector.extract_strided_slice %1032 {offsets = [2, 11], sizes = [1, 1], strides = [1, 1]} : vector<4x13xf32> to vector<1x1xf32>
    %1034 = tpu.reciprocal %1033 {approx = true} : vector<1x1xf32> -> vector<1x1xf32>
    %1035 = arith.mulf %1033, %1034 : vector<1x1xf32>
    %cst_258 = arith.constant 2.000000e+00 : f32
    %1036 = vector.broadcast %cst_258 : f32 to vector<1x1xf32>
    %1037 = arith.subf %1036, %1035 : vector<1x1xf32>
    %1038 = arith.mulf %1034, %1037 : vector<1x1xf32>
    %1039 = vector.extract_strided_slice %1032 {offsets = [2, 0], sizes = [1, 13], strides = [1, 1]} : vector<4x13xf32> to vector<1x13xf32>
    %1040 = vector.broadcast %1038 : vector<1x1xf32> to vector<1x13xf32>
    %1041 = arith.mulf %1039, %1040 : vector<1x13xf32>
    %1042 = vector.extract_strided_slice %1032 {offsets = [0, 11], sizes = [4, 1], strides = [1, 1]} : vector<4x13xf32> to vector<4x1xf32>
    %c2_i32_259 = arith.constant 2 : i32
    %1043 = vector.broadcast %c2_i32_259 : i32 to vector<4x1xi32>
    %1044 = arith.cmpi eq, %0, %1043 : vector<4x1xi32>
    %1045 = vector.broadcast %1042 : vector<4x1xf32> to vector<4x13xf32>
    %1046 = vector.broadcast %1041 : vector<1x13xf32> to vector<4x13xf32>
    %1047 = arith.mulf %1045, %1046 : vector<4x13xf32>
    %1048 = arith.subf %1032, %1047 : vector<4x13xf32>
    %1049 = vector.shape_cast %1044 : vector<4x1xi1> to vector<4x1xi1>
    %1050 = vector.broadcast %1049 : vector<4x1xi1> to vector<4x13xi1>
    %1051 = vector.shape_cast %1041 : vector<1x13xf32> to vector<1x13xf32>
    %1052 = vector.broadcast %1051 : vector<1x13xf32> to vector<4x13xf32>
    %1053 = arith.select %1050, %1052, %1048 : vector<4x13xi1>, vector<4x13xf32>
    %1054 = vector.extract_strided_slice %1053 {offsets = [3, 12], sizes = [1, 1], strides = [1, 1]} : vector<4x13xf32> to vector<1x1xf32>
    %1055 = tpu.reciprocal %1054 {approx = true} : vector<1x1xf32> -> vector<1x1xf32>
    %1056 = arith.mulf %1054, %1055 : vector<1x1xf32>
    %cst_260 = arith.constant 2.000000e+00 : f32
    %1057 = vector.broadcast %cst_260 : f32 to vector<1x1xf32>
    %1058 = arith.subf %1057, %1056 : vector<1x1xf32>
    %1059 = arith.mulf %1055, %1058 : vector<1x1xf32>
    %1060 = vector.extract_strided_slice %1053 {offsets = [3, 0], sizes = [1, 13], strides = [1, 1]} : vector<4x13xf32> to vector<1x13xf32>
    %1061 = vector.broadcast %1059 : vector<1x1xf32> to vector<1x13xf32>
    %1062 = arith.mulf %1060, %1061 : vector<1x13xf32>
    %1063 = vector.extract_strided_slice %1053 {offsets = [0, 12], sizes = [4, 1], strides = [1, 1]} : vector<4x13xf32> to vector<4x1xf32>
    %c3_i32_261 = arith.constant 3 : i32
    %1064 = vector.broadcast %c3_i32_261 : i32 to vector<4x1xi32>
    %1065 = arith.cmpi eq, %0, %1064 : vector<4x1xi32>
    %1066 = vector.broadcast %1063 : vector<4x1xf32> to vector<4x13xf32>
    %1067 = vector.broadcast %1062 : vector<1x13xf32> to vector<4x13xf32>
    %1068 = arith.mulf %1066, %1067 : vector<4x13xf32>
    %1069 = arith.subf %1053, %1068 : vector<4x13xf32>
    %1070 = vector.shape_cast %1065 : vector<4x1xi1> to vector<4x1xi1>
    %1071 = vector.broadcast %1070 : vector<4x1xi1> to vector<4x13xi1>
    %1072 = vector.shape_cast %1062 : vector<1x13xf32> to vector<1x13xf32>
    %1073 = vector.broadcast %1072 : vector<1x13xf32> to vector<4x13xf32>
    %1074 = arith.select %1071, %1073, %1069 : vector<4x13xi1>, vector<4x13xf32>
    %1075 = vector.extract_strided_slice %1074 {offsets = [0, 0], sizes = [4, 9], strides = [1, 1]} : vector<4x13xf32> to vector<4x9xf32>
    %cst_262 = arith.constant 0.000000e+00 : f32
    %1076 = vector.broadcast %cst_262 : f32 to vector<4x9xf32>
    %1077 = arith.subf %1076, %1075 : vector<4x9xf32>
    %1078 = vector.extract_strided_slice %989 {offsets = [0, 0], sizes = [9, 9], strides = [1, 1]} : vector<13x13xf32> to vector<9x9xf32>
    %1079 = vector.extract_strided_slice %989 {offsets = [0, 9], sizes = [9, 4], strides = [1, 1]} : vector<13x13xf32> to vector<9x4xf32>
    %cst_263 = arith.constant dense<0.000000e+00> : vector<9x9xf32>
    %1080 = tpu.matmul %1079, %1077, %cst_263 {dimension_numbers = #tpu.dot_dimension_numbers<[1], [0], [0], [1], [0, 0, 1, 1], [], []>} : vector<9x4xf32>, vector<4x9xf32>, vector<9x9xf32> -> vector<9x9xf32>
    %1081 = arith.addf %1078, %1080 : vector<9x9xf32>
    %c1_264 = arith.constant 1 : index
    %c0_265 = arith.constant 0 : index
    %c128_266 = arith.constant 128 : index
    %1082 = vector.load %arg3[%c1_264, %c0_265, %c128_266] : memref<2x13x896xf32, #tpu.memory_space<vmem>>, vector<1x13x13xf32>
    %1083 = vector.shape_cast %1082 : vector<1x13x13xf32> to vector<13x13xf32>
    %1084 = vector.shape_cast %989 : vector<13x13xf32> to vector<1x13x13xf32>
    tpu.vector_store %arg3[%c1_264, %c0_265, %c128_266], %1084 {strides = array<i32>} : memref<2x13x896xf32, #tpu.memory_space<vmem>>, vector<1x13x13xf32>,
    %c1_267 = arith.constant 1 : index
    %c0_268 = arith.constant 0 : index
    %c141_269 = arith.constant 141 : index
    %1085 = vector.load %arg3[%c1_267, %c0_268, %c141_269] : memref<2x13x896xf32, #tpu.memory_space<vmem>>, vector<1x9x9xf32>
    %1086 = vector.shape_cast %1085 : vector<1x9x9xf32> to vector<9x9xf32>
    %1087 = vector.shape_cast %1081 : vector<9x9xf32> to vector<1x9x9xf32>
    tpu.vector_store %arg3[%c1_267, %c0_268, %c141_269], %1087 {strides = array<i32>} : memref<2x13x896xf32, #tpu.memory_space<vmem>>, vector<1x9x9xf32>,
    %c1_270 = arith.constant 1 : index
    %c0_271 = arith.constant 0 : index
    %c150_272 = arith.constant 150 : index
    %1088 = vector.load %arg3[%c1_270, %c0_271, %c150_272] : memref<2x13x896xf32, #tpu.memory_space<vmem>>, vector<1x4x9xf32>
    %1089 = vector.shape_cast %1088 : vector<1x4x9xf32> to vector<4x9xf32>
    %1090 = vector.shape_cast %1077 : vector<4x9xf32> to vector<1x4x9xf32>
    tpu.vector_store %arg3[%c1_270, %c0_271, %c150_272], %1090 {strides = array<i32>} : memref<2x13x896xf32, #tpu.memory_space<vmem>>, vector<1x4x9xf32>,
    %c0_273 = arith.constant 0 : index
    %c0_274 = arith.constant 0 : index
    %c0_275 = arith.constant 0 : index
    %c0_276 = arith.constant 0 : index
    %1091 = vector.load %arg1[%c0_273, %c0_274, %c0_275, %c0_276] : memref<6x2x9x13xf32, #tpu.memory_space<vmem>>, vector<1x1x9x13xf32>
    %1092 = vector.shape_cast %1091 : vector<1x1x9x13xf32> to vector<9x13xf32>
    %c0_277 = arith.constant 0 : index
    %c0_278 = arith.constant 0 : index
    %c0_279 = arith.constant 0 : index
    %c0_280 = arith.constant 0 : index
    %1093 = vector.load %arg2[%c0_277, %c0_278, %c0_279, %c0_280] : memref<6x2x13x13xf32, #tpu.memory_space<vmem>>, vector<1x1x13x13xf32>
    %1094 = vector.shape_cast %1093 : vector<1x1x13x13xf32> to vector<13x13xf32>
    %cst_281 = arith.constant dense<0.000000e+00> : vector<9x13xf32>
    %1095 = tpu.matmul %973, %1092, %cst_281 {dimension_numbers = #tpu.dot_dimension_numbers<[1], [0], [0], [1], [0, 0, 1, 1], [], []>} : vector<9x9xf32>, vector<9x13xf32>, vector<9x13xf32> -> vector<9x13xf32>
    %cst_282 = arith.constant dense<0.000000e+00> : vector<13x13xf32>
    %1096 = tpu.matmul %1092, %1095, %cst_282 {dimension_numbers = #tpu.dot_dimension_numbers<[0], [0], [1], [1], [0, 1, 1, 1], [], []>} : vector<9x13xf32>, vector<9x13xf32>, vector<13x13xf32> -> vector<13x13xf32>
    %1097 = arith.addf %1094, %1096 : vector<13x13xf32>
    %1098 = vector.extract_strided_slice %1097 {offsets = [9, 0], sizes = [4, 13], strides = [1, 1]} : vector<13x13xf32> to vector<4x13xf32>
    %1099 = vector.extract_strided_slice %1098 {offsets = [0, 9], sizes = [1, 1], strides = [1, 1]} : vector<4x13xf32> to vector<1x1xf32>
    %1100 = tpu.reciprocal %1099 {approx = true} : vector<1x1xf32> -> vector<1x1xf32>
    %1101 = arith.mulf %1099, %1100 : vector<1x1xf32>
    %cst_283 = arith.constant 2.000000e+00 : f32
    %1102 = vector.broadcast %cst_283 : f32 to vector<1x1xf32>
    %1103 = arith.subf %1102, %1101 : vector<1x1xf32>
    %1104 = arith.mulf %1100, %1103 : vector<1x1xf32>
    %1105 = vector.extract_strided_slice %1098 {offsets = [0, 0], sizes = [1, 13], strides = [1, 1]} : vector<4x13xf32> to vector<1x13xf32>
    %1106 = vector.broadcast %1104 : vector<1x1xf32> to vector<1x13xf32>
    %1107 = arith.mulf %1105, %1106 : vector<1x13xf32>
    %1108 = vector.extract_strided_slice %1098 {offsets = [0, 9], sizes = [4, 1], strides = [1, 1]} : vector<4x13xf32> to vector<4x1xf32>
    %c0_i32_284 = arith.constant 0 : i32
    %1109 = vector.broadcast %c0_i32_284 : i32 to vector<4x1xi32>
    %1110 = arith.cmpi eq, %0, %1109 : vector<4x1xi32>
    %1111 = vector.broadcast %1108 : vector<4x1xf32> to vector<4x13xf32>
    %1112 = vector.broadcast %1107 : vector<1x13xf32> to vector<4x13xf32>
    %1113 = arith.mulf %1111, %1112 : vector<4x13xf32>
    %1114 = arith.subf %1098, %1113 : vector<4x13xf32>
    %1115 = vector.shape_cast %1110 : vector<4x1xi1> to vector<4x1xi1>
    %1116 = vector.broadcast %1115 : vector<4x1xi1> to vector<4x13xi1>
    %1117 = vector.shape_cast %1107 : vector<1x13xf32> to vector<1x13xf32>
    %1118 = vector.broadcast %1117 : vector<1x13xf32> to vector<4x13xf32>
    %1119 = arith.select %1116, %1118, %1114 : vector<4x13xi1>, vector<4x13xf32>
    %1120 = vector.extract_strided_slice %1119 {offsets = [1, 10], sizes = [1, 1], strides = [1, 1]} : vector<4x13xf32> to vector<1x1xf32>
    %1121 = tpu.reciprocal %1120 {approx = true} : vector<1x1xf32> -> vector<1x1xf32>
    %1122 = arith.mulf %1120, %1121 : vector<1x1xf32>
    %cst_285 = arith.constant 2.000000e+00 : f32
    %1123 = vector.broadcast %cst_285 : f32 to vector<1x1xf32>
    %1124 = arith.subf %1123, %1122 : vector<1x1xf32>
    %1125 = arith.mulf %1121, %1124 : vector<1x1xf32>
    %1126 = vector.extract_strided_slice %1119 {offsets = [1, 0], sizes = [1, 13], strides = [1, 1]} : vector<4x13xf32> to vector<1x13xf32>
    %1127 = vector.broadcast %1125 : vector<1x1xf32> to vector<1x13xf32>
    %1128 = arith.mulf %1126, %1127 : vector<1x13xf32>
    %1129 = vector.extract_strided_slice %1119 {offsets = [0, 10], sizes = [4, 1], strides = [1, 1]} : vector<4x13xf32> to vector<4x1xf32>
    %c1_i32_286 = arith.constant 1 : i32
    %1130 = vector.broadcast %c1_i32_286 : i32 to vector<4x1xi32>
    %1131 = arith.cmpi eq, %0, %1130 : vector<4x1xi32>
    %1132 = vector.broadcast %1129 : vector<4x1xf32> to vector<4x13xf32>
    %1133 = vector.broadcast %1128 : vector<1x13xf32> to vector<4x13xf32>
    %1134 = arith.mulf %1132, %1133 : vector<4x13xf32>
    %1135 = arith.subf %1119, %1134 : vector<4x13xf32>
    %1136 = vector.shape_cast %1131 : vector<4x1xi1> to vector<4x1xi1>
    %1137 = vector.broadcast %1136 : vector<4x1xi1> to vector<4x13xi1>
    %1138 = vector.shape_cast %1128 : vector<1x13xf32> to vector<1x13xf32>
    %1139 = vector.broadcast %1138 : vector<1x13xf32> to vector<4x13xf32>
    %1140 = arith.select %1137, %1139, %1135 : vector<4x13xi1>, vector<4x13xf32>
    %1141 = vector.extract_strided_slice %1140 {offsets = [2, 11], sizes = [1, 1], strides = [1, 1]} : vector<4x13xf32> to vector<1x1xf32>
    %1142 = tpu.reciprocal %1141 {approx = true} : vector<1x1xf32> -> vector<1x1xf32>
    %1143 = arith.mulf %1141, %1142 : vector<1x1xf32>
    %cst_287 = arith.constant 2.000000e+00 : f32
    %1144 = vector.broadcast %cst_287 : f32 to vector<1x1xf32>
    %1145 = arith.subf %1144, %1143 : vector<1x1xf32>
    %1146 = arith.mulf %1142, %1145 : vector<1x1xf32>
    %1147 = vector.extract_strided_slice %1140 {offsets = [2, 0], sizes = [1, 13], strides = [1, 1]} : vector<4x13xf32> to vector<1x13xf32>
    %1148 = vector.broadcast %1146 : vector<1x1xf32> to vector<1x13xf32>
    %1149 = arith.mulf %1147, %1148 : vector<1x13xf32>
    %1150 = vector.extract_strided_slice %1140 {offsets = [0, 11], sizes = [4, 1], strides = [1, 1]} : vector<4x13xf32> to vector<4x1xf32>
    %c2_i32_288 = arith.constant 2 : i32
    %1151 = vector.broadcast %c2_i32_288 : i32 to vector<4x1xi32>
    %1152 = arith.cmpi eq, %0, %1151 : vector<4x1xi32>
    %1153 = vector.broadcast %1150 : vector<4x1xf32> to vector<4x13xf32>
    %1154 = vector.broadcast %1149 : vector<1x13xf32> to vector<4x13xf32>
    %1155 = arith.mulf %1153, %1154 : vector<4x13xf32>
    %1156 = arith.subf %1140, %1155 : vector<4x13xf32>
    %1157 = vector.shape_cast %1152 : vector<4x1xi1> to vector<4x1xi1>
    %1158 = vector.broadcast %1157 : vector<4x1xi1> to vector<4x13xi1>
    %1159 = vector.shape_cast %1149 : vector<1x13xf32> to vector<1x13xf32>
    %1160 = vector.broadcast %1159 : vector<1x13xf32> to vector<4x13xf32>
    %1161 = arith.select %1158, %1160, %1156 : vector<4x13xi1>, vector<4x13xf32>
    %1162 = vector.extract_strided_slice %1161 {offsets = [3, 12], sizes = [1, 1], strides = [1, 1]} : vector<4x13xf32> to vector<1x1xf32>
    %1163 = tpu.reciprocal %1162 {approx = true} : vector<1x1xf32> -> vector<1x1xf32>
    %1164 = arith.mulf %1162, %1163 : vector<1x1xf32>
    %cst_289 = arith.constant 2.000000e+00 : f32
    %1165 = vector.broadcast %cst_289 : f32 to vector<1x1xf32>
    %1166 = arith.subf %1165, %1164 : vector<1x1xf32>
    %1167 = arith.mulf %1163, %1166 : vector<1x1xf32>
    %1168 = vector.extract_strided_slice %1161 {offsets = [3, 0], sizes = [1, 13], strides = [1, 1]} : vector<4x13xf32> to vector<1x13xf32>
    %1169 = vector.broadcast %1167 : vector<1x1xf32> to vector<1x13xf32>
    %1170 = arith.mulf %1168, %1169 : vector<1x13xf32>
    %1171 = vector.extract_strided_slice %1161 {offsets = [0, 12], sizes = [4, 1], strides = [1, 1]} : vector<4x13xf32> to vector<4x1xf32>
    %c3_i32_290 = arith.constant 3 : i32
    %1172 = vector.broadcast %c3_i32_290 : i32 to vector<4x1xi32>
    %1173 = arith.cmpi eq, %0, %1172 : vector<4x1xi32>
    %1174 = vector.broadcast %1171 : vector<4x1xf32> to vector<4x13xf32>
    %1175 = vector.broadcast %1170 : vector<1x13xf32> to vector<4x13xf32>
    %1176 = arith.mulf %1174, %1175 : vector<4x13xf32>
    %1177 = arith.subf %1161, %1176 : vector<4x13xf32>
    %1178 = vector.shape_cast %1173 : vector<4x1xi1> to vector<4x1xi1>
    %1179 = vector.broadcast %1178 : vector<4x1xi1> to vector<4x13xi1>
    %1180 = vector.shape_cast %1170 : vector<1x13xf32> to vector<1x13xf32>
    %1181 = vector.broadcast %1180 : vector<1x13xf32> to vector<4x13xf32>
    %1182 = arith.select %1179, %1181, %1177 : vector<4x13xi1>, vector<4x13xf32>
    %1183 = vector.extract_strided_slice %1182 {offsets = [0, 0], sizes = [4, 9], strides = [1, 1]} : vector<4x13xf32> to vector<4x9xf32>
    %cst_291 = arith.constant 0.000000e+00 : f32
    %1184 = vector.broadcast %cst_291 : f32 to vector<4x9xf32>
    %1185 = arith.subf %1184, %1183 : vector<4x9xf32>
    %1186 = vector.extract_strided_slice %1097 {offsets = [0, 0], sizes = [9, 9], strides = [1, 1]} : vector<13x13xf32> to vector<9x9xf32>
    %1187 = vector.extract_strided_slice %1097 {offsets = [0, 9], sizes = [9, 4], strides = [1, 1]} : vector<13x13xf32> to vector<9x4xf32>
    %cst_292 = arith.constant dense<0.000000e+00> : vector<9x9xf32>
    %1188 = tpu.matmul %1187, %1185, %cst_292 {dimension_numbers = #tpu.dot_dimension_numbers<[1], [0], [0], [1], [0, 0, 1, 1], [], []>} : vector<9x4xf32>, vector<4x9xf32>, vector<9x9xf32> -> vector<9x9xf32>
    %1189 = arith.addf %1186, %1188 : vector<9x9xf32>
    %c0_293 = arith.constant 0 : index
    %c0_294 = arith.constant 0 : index
    %c0_295 = arith.constant 0 : index
    %1190 = vector.load %arg3[%c0_293, %c0_294, %c0_295] : memref<2x13x896xf32, #tpu.memory_space<vmem>>, vector<1x13x13xf32>
    %1191 = vector.shape_cast %1190 : vector<1x13x13xf32> to vector<13x13xf32>
    %1192 = vector.shape_cast %1097 : vector<13x13xf32> to vector<1x13x13xf32>
    tpu.vector_store %arg3[%c0_293, %c0_294, %c0_295], %1192 {strides = array<i32>} : memref<2x13x896xf32, #tpu.memory_space<vmem>>, vector<1x13x13xf32>,
    %c0_296 = arith.constant 0 : index
    %c0_297 = arith.constant 0 : index
    %c13 = arith.constant 13 : index
    %1193 = vector.load %arg3[%c0_296, %c0_297, %c13] : memref<2x13x896xf32, #tpu.memory_space<vmem>>, vector<1x9x9xf32>
    %1194 = vector.shape_cast %1193 : vector<1x9x9xf32> to vector<9x9xf32>
    %1195 = vector.shape_cast %1189 : vector<9x9xf32> to vector<1x9x9xf32>
    tpu.vector_store %arg3[%c0_296, %c0_297, %c13], %1195 {strides = array<i32>} : memref<2x13x896xf32, #tpu.memory_space<vmem>>, vector<1x9x9xf32>,
    %c0_298 = arith.constant 0 : index
    %c0_299 = arith.constant 0 : index
    %c22 = arith.constant 22 : index
    %1196 = vector.load %arg3[%c0_298, %c0_299, %c22] : memref<2x13x896xf32, #tpu.memory_space<vmem>>, vector<1x4x9xf32>
    %1197 = vector.shape_cast %1196 : vector<1x4x9xf32> to vector<4x9xf32>
    %1198 = vector.shape_cast %1185 : vector<4x9xf32> to vector<1x4x9xf32>
    tpu.vector_store %arg3[%c0_298, %c0_299, %c22], %1198 {strides = array<i32>} : memref<2x13x896xf32, #tpu.memory_space<vmem>>, vector<1x4x9xf32>,
    %c0_300 = arith.constant 0 : index
    %c1_301 = arith.constant 1 : index
    %c0_302 = arith.constant 0 : index
    %c0_303 = arith.constant 0 : index
    %1199 = vector.load %arg1[%c0_300, %c1_301, %c0_302, %c0_303] : memref<6x2x9x13xf32, #tpu.memory_space<vmem>>, vector<1x1x9x13xf32>
    %1200 = vector.shape_cast %1199 : vector<1x1x9x13xf32> to vector<9x13xf32>
    %c0_304 = arith.constant 0 : index
    %c1_305 = arith.constant 1 : index
    %c0_306 = arith.constant 0 : index
    %c0_307 = arith.constant 0 : index
    %1201 = vector.load %arg2[%c0_304, %c1_305, %c0_306, %c0_307] : memref<6x2x13x13xf32, #tpu.memory_space<vmem>>, vector<1x1x13x13xf32>
    %1202 = vector.shape_cast %1201 : vector<1x1x13x13xf32> to vector<13x13xf32>
    %cst_308 = arith.constant dense<0.000000e+00> : vector<9x13xf32>
    %1203 = tpu.matmul %1081, %1200, %cst_308 {dimension_numbers = #tpu.dot_dimension_numbers<[1], [0], [0], [1], [0, 0, 1, 1], [], []>} : vector<9x9xf32>, vector<9x13xf32>, vector<9x13xf32> -> vector<9x13xf32>
    %cst_309 = arith.constant dense<0.000000e+00> : vector<13x13xf32>
    %1204 = tpu.matmul %1200, %1203, %cst_309 {dimension_numbers = #tpu.dot_dimension_numbers<[0], [0], [1], [1], [0, 1, 1, 1], [], []>} : vector<9x13xf32>, vector<9x13xf32>, vector<13x13xf32> -> vector<13x13xf32>
    %1205 = arith.addf %1202, %1204 : vector<13x13xf32>
    %1206 = vector.extract_strided_slice %1205 {offsets = [9, 0], sizes = [4, 13], strides = [1, 1]} : vector<13x13xf32> to vector<4x13xf32>
    %1207 = vector.extract_strided_slice %1206 {offsets = [0, 9], sizes = [1, 1], strides = [1, 1]} : vector<4x13xf32> to vector<1x1xf32>
    %1208 = tpu.reciprocal %1207 {approx = true} : vector<1x1xf32> -> vector<1x1xf32>
    %1209 = arith.mulf %1207, %1208 : vector<1x1xf32>
    %cst_310 = arith.constant 2.000000e+00 : f32
    %1210 = vector.broadcast %cst_310 : f32 to vector<1x1xf32>
    %1211 = arith.subf %1210, %1209 : vector<1x1xf32>
    %1212 = arith.mulf %1208, %1211 : vector<1x1xf32>
    %1213 = vector.extract_strided_slice %1206 {offsets = [0, 0], sizes = [1, 13], strides = [1, 1]} : vector<4x13xf32> to vector<1x13xf32>
    %1214 = vector.broadcast %1212 : vector<1x1xf32> to vector<1x13xf32>
    %1215 = arith.mulf %1213, %1214 : vector<1x13xf32>
    %1216 = vector.extract_strided_slice %1206 {offsets = [0, 9], sizes = [4, 1], strides = [1, 1]} : vector<4x13xf32> to vector<4x1xf32>
    %c0_i32_311 = arith.constant 0 : i32
    %1217 = vector.broadcast %c0_i32_311 : i32 to vector<4x1xi32>
    %1218 = arith.cmpi eq, %0, %1217 : vector<4x1xi32>
    %1219 = vector.broadcast %1216 : vector<4x1xf32> to vector<4x13xf32>
    %1220 = vector.broadcast %1215 : vector<1x13xf32> to vector<4x13xf32>
    %1221 = arith.mulf %1219, %1220 : vector<4x13xf32>
    %1222 = arith.subf %1206, %1221 : vector<4x13xf32>
    %1223 = vector.shape_cast %1218 : vector<4x1xi1> to vector<4x1xi1>
    %1224 = vector.broadcast %1223 : vector<4x1xi1> to vector<4x13xi1>
    %1225 = vector.shape_cast %1215 : vector<1x13xf32> to vector<1x13xf32>
    %1226 = vector.broadcast %1225 : vector<1x13xf32> to vector<4x13xf32>
    %1227 = arith.select %1224, %1226, %1222 : vector<4x13xi1>, vector<4x13xf32>
    %1228 = vector.extract_strided_slice %1227 {offsets = [1, 10], sizes = [1, 1], strides = [1, 1]} : vector<4x13xf32> to vector<1x1xf32>
    %1229 = tpu.reciprocal %1228 {approx = true} : vector<1x1xf32> -> vector<1x1xf32>
    %1230 = arith.mulf %1228, %1229 : vector<1x1xf32>
    %cst_312 = arith.constant 2.000000e+00 : f32
    %1231 = vector.broadcast %cst_312 : f32 to vector<1x1xf32>
    %1232 = arith.subf %1231, %1230 : vector<1x1xf32>
    %1233 = arith.mulf %1229, %1232 : vector<1x1xf32>
    %1234 = vector.extract_strided_slice %1227 {offsets = [1, 0], sizes = [1, 13], strides = [1, 1]} : vector<4x13xf32> to vector<1x13xf32>
    %1235 = vector.broadcast %1233 : vector<1x1xf32> to vector<1x13xf32>
    %1236 = arith.mulf %1234, %1235 : vector<1x13xf32>
    %1237 = vector.extract_strided_slice %1227 {offsets = [0, 10], sizes = [4, 1], strides = [1, 1]} : vector<4x13xf32> to vector<4x1xf32>
    %c1_i32_313 = arith.constant 1 : i32
    %1238 = vector.broadcast %c1_i32_313 : i32 to vector<4x1xi32>
    %1239 = arith.cmpi eq, %0, %1238 : vector<4x1xi32>
    %1240 = vector.broadcast %1237 : vector<4x1xf32> to vector<4x13xf32>
    %1241 = vector.broadcast %1236 : vector<1x13xf32> to vector<4x13xf32>
    %1242 = arith.mulf %1240, %1241 : vector<4x13xf32>
    %1243 = arith.subf %1227, %1242 : vector<4x13xf32>
    %1244 = vector.shape_cast %1239 : vector<4x1xi1> to vector<4x1xi1>
    %1245 = vector.broadcast %1244 : vector<4x1xi1> to vector<4x13xi1>
    %1246 = vector.shape_cast %1236 : vector<1x13xf32> to vector<1x13xf32>
    %1247 = vector.broadcast %1246 : vector<1x13xf32> to vector<4x13xf32>
    %1248 = arith.select %1245, %1247, %1243 : vector<4x13xi1>, vector<4x13xf32>
    %1249 = vector.extract_strided_slice %1248 {offsets = [2, 11], sizes = [1, 1], strides = [1, 1]} : vector<4x13xf32> to vector<1x1xf32>
    %1250 = tpu.reciprocal %1249 {approx = true} : vector<1x1xf32> -> vector<1x1xf32>
    %1251 = arith.mulf %1249, %1250 : vector<1x1xf32>
    %cst_314 = arith.constant 2.000000e+00 : f32
    %1252 = vector.broadcast %cst_314 : f32 to vector<1x1xf32>
    %1253 = arith.subf %1252, %1251 : vector<1x1xf32>
    %1254 = arith.mulf %1250, %1253 : vector<1x1xf32>
    %1255 = vector.extract_strided_slice %1248 {offsets = [2, 0], sizes = [1, 13], strides = [1, 1]} : vector<4x13xf32> to vector<1x13xf32>
    %1256 = vector.broadcast %1254 : vector<1x1xf32> to vector<1x13xf32>
    %1257 = arith.mulf %1255, %1256 : vector<1x13xf32>
    %1258 = vector.extract_strided_slice %1248 {offsets = [0, 11], sizes = [4, 1], strides = [1, 1]} : vector<4x13xf32> to vector<4x1xf32>
    %c2_i32_315 = arith.constant 2 : i32
    %1259 = vector.broadcast %c2_i32_315 : i32 to vector<4x1xi32>
    %1260 = arith.cmpi eq, %0, %1259 : vector<4x1xi32>
    %1261 = vector.broadcast %1258 : vector<4x1xf32> to vector<4x13xf32>
    %1262 = vector.broadcast %1257 : vector<1x13xf32> to vector<4x13xf32>
    %1263 = arith.mulf %1261, %1262 : vector<4x13xf32>
    %1264 = arith.subf %1248, %1263 : vector<4x13xf32>
    %1265 = vector.shape_cast %1260 : vector<4x1xi1> to vector<4x1xi1>
    %1266 = vector.broadcast %1265 : vector<4x1xi1> to vector<4x13xi1>
    %1267 = vector.shape_cast %1257 : vector<1x13xf32> to vector<1x13xf32>
    %1268 = vector.broadcast %1267 : vector<1x13xf32> to vector<4x13xf32>
    %1269 = arith.select %1266, %1268, %1264 : vector<4x13xi1>, vector<4x13xf32>
    %1270 = vector.extract_strided_slice %1269 {offsets = [3, 12], sizes = [1, 1], strides = [1, 1]} : vector<4x13xf32> to vector<1x1xf32>
    %1271 = tpu.reciprocal %1270 {approx = true} : vector<1x1xf32> -> vector<1x1xf32>
    %1272 = arith.mulf %1270, %1271 : vector<1x1xf32>
    %cst_316 = arith.constant 2.000000e+00 : f32
    %1273 = vector.broadcast %cst_316 : f32 to vector<1x1xf32>
    %1274 = arith.subf %1273, %1272 : vector<1x1xf32>
    %1275 = arith.mulf %1271, %1274 : vector<1x1xf32>
    %1276 = vector.extract_strided_slice %1269 {offsets = [3, 0], sizes = [1, 13], strides = [1, 1]} : vector<4x13xf32> to vector<1x13xf32>
    %1277 = vector.broadcast %1275 : vector<1x1xf32> to vector<1x13xf32>
    %1278 = arith.mulf %1276, %1277 : vector<1x13xf32>
    %1279 = vector.extract_strided_slice %1269 {offsets = [0, 12], sizes = [4, 1], strides = [1, 1]} : vector<4x13xf32> to vector<4x1xf32>
    %c3_i32_317 = arith.constant 3 : i32
    %1280 = vector.broadcast %c3_i32_317 : i32 to vector<4x1xi32>
    %1281 = arith.cmpi eq, %0, %1280 : vector<4x1xi32>
    %1282 = vector.broadcast %1279 : vector<4x1xf32> to vector<4x13xf32>
    %1283 = vector.broadcast %1278 : vector<1x13xf32> to vector<4x13xf32>
    %1284 = arith.mulf %1282, %1283 : vector<4x13xf32>
    %1285 = arith.subf %1269, %1284 : vector<4x13xf32>
    %1286 = vector.shape_cast %1281 : vector<4x1xi1> to vector<4x1xi1>
    %1287 = vector.broadcast %1286 : vector<4x1xi1> to vector<4x13xi1>
    %1288 = vector.shape_cast %1278 : vector<1x13xf32> to vector<1x13xf32>
    %1289 = vector.broadcast %1288 : vector<1x13xf32> to vector<4x13xf32>
    %1290 = arith.select %1287, %1289, %1285 : vector<4x13xi1>, vector<4x13xf32>
    %1291 = vector.extract_strided_slice %1290 {offsets = [0, 0], sizes = [4, 9], strides = [1, 1]} : vector<4x13xf32> to vector<4x9xf32>
    %cst_318 = arith.constant 0.000000e+00 : f32
    %1292 = vector.broadcast %cst_318 : f32 to vector<4x9xf32>
    %1293 = arith.subf %1292, %1291 : vector<4x9xf32>
    %1294 = vector.extract_strided_slice %1205 {offsets = [0, 0], sizes = [9, 9], strides = [1, 1]} : vector<13x13xf32> to vector<9x9xf32>
    %1295 = vector.extract_strided_slice %1205 {offsets = [0, 9], sizes = [9, 4], strides = [1, 1]} : vector<13x13xf32> to vector<9x4xf32>
    %cst_319 = arith.constant dense<0.000000e+00> : vector<9x9xf32>
    %1296 = tpu.matmul %1295, %1293, %cst_319 {dimension_numbers = #tpu.dot_dimension_numbers<[1], [0], [0], [1], [0, 0, 1, 1], [], []>} : vector<9x4xf32>, vector<4x9xf32>, vector<9x9xf32> -> vector<9x9xf32>
    %1297 = arith.addf %1294, %1296 : vector<9x9xf32>
    %c1_320 = arith.constant 1 : index
    %c0_321 = arith.constant 0 : index
    %c0_322 = arith.constant 0 : index
    %1298 = vector.load %arg3[%c1_320, %c0_321, %c0_322] : memref<2x13x896xf32, #tpu.memory_space<vmem>>, vector<1x13x13xf32>
    %1299 = vector.shape_cast %1298 : vector<1x13x13xf32> to vector<13x13xf32>
    %1300 = vector.shape_cast %1205 : vector<13x13xf32> to vector<1x13x13xf32>
    tpu.vector_store %arg3[%c1_320, %c0_321, %c0_322], %1300 {strides = array<i32>} : memref<2x13x896xf32, #tpu.memory_space<vmem>>, vector<1x13x13xf32>,
    %c1_323 = arith.constant 1 : index
    %c0_324 = arith.constant 0 : index
    %c13_325 = arith.constant 13 : index
    %1301 = vector.load %arg3[%c1_323, %c0_324, %c13_325] : memref<2x13x896xf32, #tpu.memory_space<vmem>>, vector<1x9x9xf32>
    %1302 = vector.shape_cast %1301 : vector<1x9x9xf32> to vector<9x9xf32>
    %1303 = vector.shape_cast %1297 : vector<9x9xf32> to vector<1x9x9xf32>
    tpu.vector_store %arg3[%c1_323, %c0_324, %c13_325], %1303 {strides = array<i32>} : memref<2x13x896xf32, #tpu.memory_space<vmem>>, vector<1x9x9xf32>,
    %c1_326 = arith.constant 1 : index
    %c0_327 = arith.constant 0 : index
    %c22_328 = arith.constant 22 : index
    %1304 = vector.load %arg3[%c1_326, %c0_327, %c22_328] : memref<2x13x896xf32, #tpu.memory_space<vmem>>, vector<1x4x9xf32>
    %1305 = vector.shape_cast %1304 : vector<1x4x9xf32> to vector<4x9xf32>
    %1306 = vector.shape_cast %1293 : vector<4x9xf32> to vector<1x4x9xf32>
    tpu.vector_store %arg3[%c1_326, %c0_327, %c22_328], %1306 {strides = array<i32>} : memref<2x13x896xf32, #tpu.memory_space<vmem>>, vector<1x4x9xf32>,
    return
  }
  func.func @transform_0(%arg0: i32) -> (i32, i32, i32, i32) {
    %c0_i32 = arith.constant 0 : i32
    %c0_i32_0 = arith.constant 0 : i32
    %c0_i32_1 = arith.constant 0 : i32
    %c0_i32_2 = arith.constant 0 : i32
    return %c0_i32, %arg0, %c0_i32_0, %c0_i32_1 : i32, i32, i32, i32
  }
  func.func @transform_1(%arg0: i32) -> (i32, i32, i32, i32) {
    %c0_i32 = arith.constant 0 : i32
    %c0_i32_0 = arith.constant 0 : i32
    %c0_i32_1 = arith.constant 0 : i32
    %c0_i32_2 = arith.constant 0 : i32
    return %c0_i32, %arg0, %c0_i32_0, %c0_i32_1 : i32, i32, i32, i32
  }
  func.func @transform_2(%arg0: i32) -> (i32, i32, i32) {
    %c0_i32 = arith.constant 0 : i32
    %c0_i32_0 = arith.constant 0 : i32
    %c0_i32_1 = arith.constant 0 : i32
    return %arg0, %c0_i32, %c0_i32_0 : i32, i32, i32
  }
}

</mosaic_0001>

<bundles_post_ra>
// kernel: _lambda_.1
= control target key start
LH: loop header
LB: loop body
LE: loop exit
PB: predicated region body
PF: predicated region fallthrough
CT: control target
= control target key end

     0   :  { %vm30_vm0 = vcmask 1040384   ;;  %vm13_vm1 = vcmask 179304   ;;  %v3183_v2 = vmov 0.0   ;;  %vm15_vm2 = vcmask 172136   ;;  %s3188_s5 = smov 119   ;;  %s3189_s29 = smov 13   ;;  %s4275_s0 = inlined_call_operand.vmem [shape: f32[6,2,9,13], index: 0, kind: input, shape index: {}]   ;;  %s4276_s2 = inlined_call_operand.vmem [shape: f32[2,13,896], index: 2, kind: output, shape index: {}]   ;;  %s4277_s1 = inlined_call_operand.vmem [shape: f32[6,2,13,13], index: 1, kind: input, shape index: {}]  }
   0x1   :  { %v2858_v0 = vld [vmem:[%s4275_s0 + $0xa0] sm:$0xff]  ;;  %v2859_v1 = vld [vmem:[%s4275_s0 + $0xa8] sm:$0x1]  ;;  %14 = vst.msk [vmem:[%s4276_s2 + $0x30] sm:$0xff] %vm13_vm1, %v3183_v2  ;;  %vm26_vm3 = vcmask 72704   ;;  %v3184_v7 = vmov 9   ;;  %v11_v21 = vlaneseq }
   0x2   :  { %57 = vxpose.xlu0.b32.start [1/2] (short) (narrow) %v2858_v0, 16  ;;  %2862 = vmatpush.msk.msra.mxu0 %vm30_vm0, %v2859_v1  ;;  %16 = vst.msk [vmem:[%s4276_s2 + $0x68] sm:$0x1] %vm15_vm2, %v3183_v2  ;;  %v2860_v8 = vld [vmem:[%s4277_s1 + $0xa0] sm:$0xff]  ;;  %vm254_vm4 = vcmask 105472   ;;  %vm256_vm5 = vcmask 102400  }
   0x3   :  { %2856 = vst.msk [vmem:[%s4276_s2 + $0xa0] sm:$0xff] %vm13_vm1, %v3183_v2  ;;  %3044 = vset.pattern.permute.xlu1 %v3184_v7  ;;  %v2861_v11 = vld [vmem:[%s4277_s1 + $0xa8] sm:$0x1f]  ;;  %v3185_v18 = vmov 10   ;;  %v3264_v23 = vshrl.u32 %v11_v21, 7  ;;  %v3186_v33 = vmov 11  }
   0x4   :  { %49 = vmatpush.msra.mxu0 %v2858_v0  ;;  %2857 = vst.msk [vmem:[%s4276_s2 + $0xd8] sm:$0x1] %vm15_vm2, %v3183_v2  ;;  %3045 = vset.pattern.permute.xlu2 %v3185_v18  ;;  %v3187_v45 = vmov 12   ;;  %v2870_v46 = vld [vmem:[%s4275_s0 + $0xb8] sm:$0x1]  ;;  %v2869_v47 = vld [vmem:[%s4275_s0 + $0xb0] sm:$0xff] }
   0x5   :  { %50 = vmatmul.f32.vlgmr.msra.gmra.mxu0 %v3183_v2  ;;  %vm133_vm6 = vcmp.eq.s32.totalorder %v3264_v23, 0  ;;  %vm158_vm7 = vcmp.eq.s32.totalorder %v3264_v23, 1  ;;  %2873 = vmatpush.msk.msra.mxu3 %vm30_vm0, %v2870_v46  ;;  %vm180_vm8 = vcmp.eq.s32.totalorder %v3264_v23, 2  ;;  %vm202_vm9 = vcmp.eq.s32.totalorder %v3264_v23, 3  ;;  %s3190_s9 = smov 22  }
   0x6   :  { %vm225_vm10 = vcmask 1043456   ;;  %vm220_vm11 = vcmask 31744   ;;  %vm271_vm12 = vcmask 249008  }
   0x7   :  { %297 = vmatpush.msra.mxu3 %v2869_v47 }
   0x8   :  { %298 = vmatmul.f32.vlgmr.msra.gmra.mxu3 %v3183_v2 }
   0xa   :  { %58 = vxpose.xlu0.b32.end [2/2] (short) (narrow) %v2859_v1, 16 }
   0xd   :  { %53 = vmatmul.f32.gmra.mxu0 %v3183_v2 }
  0x10   :  { %301 = vmatmul.f32.gmra.mxu3 %v3183_v2 }
  0x71   :  { %3046 = vset.pattern.permute.xlu0 %v3186_v33 }
  0x82   :  { %v51_v3 = vpop.f32.mrf.mxu0 }
  0x8a   :  { %v54_v4 = vpop.f32.mrf.mxu0 }
  0x8b   :  { %2863 = vmatpush.msk.msra.mxu1 %vm30_vm0, %v54_v4  ;;  %v299_v4 = vpop.f32.mrf.mxu3 }
  0x8d   :  { %113 = vmatpush.msra.mxu1 %v51_v3 }
  0xa6   :  { %v73_v5 = vpop.trf.xlu0 }
  0xa7   :  { %2864 = vmatmul.msk.f32.vlgmr.msra.gmra.mxu1 %vm26_vm3, %v73_v5 }
  0xae   :  { %v74_v6 = vpop.trf.xlu0 }
  0xaf   :  { %2865 = vmatmul.msk.f32.gmra.mxu1 %vm26_vm3, %v74_v6  ;;  %v302_v6 = vpop.f32.mrf.mxu3 }
 0x124   :  { %v115_v9 = vpop.f32.mrf.mxu1 }
 0x125   :  { %v3242_v10 = vadd.f32 %v2860_v8, %v115_v9 }
 0x127   :  { %255 = vst.msk [vmem:[%s4276_s2 + $0x28] sm:$0xff] %vm254_vm4, %v3242_v10 }
 0x12c   :  { %v118_v12 = vpop.f32.mrf.mxu1 }
 0x12d   :  { %v3252_v13 = vadd.f32 %v2861_v11, %v118_v12  ;;  %v3312_v11 = vld [vmem:[%s4275_s0 + $0x88] sm:$0x1]  ;;  %v3319_v12 = vld [vmem:[%s4275_s0 + $0x80] sm:$0xff] }
 0x12e   :  { %2889 = vmatpush.msk.msrb.mxu1 %vm30_vm0, %v3312_v11 }
 0x12f   :  { %3087 = vrcp.f32 %v3252_v13  ;;  %257 = vst.msk [vmem:[%s4276_s2 + $0x60] sm:$0x1f] %vm256_vm5, %v3252_v13 }
 0x130   :  { %532 = vmatpush.msrb.mxu1 %v3319_v12 }
 0x135   :  { %v3088_v14 = vpop.eup %3087 }
 0x136   :  { %v124_v15 = vmul.f32 %v3088_v14, %v3252_v13 }
 0x138   :  { %v125_v16 = vsub.f32 2.0, %v124_v15 }
 0x13a   :  { %v126_v17 = vmul.f32 %v3088_v14, %v125_v16 }
 0x13c   :  { %129 = vperm.xlu1 %3044, %v126_v17  }
 0x144   :  { %136 = vperm.xlu1 %3044, %v3252_v13  }
 0x14c   :  { %3047 = vset.pattern.permute.xlu1 %v3186_v33 }
 0x1ae   :  { %v130_v19 = vpop.permute.xlu1 %129 }
 0x1af   :  { %v132_v20 = vmul.f32 %v130_v19, %v3252_v13  ;;  %v2871_v19 = vld [vmem:[%s4277_s1 + $0xb0] sm:$0xff] }
 0x1b1   :  { %v139_v22 = vperm.slane %v132_v20, 1 }
 0x1b6   :  { %v137_v24 = vpop.permute.xlu1 %136 }
 0x1b7   :  { %v140_v25 = vmul.f32 %v139_v22, %v137_v24 }
 0x1b9   :  { %v141_v26 = vsub.f32 %v3252_v13, %v140_v25 }
 0x1bb   :  { %v145_v27 = vrot.slane %v141_v26, 1 }
 0x1bd   :  { %v147_v28 = vsel %vm133_vm6, %v139_v22, %v145_v27 }
 0x1be   :  { %3089 = vrcp.f32 %v147_v28 }
 0x1c4   :  { %v3090_v29 = vpop.eup %3089 }
 0x1c5   :  { %v149_v30 = vmul.f32 %v3090_v29, %v147_v28 }
 0x1c7   :  { %v150_v31 = vsub.f32 2.0, %v149_v30 }
 0x1c9   :  { %v151_v32 = vmul.f32 %v3090_v29, %v150_v31 }
 0x1cb   :  { %154 = vperm.xlu2 %3045, %v151_v32  }
 0x1d3   :  { %161 = vperm.xlu2 %3045, %v147_v28  }
 0x1db   :  { %3049 = vset.pattern.permute.xlu2 %v3187_v45 }
 0x225   :  { %v155_v34 = vpop.permute.xlu2 %154 }
 0x226   :  { %v157_v35 = vmul.f32 %v155_v34, %v147_v28 }
 0x228   :  { %v164_v36 = vperm.slane %v157_v35, 1 }
 0x22d   :  { %v162_v37 = vpop.permute.xlu2 %161 }
 0x22e   :  { %v165_v38 = vmul.f32 %v164_v36, %v162_v37 }
 0x230   :  { %v166_v39 = vsub.f32 %v147_v28, %v165_v38 }
 0x232   :  { %v169_v40 = vsel %vm158_vm7, %v164_v36, %v166_v39 }
 0x233   :  { %183 = vperm.xlu1 %3047, %v169_v40   ;;  %3091 = vrcp.f32 %v169_v40 }
 0x239   :  { %v3092_v41 = vpop.eup %3091 }
 0x23a   :  { %v171_v42 = vmul.f32 %v3092_v41, %v169_v40 }
 0x23b   :  { %3048 = vset.pattern.permute.xlu1 %v3187_v45 }
 0x23c   :  { %v172_v43 = vsub.f32 2.0, %v171_v42 }
 0x23e   :  { %v173_v44 = vmul.f32 %v3092_v41, %v172_v43 }
 0x240   :  { %176 = vperm.xlu0 %3046, %v173_v44  }
 0x2a5   :  { %v184_v51 = vpop.permute.xlu1 %183 }
 0x2b2   :  { %v177_v48 = vpop.permute.xlu0 %176 }
 0x2b3   :  { %v179_v49 = vmul.f32 %v177_v48, %v169_v40 }
 0x2b5   :  { %v186_v50 = vperm.slane %v179_v49, 2 }
 0x2b7   :  { %v187_v52 = vmul.f32 %v186_v50, %v184_v51 }
 0x2b9   :  { %v188_v53 = vsub.f32 %v169_v40, %v187_v52 }
 0x2bb   :  { %v191_v54 = vsel %vm180_vm8, %v186_v50, %v188_v53 }
 0x2bc   :  { %205 = vperm.xlu1 %3048, %v191_v54   ;;  %3093 = vrcp.f32 %v191_v54 }
 0x2c2   :  { %v3094_v55 = vpop.eup %3093 }
 0x2c3   :  { %v193_v56 = vmul.f32 %v3094_v55, %v191_v54 }
 0x2c4   :  { %218 = vrot.lane.b32.xlu1 %v3252_v13, %s3188_s5 }
 0x2c5   :  { %v194_v57 = vsub.f32 2.0, %v193_v56  ;;  %3050 = vset.pattern.permute.xlu1 %v3184_v7 }
 0x2c7   :  { %v195_v58 = vmul.f32 %v3094_v55, %v194_v57 }
 0x2c9   :  { %198 = vperm.xlu2 %3049, %v195_v58  }
 0x2d1   :  { %216 = vrot.lane.b32.xlu2 %v3242_v10, %s3188_s5 }
 0x2f7   :  { %305 = vxpose.xlu2.b32.start [1/2] (short) (narrow) %v2869_v47, 16 }
 0x2ff   :  { %306 = vxpose.xlu2.b32.end [2/2] (short) (narrow) %v2870_v46, 16 }
 0x323   :  { %v199_v59 = vpop.permute.xlu2 %198 }
 0x324   :  { %v201_v60 = vmul.f32 %v199_v59, %v191_v54 }
 0x326   :  { %v208_v61 = vperm.slane %v201_v60, 3 }
 0x32b   :  { %v217_v3 = vpop.permute.xlu2 %216 }
 0x32e   :  { %v206_v62 = vpop.permute.xlu1 %205 }
 0x32f   :  { %v209_v63 = vmul.f32 %v208_v61, %v206_v62 }
 0x331   :  { %v210_v0 = vsub.f32 %v191_v54, %v209_v63 }
 0x333   :  { %v3297_v1 = vsel %vm202_vm9, %v208_v61, %v210_v0 }
 0x334   :  { %v214_v2 = vsub.f32 0.0, %v3297_v1 }
 0x336   :  { %2866 = vmatpush.msk.msra.mxu2 %vm225_vm10, %v214_v2  ;;  %v219_v5 = vpop.permute.xlu1 %218 }
 0x337   :  { %2867 = vmatmul.msk.f32.vlgmr.msra.gmra.mxu2 %vm220_vm11, %v217_v3 }
 0x338   :  { %2874 = vmatpush.msk.msrb.mxu2 %vm30_vm0, %v302_v6 }
 0x33a   :  { %361 = vmatpush.msrb.mxu2 %v299_v4  ;;  %v2898_v4 = vld [vmem:[%s4275_s0 + $0x90] sm:$0xff] }
 0x33b   :  { %775 = vxpose.xlu0.b32.start [1/2] (short) (narrow) %v2898_v4, 16 }
 0x33f   :  { %2868 = vmatmul.msk.f32.gmra.mxu2 %vm220_vm11, %v219_v5  ;;  %v2899_v5 = vld [vmem:[%s4275_s0 + $0x98] sm:$0x1] }
 0x343   :  { %776 = vxpose.xlu0.b32.end [2/2] (short) (narrow) %v2899_v5, 16 }
 0x361   :  { %3053 = vset.pattern.permute.xlu2 %v3186_v33 }
 0x390   :  { %v321_v8 = vpop.trf.xlu2 }
 0x391   :  { %2875 = vmatmul.msk.f32.vlgmr.msrb.gmra.mxu2 %vm26_vm3, %v321_v8 }
 0x398   :  { %v322_v9 = vpop.trf.xlu2 }
 0x399   :  { %2876 = vmatmul.msk.f32.gmra.mxu2 %vm26_vm3, %v322_v9 }
 0x3aa   :  { %3055 = vset.pattern.permute.xlu0 %v3184_v7 }
 0x3ba   :  { %v246_v14 = vpop.f32.mrf.mxu2 }
 0x3bb   :  { %v3323_v15 = vadd.f32 %v246_v14, %v3242_v10  ;;  %v2872_v10 = vld [vmem:[%s4277_s1 + $0xb8] sm:$0x1f] }
 0x3bd   :  { %2890 = vmatmul.msk.f32.vlgmr.msrb.gmra.mxu1 %vm26_vm3, %v3323_v15 }
 0x3c2   :  { %v249_v16 = vpop.f32.mrf.mxu2 }
 0x3c3   :  { %v3328_v17 = vadd.f32 %v249_v16, %v3252_v13 }
 0x3c5   :  { %2891 = vmatmul.msk.f32.gmra.mxu1 %vm26_vm3, %v3328_v17 }
 0x414   :  { %v363_v20 = vpop.f32.mrf.mxu2 }
 0x415   :  { %v3335_v21 = vadd.f32 %v2871_v19, %v363_v20 }
 0x417   :  { %2880 = vst.msk [vmem:[%s4276_s2 + $0x98] sm:$0xff] %vm254_vm4, %v3335_v21 }
 0x41c   :  { %v366_v13 = vpop.f32.mrf.mxu2 }
 0x41d   :  { %v3345_v22 = vadd.f32 %v2872_v10, %v366_v13 }
 0x41f   :  { %3095 = vrcp.f32 %v3345_v22  ;;  %2881 = vst.msk [vmem:[%s4276_s2 + $0xd0] sm:$0x1f] %vm256_vm5, %v3345_v22 }
 0x425   :  { %v3096_v24 = vpop.eup %3095 }
 0x426   :  { %v372_v25 = vmul.f32 %v3096_v24, %v3345_v22 }
 0x428   :  { %v373_v26 = vsub.f32 2.0, %v372_v25 }
 0x42a   :  { %v374_v27 = vmul.f32 %v3096_v24, %v373_v26 }
 0x42c   :  { %377 = vperm.xlu1 %3050, %v374_v27  }
 0x434   :  { %383 = vperm.xlu1 %3050, %v3345_v22  }
 0x43a   :  { %v534_v28 = vpop.f32.mrf.mxu1 }
 0x43c   :  { %3051 = vset.pattern.permute.xlu1 %v3185_v18 }
 0x442   :  { %v537_v29 = vpop.f32.mrf.mxu1 }
 0x443   :  { %2892 = vmatpush.msk.msrb.mxu3 %vm30_vm0, %v537_v29  ;;  %v2887_v29 = vld [vmem:[%s4277_s1 + $0x80] sm:$0xff] }
 0x445   :  { %596 = vmatpush.msrb.mxu3 %v534_v28 }
 0x49e   :  { %v378_v30 = vpop.permute.xlu1 %377 }
 0x49f   :  { %v380_v31 = vmul.f32 %v378_v30, %v3345_v22 }
 0x4a1   :  { %v386_v32 = vperm.slane %v380_v31, 1 }
 0x4a6   :  { %v384_v34 = vpop.permute.xlu1 %383 }
 0x4a7   :  { %v387_v35 = vmul.f32 %v386_v32, %v384_v34 }
 0x4a9   :  { %v388_v36 = vsub.f32 %v3345_v22, %v387_v35 }
 0x4ab   :  { %v390_v37 = vrot.slane %v388_v36, 1  ;;  %v791_v36 = vpop.trf.xlu0 }
 0x4ad   :  { %v392_v38 = vsel %vm133_vm6, %v386_v32, %v390_v37 }
 0x4ae   :  { %3097 = vrcp.f32 %v392_v38 }
 0x4b4   :  { %v3098_v39 = vpop.eup %3097 }
 0x4b5   :  { %v394_v40 = vmul.f32 %v3098_v39, %v392_v38 }
 0x4b7   :  { %v395_v41 = vsub.f32 2.0, %v394_v40 }
 0x4b9   :  { %v396_v42 = vmul.f32 %v3098_v39, %v395_v41  ;;  %v792_v41 = vpop.trf.xlu0 }
 0x4bb   :  { %399 = vperm.xlu1 %3051, %v396_v42  }
 0x4c3   :  { %405 = vperm.xlu1 %3051, %v392_v38  }
 0x4cb   :  { %3052 = vset.pattern.permute.xlu1 %v3186_v33 }
 0x52d   :  { %v400_v43 = vpop.permute.xlu1 %399 }
 0x52e   :  { %v402_v44 = vmul.f32 %v400_v43, %v392_v38 }
 0x530   :  { %v408_v46 = vperm.slane %v402_v44, 1 }
 0x535   :  { %v406_v47 = vpop.permute.xlu1 %405 }
 0x536   :  { %v409_v48 = vmul.f32 %v408_v46, %v406_v47 }
 0x538   :  { %v410_v49 = vsub.f32 %v392_v38, %v409_v48 }
 0x53a   :  { %v411_v50 = vsel %vm158_vm7, %v408_v46, %v410_v49  ;;  %v2900_v49 = vld [vmem:[%s4277_s1 + $0x90] sm:$0xff] }
 0x53b   :  { %424 = vperm.xlu2 %3053, %v411_v50   ;;  %3099 = vrcp.f32 %v411_v50 }
 0x541   :  { %v3100_v51 = vpop.eup %3099 }
 0x542   :  { %v413_v52 = vmul.f32 %v3100_v51, %v411_v50 }
 0x543   :  { %3057 = vset.pattern.permute.xlu2 %v3184_v7 }
 0x544   :  { %v414_v53 = vsub.f32 2.0, %v413_v52 }
 0x546   :  { %v415_v54 = vmul.f32 %v3100_v51, %v414_v53 }
 0x548   :  { %418 = vperm.xlu1 %3052, %v415_v54   ;;  %v2901_v54 = vld [vmem:[%s4277_s1 + $0x98] sm:$0x1f] }
 0x550   :  { %3054 = vset.pattern.permute.xlu1 %v3187_v45 }
 0x595   :  { %v425_v58 = vpop.permute.xlu2 %424 }
 0x5ba   :  { %v419_v55 = vpop.permute.xlu1 %418 }
 0x5bb   :  { %v421_v56 = vmul.f32 %v419_v55, %v411_v50 }
 0x5bd   :  { %v427_v57 = vperm.slane %v421_v56, 2 }
 0x5bf   :  { %v428_v59 = vmul.f32 %v427_v57, %v425_v58 }
 0x5c1   :  { %v429_v60 = vsub.f32 %v411_v50, %v428_v59 }
 0x5c3   :  { %v430_v61 = vsel %vm180_vm8, %v427_v57, %v429_v60 }
 0x5c4   :  { %3101 = vrcp.f32 %v430_v61 }
 0x5ca   :  { %v3102_v62 = vpop.eup %3101 }
 0x5cb   :  { %v432_v63 = vmul.f32 %v3102_v62, %v430_v61 }
 0x5cd   :  { %v433_v0 = vsub.f32 2.0, %v432_v63 }
 0x5cf   :  { %v434_v3 = vmul.f32 %v3102_v62, %v433_v0 }
 0x5d1   :  { %437 = vperm.xlu1 %3054, %v434_v3  }
 0x5d9   :  { %443 = vperm.xlu1 %3054, %v430_v61  }
 0x5e1   :  { %452 = vrot.lane.b32.xlu1 %v3335_v21, %s3188_s5 }
 0x5e9   :  { %454 = vrot.lane.b32.xlu1 %v3345_v22, %s3188_s5 }
 0x61e   :  { %540 = vxpose.xlu1.b32.start [1/2] (short) (narrow) %v3319_v12, 16 }
 0x626   :  { %541 = vxpose.xlu1.b32.end [2/2] (short) (narrow) %v3312_v11, 16 }
 0x643   :  { %v438_v6 = vpop.permute.xlu1 %437 }
 0x644   :  { %v440_v8 = vmul.f32 %v438_v6, %v430_v61 }
 0x646   :  { %v446_v9 = vperm.slane %v440_v8, 3 }
 0x64b   :  { %v444_v14 = vpop.permute.xlu1 %443 }
 0x64c   :  { %v447_v16 = vmul.f32 %v446_v9, %v444_v14 }
 0x64e   :  { %v448_v19 = vsub.f32 %v430_v61, %v447_v16 }
 0x650   :  { %v3382_v12 = vsel %vm202_vm9, %v446_v9, %v448_v19 }
 0x651   :  { %v450_v11 = vsub.f32 0.0, %v3382_v12 }
 0x653   :  { %2877 = vmatpush.msk.msrb.mxu0 %vm225_vm10, %v450_v11  ;;  %v453_v20 = vpop.permute.xlu1 %452 }
 0x654   :  { %2878 = vmatmul.msk.f32.vlgmr.msrb.gmra.mxu0 %vm220_vm11, %v453_v20 }
 0x655   :  { %2902 = vmatpush.msk.msra.mxu0 %vm30_vm0, %v2899_v5 }
 0x657   :  { %767 = vmatpush.msra.mxu0 %v2898_v4 }
 0x65b   :  { %v455_v10 = vpop.permute.xlu1 %454 }
 0x65c   :  { %2879 = vmatmul.msk.f32.gmra.mxu0 %vm220_vm11, %v455_v10 }
 0x679   :  { %3056 = vset.pattern.permute.xlu1 %v3184_v7 }
 0x6c2   :  { %v556_v13 = vpop.trf.xlu1 }
 0x6c3   :  { %2893 = vmatmul.msk.f32.vlgmr.msrb.gmra.mxu3 %vm26_vm3, %v556_v13 }
 0x6ca   :  { %v557_v24 = vpop.trf.xlu1 }
 0x6cb   :  { %2894 = vmatmul.msk.f32.gmra.mxu3 %vm26_vm3, %v557_v24 }
 0x6d1   :  { %v480_v25 = vpop.f32.mrf.mxu0 }
 0x6d2   :  { %v3396_v26 = vadd.f32 %v480_v25, %v3335_v21  ;;  %v2888_v21 = vld [vmem:[%s4277_s1 + $0x88] sm:$0x1f] }
 0x6d4   :  { %2903 = vmatmul.msk.f32.vlgmr.msra.gmra.mxu0 %vm26_vm3, %v3396_v26 }
 0x6d9   :  { %v483_v27 = vpop.f32.mrf.mxu0 }
 0x6da   :  { %v3401_v28 = vadd.f32 %v483_v27, %v3345_v22 }
 0x6dc   :  { %2904 = vmatmul.msk.f32.gmra.mxu0 %vm26_vm3, %v3401_v28 }
 0x746   :  { %v598_v30 = vpop.f32.mrf.mxu3 }
 0x747   :  { %v3408_v31 = vadd.f32 %v2887_v29, %v598_v30 }
 0x749   :  { %723 = vst.msk [vmem:[%s4276_s2 + $0x20] sm:$0xff] %vm254_vm4, %v3408_v31 }
 0x74e   :  { %v601_v22 = vpop.f32.mrf.mxu3 }
 0x74f   :  { %v3418_v32 = vadd.f32 %v2888_v21, %v601_v22 }
 0x751   :  { %v769_v34 = vpop.f32.mrf.mxu0  ;;  %3103 = vrcp.f32 %v3418_v32  ;;  %618 = vperm.xlu2 %3057, %v3418_v32   ;;  %724 = vst.msk [vmem:[%s4276_s2 + $0x58] sm:$0x1f] %vm256_vm5, %v3418_v32 }
 0x757   :  { %v3104_v35 = vpop.eup %3103 }
 0x758   :  { %v607_v37 = vmul.f32 %v3104_v35, %v3418_v32 }
 0x759   :  { %v772_v38 = vpop.f32.mrf.mxu0 }
 0x75a   :  { %2905 = vmatpush.msk.msra.mxu1 %vm30_vm0, %v772_v38  ;;  %v608_v39 = vsub.f32 2.0, %v607_v37 }
 0x75c   :  { %831 = vmatpush.msra.mxu1 %v769_v34  ;;  %v609_v40 = vmul.f32 %v3104_v35, %v608_v39 }
 0x75d   :  { %2906 = vmatmul.msk.f32.vlgmr.msra.gmra.mxu1 %vm26_vm3, %v791_v36 }
 0x75e   :  { %612 = vperm.xlu0 %3055, %v609_v40  }
 0x765   :  { %2907 = vmatmul.msk.f32.gmra.mxu1 %vm26_vm3, %v792_v41 }
 0x766   :  { %687 = vrot.lane.b32.xlu0 %v3408_v31, %s3188_s5 }
 0x7ab   :  { %v619_v44 = vpop.permute.xlu2 %618 }
 0x7d0   :  { %v613_v42 = vpop.permute.xlu0 %612 }
 0x7d1   :  { %v615_v43 = vmul.f32 %v613_v42, %v3418_v32 }
 0x7d3   :  { %v621_v46 = vperm.slane %v615_v43, 1 }
 0x7d5   :  { %v622_v47 = vmul.f32 %v621_v46, %v619_v44 }
 0x7d7   :  { %v623_v48 = vsub.f32 %v3418_v32, %v622_v47 }
 0x7d9   :  { %v625_v50 = vrot.slane %v623_v48, 1 }
 0x7da   :  { %v833_v51 = vpop.f32.mrf.mxu1 }
 0x7db   :  { %v627_v52 = vsel %vm133_vm6, %v621_v46, %v625_v50  ;;  %v3440_v53 = vadd.f32 %v2900_v49, %v833_v51 }
 0x7dc   :  { %3105 = vrcp.f32 %v627_v52 }
 0x7dd   :  { %2911 = vst.msk [vmem:[%s4276_s2 + $0x90] sm:$0xff] %vm254_vm4, %v3440_v53 }
 0x7e2   :  { %v3106_v55 = vpop.eup %3105  ;;  %v836_v56 = vpop.f32.mrf.mxu1 }
 0x7e3   :  { %v3450_v57 = vadd.f32 %v2901_v54, %v836_v56  ;;  %v629_v58 = vmul.f32 %v3106_v55, %v627_v52 }
 0x7e5   :  { %924 = vrot.lane.b32.xlu0 %v3450_v57, %s3188_s5  ;;  %853 = vperm.xlu2 %3057, %v3450_v57   ;;  %3107 = vrcp.f32 %v3450_v57  ;;  %2912 = vst.msk [vmem:[%s4276_s2 + $0xc8] sm:$0x1f] %vm256_vm5, %v3450_v57  ;;  %v630_v59 = vsub.f32 2.0, %v629_v58 }
 0x7e7   :  { %v631_v61 = vmul.f32 %v3106_v55, %v630_v59 }
 0x7eb   :  { %v3108_v60 = vpop.eup %3107 }
 0x7ec   :  { %v842_v62 = vmul.f32 %v3108_v60, %v3450_v57 }
 0x7ed   :  { %3058 = vset.pattern.permute.xlu2 %v3185_v18 }
 0x7ee   :  { %634 = vperm.xlu2 %3058, %v631_v61   ;;  %v843_v63 = vsub.f32 2.0, %v842_v62 }
 0x7f0   :  { %v844_v0 = vmul.f32 %v3108_v60, %v843_v63 }
 0x7f2   :  { %847 = vperm.xlu1 %3056, %v844_v0  }
 0x7f6   :  { %640 = vperm.xlu2 %3058, %v627_v52  }
 0x7fa   :  { %3060 = vset.pattern.permute.xlu1 %v3187_v45 }
 0x83f   :  { %v854_v3 = vpop.permute.xlu2 %853 }
 0x848   :  { %v635_v4 = vpop.permute.xlu2 %634 }
 0x849   :  { %v637_v14 = vmul.f32 %v635_v4, %v627_v52 }
 0x84b   :  { %v643_v10 = vperm.slane %v637_v14, 1 }
 0x850   :  { %v641_v19 = vpop.permute.xlu2 %640 }
 0x851   :  { %v644_v24 = vmul.f32 %v643_v10, %v641_v19 }
 0x853   :  { %v645_v25 = vsub.f32 %v627_v52, %v644_v24 }
 0x855   :  { %v646_v30 = vsel %vm158_vm7, %v643_v10, %v645_v25 }
 0x864   :  { %v848_v5 = vpop.permute.xlu1 %847 }
 0x865   :  { %v850_v6 = vmul.f32 %v848_v5, %v3450_v57 }
 0x867   :  { %v856_v8 = vperm.slane %v850_v6, 1 }
 0x869   :  { %v857_v9 = vmul.f32 %v856_v8, %v854_v3 }
 0x86b   :  { %v858_v16 = vsub.f32 %v3450_v57, %v857_v9 }
 0x86d   :  { %v860_v20 = vrot.slane %v858_v16, 1 }
 0x86f   :  { %v862_v13 = vsel %vm133_vm6, %v856_v8, %v860_v20 }
 0x870   :  { %3109 = vrcp.f32 %v862_v13 }
 0x871   :  { %3111 = vrcp.f32 %v646_v30 }
 0x876   :  { %v3110_v27 = vpop.eup %3109 }
 0x877   :  { %v864_v29 = vmul.f32 %v3110_v27, %v862_v13  ;;  %v3112_v34 = vpop.eup %3111 }
 0x878   :  { %v648_v35 = vmul.f32 %v3112_v34, %v646_v30 }
 0x879   :  { %v865_v21 = vsub.f32 2.0, %v864_v29 }
 0x87a   :  { %v649_v36 = vsub.f32 2.0, %v648_v35 }
 0x87b   :  { %v866_v22 = vmul.f32 %v3110_v27, %v865_v21  ;;  %v688_v21 = vpop.permute.xlu0 %687 }
 0x87c   :  { %v650_v37 = vmul.f32 %v3112_v34, %v649_v36 }
 0x87d   :  { %869 = vperm.xlu2 %3058, %v866_v22  }
 0x885   :  { %875 = vperm.xlu2 %3058, %v862_v13  }
 0x88d   :  { %3059 = vset.pattern.permute.xlu2 %v3186_v33 }
 0x88e   :  { %653 = vperm.xlu2 %3059, %v650_v37  }
 0x896   :  { %659 = vperm.xlu2 %3059, %v646_v30  }
 0x8d7   :  { %v870_v38 = vpop.permute.xlu2 %869 }
 0x8d8   :  { %v872_v39 = vmul.f32 %v870_v38, %v862_v13 }
 0x8da   :  { %v878_v40 = vperm.slane %v872_v39, 1 }
 0x8df   :  { %v876_v41 = vpop.permute.xlu2 %875 }
 0x8e0   :  { %v879_v42 = vmul.f32 %v878_v40, %v876_v41 }
 0x8e2   :  { %v880_v43 = vsub.f32 %v862_v13, %v879_v42 }
 0x8e4   :  { %v881_v44 = vsel %vm158_vm7, %v878_v40, %v880_v43  ;;  %v925_v43 = vpop.permute.xlu0 %924 }
 0x8e5   :  { %3113 = vrcp.f32 %v881_v44 }
 0x8e8   :  { %v654_v46 = vpop.permute.xlu2 %653 }
 0x8e9   :  { %v656_v48 = vmul.f32 %v654_v46, %v646_v30  ;;  %v2916_v46 = vld [vmem:[%s4275_s0 + $0x60] sm:$0xff] }
 0x8eb   :  { %v3114_v47 = vpop.eup %3113  ;;  %v662_v51 = vperm.slane %v656_v48, 2 }
 0x8ec   :  { %v883_v49 = vmul.f32 %v3114_v47, %v881_v44 }
 0x8ee   :  { %v884_v50 = vsub.f32 2.0, %v883_v49 }
 0x8f0   :  { %v660_v52 = vpop.permute.xlu2 %659  ;;  %v885_v54 = vmul.f32 %v3114_v47, %v884_v50  ;;  %v2929_v47 = vld [vmem:[%s4275_s0 + $0x70] sm:$0xff]  ;;  %v2930_v50 = vld [vmem:[%s4275_s0 + $0x78] sm:$0x1] }
 0x8f1   :  { %v663_v55 = vmul.f32 %v662_v51, %v660_v52 }
 0x8f2   :  { %888 = vperm.xlu2 %3059, %v885_v54  }
 0x8f3   :  { %v664_v56 = vsub.f32 %v646_v30, %v663_v55 }
 0x8f5   :  { %v665_v58 = vsel %vm180_vm8, %v662_v51, %v664_v56 }
 0x8f6   :  { %3115 = vrcp.f32 %v665_v58 }
 0x8fa   :  { %894 = vperm.xlu2 %3059, %v881_v44  }
 0x8fc   :  { %v3116_v59 = vpop.eup %3115 }
 0x8fd   :  { %v667_v60 = vmul.f32 %v3116_v59, %v665_v58 }
 0x8ff   :  { %v668_v61 = vsub.f32 2.0, %v667_v60 }
 0x901   :  { %v669_v62 = vmul.f32 %v3116_v59, %v668_v61 }
 0x902   :  { %3061 = vset.pattern.permute.xlu2 %v3187_v45 }
 0x903   :  { %672 = vperm.xlu1 %3060, %v669_v62  }
 0x90b   :  { %678 = vperm.xlu1 %3060, %v665_v58  }
 0x913   :  { %922 = vrot.lane.b32.xlu1 %v3440_v53, %s3188_s5 }
 0x948   :  { %1010 = vxpose.xlu1.b32.start [1/2] (short) (narrow) %v2916_v46, 16 }
 0x94c   :  { %v889_v63 = vpop.permute.xlu2 %888 }
 0x94d   :  { %v891_v0 = vmul.f32 %v889_v63, %v881_v44  ;;  %v2918_v63 = vld [vmem:[%s4277_s1 + $0x60] sm:$0xff] }
 0x94f   :  { %v897_v3 = vperm.slane %v891_v0, 2 }
 0x954   :  { %v895_v4 = vpop.permute.xlu2 %894 }
 0x955   :  { %v898_v5 = vmul.f32 %v897_v3, %v895_v4  ;;  %v2919_v4 = vld [vmem:[%s4277_s1 + $0x68] sm:$0x1f] }
 0x957   :  { %v899_v6 = vsub.f32 %v881_v44, %v898_v5  ;;  %v2917_v44 = vld [vmem:[%s4275_s0 + $0x68] sm:$0x1] }
 0x958   :  { %1011 = vxpose.xlu1.b32.end [2/2] (short) (narrow) %v2917_v44, 16 }
 0x959   :  { %v900_v8 = vsel %vm180_vm8, %v897_v3, %v899_v6 }
 0x95a   :  { %3117 = vrcp.f32 %v900_v8 }
 0x960   :  { %v3118_v9 = vpop.eup %3117 }
 0x961   :  { %v902_v14 = vmul.f32 %v3118_v9, %v900_v8 }
 0x963   :  { %v903_v16 = vsub.f32 2.0, %v902_v14 }
 0x965   :  { %v904_v19 = vmul.f32 %v3118_v9, %v903_v16 }
 0x967   :  { %907 = vperm.xlu2 %3061, %v904_v19  }
 0x96f   :  { %913 = vperm.xlu2 %3061, %v900_v8  }
 0x975   :  { %v673_v20 = vpop.permute.xlu1 %672 }
 0x976   :  { %v675_v10 = vmul.f32 %v673_v20, %v665_v58 }
 0x977   :  { %689 = vrot.lane.b32.xlu2 %v3418_v32, %s3188_s5 }
 0x978   :  { %v681_v13 = vperm.slane %v675_v10, 3  ;;  %v2932_v10 = vld [vmem:[%s4277_s1 + $0x78] sm:$0x1f] }
 0x97d   :  { %v679_v24 = vpop.permute.xlu1 %678 }
 0x97e   :  { %v682_v25 = vmul.f32 %v681_v13, %v679_v24 }
 0x980   :  { %v683_v27 = vsub.f32 %v665_v58, %v682_v25 }
 0x982   :  { %v3484_v29 = vsel %vm202_vm9, %v681_v13, %v683_v27 }
 0x983   :  { %v685_v30 = vsub.f32 0.0, %v3484_v29 }
 0x985   :  { %2895 = vmatpush.msk.msra.mxu2 %vm225_vm10, %v685_v30  ;;  %v923_v41 = vpop.permute.xlu1 %922 }
 0x986   :  { %2896 = vmatmul.msk.f32.vlgmr.msra.gmra.mxu2 %vm220_vm11, %v688_v21 }
 0x987   :  { %2920 = vmatpush.msk.msrb.mxu2 %vm30_vm0, %v2917_v44 }
 0x989   :  { %1002 = vmatpush.msrb.mxu2 %v2916_v46 }
 0x99d   :  { %1245 = vxpose.xlu2.b32.start [1/2] (short) (narrow) %v2929_v47, 16 }
 0x9a5   :  { %1246 = vxpose.xlu2.b32.end [2/2] (short) (narrow) %v2930_v50, 16 }
 0x9ab   :  { %3064 = vset.pattern.permute.xlu1 %v3185_v18 }
 0x9c1   :  { %v908_v22 = vpop.permute.xlu2 %907 }
 0x9c2   :  { %v910_v34 = vmul.f32 %v908_v22, %v900_v8 }
 0x9c4   :  { %v916_v35 = vperm.slane %v910_v34, 3 }
 0x9c9   :  { %v914_v36 = vpop.permute.xlu2 %913 }
 0x9ca   :  { %v917_v37 = vmul.f32 %v916_v35, %v914_v36 }
 0x9cc   :  { %v918_v38 = vsub.f32 %v900_v8, %v917_v37  ;;  %v2931_v8 = vld [vmem:[%s4277_s1 + $0x70] sm:$0xff] }
 0x9ce   :  { %v3493_v39 = vsel %vm202_vm9, %v916_v35, %v918_v38 }
 0x9cf   :  { %v920_v40 = vsub.f32 0.0, %v3493_v39 }
 0x9d1   :  { %2908 = vmatpush.msk.msra.mxu3 %vm225_vm10, %v920_v40  ;;  %v690_v42 = vpop.permute.xlu2 %689 }
 0x9d2   :  { %2897 = vmatmul.msk.f32.gmra.mxu2 %vm220_vm11, %v690_v42  ;;  %2909 = vmatmul.msk.f32.vlgmr.msra.gmra.mxu3 %vm220_vm11, %v923_v41 }
 0x9d3   :  { %2933 = vmatpush.msk.msrb.mxu3 %vm30_vm0, %v2930_v50 }
 0x9d5   :  { %1237 = vmatpush.msrb.mxu3 %v2929_v47 }
 0x9da   :  { %2910 = vmatmul.msk.f32.gmra.mxu3 %vm220_vm11, %v925_v43 }
 0x9f4   :  { %v1026_v58 = vpop.trf.xlu1 }
 0xa07   :  { %3063 = vset.pattern.permute.xlu2 %v3185_v18 }
 0xa09   :  { %v715_v48 = vpop.f32.mrf.mxu2 }
 0xa0a   :  { %v3513_v49 = vadd.f32 %v715_v48, %v3408_v31 }
 0xa0c   :  { %2921 = vmatmul.msk.f32.vlgmr.msrb.gmra.mxu2 %vm26_vm3, %v3513_v49 }
 0xa36   :  { %v1261_v60 = vpop.trf.xlu2 }
 0xa3e   :  { %v1262_v62 = vpop.trf.xlu2 }
 0xa55   :  { %v718_v51 = vpop.f32.mrf.mxu2  ;;  %v950_v52 = vpop.f32.mrf.mxu3 }
 0xa56   :  { %v3523_v54 = vadd.f32 %v718_v51, %v3418_v32  ;;  %v3526_v31 = vadd.f32 %v950_v52, %v3440_v53 }
 0xa58   :  { %2922 = vmatmul.msk.f32.gmra.mxu2 %vm26_vm3, %v3523_v54  ;;  %2934 = vmatmul.msk.f32.vlgmr.msrb.gmra.mxu3 %vm26_vm3, %v3526_v31 }
 0xa5d   :  { %v953_v55 = vpop.f32.mrf.mxu3 }
 0xa5e   :  { %v3533_v56 = vadd.f32 %v953_v55, %v3450_v57  ;;  %v1027_v57 = vpop.trf.xlu1 }
 0xa60   :  { %2935 = vmatmul.msk.f32.gmra.mxu3 %vm26_vm3, %v3533_v56 }
 0xa8f   :  { %v1004_v32 = vpop.f32.mrf.mxu2 }
 0xadb   :  { %v1007_v59 = vpop.f32.mrf.mxu2  ;;  %v1239_v53 = vpop.f32.mrf.mxu3 }
 0xadc   :  { %2923 = vmatpush.msk.msrb.mxu0 %vm30_vm0, %v1007_v59 }
 0xade   :  { %1066 = vmatpush.msrb.mxu0 %v1004_v32 }
 0xadf   :  { %2924 = vmatmul.msk.f32.vlgmr.msrb.gmra.mxu0 %vm26_vm3, %v1026_v58 }
 0xae3   :  { %v1242_v61 = vpop.f32.mrf.mxu3 }
 0xae4   :  { %2936 = vmatpush.msk.msra.mxu2 %vm30_vm0, %v1242_v61 }
 0xae6   :  { %1301 = vmatpush.msra.mxu2 %v1239_v53 }
 0xae7   :  { %2925 = vmatmul.msk.f32.gmra.mxu0 %vm26_vm3, %v1027_v57  ;;  %2937 = vmatmul.msk.f32.vlgmr.msra.gmra.mxu2 %vm26_vm3, %v1261_v60 }
 0xaef   :  { %2938 = vmatmul.msk.f32.gmra.mxu2 %vm26_vm3, %v1262_v62 }
 0xb5c   :  { %v1068_v0 = vpop.f32.mrf.mxu0 }
 0xb5d   :  { %v3547_v3 = vadd.f32 %v2918_v63, %v1068_v0 }
 0xb5f   :  { %1193 = vst.msk [vmem:[%s4276_s2 + $0x18] sm:$0xff] %vm254_vm4, %v3547_v3 }
 0xb64   :  { %v1071_v5 = vpop.f32.mrf.mxu0 }
 0xb65   :  { %v3557_v6 = vadd.f32 %v2919_v4, %v1071_v5 }
 0xb67   :  { %3119 = vrcp.f32 %v3557_v6  ;;  %1194 = vst.msk [vmem:[%s4276_s2 + $0x50] sm:$0x1f] %vm256_vm5, %v3557_v6 }
 0xb6a   :  { %v1303_v9 = vpop.f32.mrf.mxu2 }
 0xb6b   :  { %v3568_v14 = vadd.f32 %v2931_v8, %v1303_v9 }
 0xb6d   :  { %v3120_v16 = vpop.eup %3119  ;;  %2942 = vst.msk [vmem:[%s4276_s2 + $0x88] sm:$0xff] %vm254_vm4, %v3568_v14 }
 0xb6e   :  { %v1077_v19 = vmul.f32 %v3120_v16, %v3557_v6 }
 0xb70   :  { %v1078_v20 = vsub.f32 2.0, %v1077_v19 }
 0xb72   :  { %v1079_v13 = vmul.f32 %v3120_v16, %v1078_v20  ;;  %v1306_v24 = vpop.f32.mrf.mxu2 }
 0xb73   :  { %v3579_v25 = vadd.f32 %v2932_v10, %v1306_v24 }
 0xb74   :  { %1082 = vperm.xlu0 %3055, %v1079_v13  }
 0xb75   :  { %3121 = vrcp.f32 %v3579_v25  ;;  %2943 = vst.msk [vmem:[%s4276_s2 + $0xc0] sm:$0x1f] %vm256_vm5, %v3579_v25 }
 0xb7b   :  { %v3122_v27 = vpop.eup %3121 }
 0xb7c   :  { %1088 = vperm.xlu0 %3055, %v3557_v6   ;;  %v1312_v21 = vmul.f32 %v3122_v27, %v3579_v25 }
 0xb7e   :  { %v1313_v22 = vsub.f32 2.0, %v1312_v21 }
 0xb80   :  { %v1314_v34 = vmul.f32 %v3122_v27, %v1313_v22 }
 0xb84   :  { %1317 = vperm.xlu0 %3055, %v1314_v34  }
 0xb8c   :  { %1323 = vperm.xlu0 %3055, %v3579_v25  }
 0xb94   :  { %3062 = vset.pattern.permute.xlu0 %v3185_v18 }
 0xbe6   :  { %v1083_v35 = vpop.permute.xlu0 %1082 }
 0xbe7   :  { %v1085_v36 = vmul.f32 %v1083_v35, %v3557_v6 }
 0xbe9   :  { %v1091_v37 = vperm.slane %v1085_v36, 1 }
 0xbee   :  { %v1089_v38 = vpop.permute.xlu0 %1088 }
 0xbef   :  { %v1092_v41 = vmul.f32 %v1091_v37, %v1089_v38 }
 0xbf1   :  { %v1093_v42 = vsub.f32 %v3557_v6, %v1092_v41 }
 0xbf3   :  { %v1095_v43 = vrot.slane %v1093_v42, 1 }
 0xbf5   :  { %v1097_v44 = vsel %vm133_vm6, %v1091_v37, %v1095_v43 }
 0xbf6   :  { %1110 = vperm.xlu2 %3063, %v1097_v44   ;;  %v1318_v46 = vpop.permute.xlu0 %1317  ;;  %3123 = vrcp.f32 %v1097_v44 }
 0xbf7   :  { %v1320_v47 = vmul.f32 %v1318_v46, %v3579_v25 }
 0xbf9   :  { %v1326_v50 = vperm.slane %v1320_v47, 1 }
 0xbfc   :  { %v3124_v48 = vpop.eup %3123 }
 0xbfd   :  { %v1099_v51 = vmul.f32 %v3124_v48, %v1097_v44 }
 0xbfe   :  { %1394 = vrot.lane.b32.xlu2 %v3579_v25, %s3188_s5  ;;  %v1324_v52 = vpop.permute.xlu0 %1323 }
 0xbff   :  { %v1327_v55 = vmul.f32 %v1326_v50, %v1324_v52  ;;  %v1100_v32 = vsub.f32 2.0, %v1099_v51  ;;  %3067 = vset.pattern.permute.xlu2 %v3184_v7 }
 0xc01   :  { %v1328_v58 = vsub.f32 %v3579_v25, %v1327_v55  ;;  %v1101_v59 = vmul.f32 %v3124_v48, %v1100_v32 }
 0xc03   :  { %v1330_v53 = vrot.slane %v1328_v58, 1  ;;  %1104 = vperm.xlu0 %3062, %v1101_v59  }
 0xc05   :  { %v1332_v60 = vsel %vm133_vm6, %v1326_v50, %v1330_v53 }
 0xc06   :  { %1345 = vperm.xlu1 %3064, %v1332_v60   ;;  %3125 = vrcp.f32 %v1332_v60 }
 0xc0c   :  { %v3126_v61 = vpop.eup %3125 }
 0xc0d   :  { %v1334_v57 = vmul.f32 %v3126_v61, %v1332_v60 }
 0xc0e   :  { %1159 = vrot.lane.b32.xlu1 %v3557_v6, %s3188_s5 }
 0xc0f   :  { %v1335_v62 = vsub.f32 2.0, %v1334_v57 }
 0xc11   :  { %v1336_v63 = vmul.f32 %v3126_v61, %v1335_v62 }
 0xc13   :  { %1339 = vperm.xlu0 %3062, %v1336_v63  }
 0xc1b   :  { %3065 = vset.pattern.permute.xlu0 %v3186_v33 }
 0xc50   :  { %v1111_v8 = vpop.permute.xlu2 %1110 }
 0xc75   :  { %v1105_v0 = vpop.permute.xlu0 %1104 }
 0xc76   :  { %v1107_v4 = vmul.f32 %v1105_v0, %v1097_v44 }
 0xc78   :  { %v1113_v5 = vperm.slane %v1107_v4, 1  ;;  %v1346_v22 = vpop.permute.xlu1 %1345 }
 0xc7a   :  { %v1114_v9 = vmul.f32 %v1113_v5, %v1111_v8 }
 0xc7c   :  { %v1115_v16 = vsub.f32 %v1097_v44, %v1114_v9 }
 0xc7e   :  { %v1116_v19 = vsel %vm158_vm7, %v1113_v5, %v1115_v16 }
 0xc7f   :  { %3127 = vrcp.f32 %v1116_v19 }
 0xc85   :  { %v3128_v20 = vpop.eup %3127  ;;  %v1340_v10 = vpop.permute.xlu0 %1339 }
 0xc86   :  { %v1342_v13 = vmul.f32 %v1340_v10, %v1332_v60  ;;  %v1118_v24 = vmul.f32 %v3128_v20, %v1116_v19 }
 0xc88   :  { %v1348_v27 = vperm.slane %v1342_v13, 1  ;;  %v1119_v21 = vsub.f32 2.0, %v1118_v24 }
 0xc8a   :  { %v1349_v34 = vmul.f32 %v1348_v27, %v1346_v22  ;;  %v1120_v35 = vmul.f32 %v3128_v20, %v1119_v21 }
 0xc8c   :  { %v1350_v36 = vsub.f32 %v1332_v60, %v1349_v34  ;;  %1123 = vperm.xlu0 %3065, %v1120_v35   ;;  %v2947_v34 = vld [vmem:[%s4275_s0 + $0x40] sm:$0xff]  ;;  %v2948_v35 = vld [vmem:[%s4275_s0 + $0x48] sm:$0x1] }
 0xc8e   :  { %v1351_v37 = vsel %vm158_vm7, %v1348_v27, %v1350_v36  ;;  %v1160_v36 = vpop.permute.xlu1 %1159 }
 0xc8f   :  { %3129 = vrcp.f32 %v1351_v37 }
 0xc94   :  { %1129 = vperm.xlu0 %3065, %v1116_v19  }
 0xc95   :  { %v3130_v38 = vpop.eup %3129 }
 0xc96   :  { %v1353_v41 = vmul.f32 %v3130_v38, %v1351_v37 }
 0xc98   :  { %v1354_v42 = vsub.f32 2.0, %v1353_v41 }
 0xc9a   :  { %v1355_v43 = vmul.f32 %v3130_v38, %v1354_v42 }
 0xc9c   :  { %1358 = vperm.xlu0 %3065, %v1355_v43  }
 0xca4   :  { %1364 = vperm.xlu0 %3065, %v1351_v37  }
 0xcac   :  { %3066 = vset.pattern.permute.xlu0 %v3187_v45 }
 0xcfe   :  { %v1124_v44 = vpop.permute.xlu0 %1123 }
 0xcff   :  { %v1126_v46 = vmul.f32 %v1124_v44, %v1116_v19 }
 0xd01   :  { %v1132_v47 = vperm.slane %v1126_v46, 2 }
 0xd06   :  { %v1130_v48 = vpop.permute.xlu0 %1129 }
 0xd07   :  { %v1133_v50 = vmul.f32 %v1132_v47, %v1130_v48 }
 0xd09   :  { %v1134_v51 = vsub.f32 %v1116_v19, %v1133_v50  ;;  %v1395_v50 = vpop.permute.xlu2 %1394 }
 0xd0b   :  { %v1135_v52 = vsel %vm180_vm8, %v1132_v47, %v1134_v51  ;;  %v2960_v51 = vld [vmem:[%s4275_s0 + $0x50] sm:$0xff] }
 0xd0c   :  { %3131 = vrcp.f32 %v1135_v52  ;;  %1715 = vxpose.xlu1.b32.start [1/2] (short) (narrow) %v2960_v51, 16 }
 0xd0e   :  { %v1359_v55 = vpop.permute.xlu0 %1358 }
 0xd0f   :  { %v1361_v59 = vmul.f32 %v1359_v55, %v1351_v37 }
 0xd11   :  { %v1367_v57 = vperm.slane %v1361_v59, 2 }
 0xd12   :  { %v3132_v32 = vpop.eup %3131 }
 0xd13   :  { %v1137_v58 = vmul.f32 %v3132_v32, %v1135_v52 }
 0xd15   :  { %v1138_v53 = vsub.f32 2.0, %v1137_v58 }
 0xd16   :  { %v1365_v61 = vpop.permute.xlu0 %1364 }
 0xd17   :  { %v1139_v60 = vmul.f32 %v3132_v32, %v1138_v53  ;;  %v1368_v62 = vmul.f32 %v1367_v57, %v1365_v61 }
 0xd19   :  { %1142 = vperm.xlu0 %3066, %v1139_v60   ;;  %v1369_v63 = vsub.f32 %v1351_v37, %v1368_v62 }
 0xd1b   :  { %v1370_v0 = vsel %vm180_vm8, %v1367_v57, %v1369_v63 }
 0xd1c   :  { %3133 = vrcp.f32 %v1370_v0 }
 0xd21   :  { %1148 = vperm.xlu0 %3066, %v1135_v52  }
 0xd22   :  { %v3134_v4 = vpop.eup %3133 }
 0xd23   :  { %v1372_v5 = vmul.f32 %v3134_v4, %v1370_v0 }
 0xd25   :  { %v1373_v8 = vsub.f32 2.0, %v1372_v5  ;;  %v2949_v5 = vld [vmem:[%s4277_s1 + $0x40] sm:$0xff] }
 0xd27   :  { %v1374_v9 = vmul.f32 %v3134_v4, %v1373_v8 }
 0xd29   :  { %1157 = vrot.lane.b32.xlu0 %v3547_v3, %s3188_s5 }
 0xd31   :  { %1383 = vperm.xlu0 %3066, %v1370_v0  }
 0xd39   :  { %1377 = vperm.xlu0 %3066, %v1374_v9  }
 0xd41   :  { %1392 = vrot.lane.b32.xlu0 %v3568_v14, %s3188_s5 }
 0xd63   :  { %1480 = vxpose.xlu0.b32.start [1/2] (short) (narrow) %v2947_v34, 16 }
 0xd6b   :  { %1481 = vxpose.xlu0.b32.end [2/2] (short) (narrow) %v2948_v35, 16 }
 0xd8b   :  { %v1143_v16 = vpop.permute.xlu0 %1142 }
 0xd8c   :  { %v1145_v19 = vmul.f32 %v1143_v16, %v1135_v52  ;;  %v2950_v16 = vld [vmem:[%s4277_s1 + $0x48] sm:$0x1f] }
 0xd8e   :  { %v1151_v20 = vperm.slane %v1145_v19, 3 }
 0xd93   :  { %v1149_v10 = vpop.permute.xlu0 %1148 }
 0xd94   :  { %v1152_v13 = vmul.f32 %v1151_v20, %v1149_v10 }
 0xd96   :  { %v1153_v24 = vsub.f32 %v1135_v52, %v1152_v13  ;;  %v2961_v52 = vld [vmem:[%s4275_s0 + $0x58] sm:$0x1] }
 0xd97   :  { %1716 = vxpose.xlu1.b32.end [2/2] (short) (narrow) %v2961_v52, 16 }
 0xd98   :  { %v3620_v27 = vsel %vm202_vm9, %v1151_v20, %v1153_v24  ;;  %v2962_v24 = vld [vmem:[%s4277_s1 + $0x50] sm:$0xff] }
 0xd99   :  { %v1155_v21 = vsub.f32 0.0, %v3620_v27 }
 0xd9b   :  { %2926 = vmatpush.msk.msrb.mxu1 %vm225_vm10, %v1155_v21  ;;  %v1158_v22 = vpop.permute.xlu0 %1157 }
 0xd9c   :  { %2927 = vmatmul.msk.f32.vlgmr.msrb.gmra.mxu1 %vm220_vm11, %v1158_v22 }
 0xd9d   :  { %2951 = vmatpush.msk.msra.mxu1 %vm30_vm0, %v2948_v35 }
 0xd9f   :  { %1472 = vmatpush.msra.mxu1 %v2947_v34 }
 0xda3   :  { %v1384_v37 = vpop.permute.xlu0 %1383 }
 0xda4   :  { %2928 = vmatmul.msk.f32.gmra.mxu1 %vm220_vm11, %v1160_v36 }
 0xdab   :  { %v1378_v38 = vpop.permute.xlu0 %1377 }
 0xdac   :  { %v1380_v41 = vmul.f32 %v1378_v38, %v1370_v0 }
 0xdae   :  { %v1386_v42 = vperm.slane %v1380_v41, 3 }
 0xdb0   :  { %v1387_v43 = vmul.f32 %v1386_v42, %v1384_v37  ;;  %v2963_v37 = vld [vmem:[%s4277_s1 + $0x58] sm:$0x1f] }
 0xdb2   :  { %v1388_v44 = vsub.f32 %v1370_v0, %v1387_v43 }
 0xdb3   :  { %v1393_v48 = vpop.permute.xlu0 %1392 }
 0xdb4   :  { %v3637_v46 = vsel %vm202_vm9, %v1386_v42, %v1388_v44 }
 0xdb5   :  { %v1390_v47 = vsub.f32 0.0, %v3637_v46 }
 0xdb7   :  { %2939 = vmatpush.msk.msra.mxu0 %vm225_vm10, %v1390_v47 }
 0xdb8   :  { %2940 = vmatmul.msk.f32.vlgmr.msra.gmra.mxu0 %vm220_vm11, %v1393_v48 }
 0xdb9   :  { %2964 = vmatpush.msk.msrb.mxu0 %vm30_vm0, %v2961_v52 }
 0xdbb   :  { %1707 = vmatpush.msrb.mxu0 %v2960_v51 }
 0xdc0   :  { %2941 = vmatmul.msk.f32.gmra.mxu0 %vm220_vm11, %v1395_v50 }
 0xdd2   :  { %3069 = vset.pattern.permute.xlu0 %v3185_v18 }
 0xdea   :  { %3071 = vset.pattern.permute.xlu1 %v3186_v33 }
 0xe07   :  { %v1496_v57 = vpop.trf.xlu0 }
 0xe19   :  { %v1185_v55 = vpop.f32.mrf.mxu1 }
 0xe1a   :  { %v3654_v32 = vadd.f32 %v1185_v55, %v3547_v3 }
 0xe1c   :  { %2952 = vmatmul.msk.f32.vlgmr.msra.gmra.mxu1 %vm26_vm3, %v3654_v32 }
 0xe21   :  { %v1188_v58 = vpop.f32.mrf.mxu1 }
 0xe22   :  { %v3659_v59 = vadd.f32 %v1188_v58, %v3557_v6 }
 0xe24   :  { %2953 = vmatmul.msk.f32.gmra.mxu1 %vm26_vm3, %v3659_v59 }
 0xe33   :  { %v1731_v0 = vpop.trf.xlu1 }
 0xe35   :  { %v1420_v53 = vpop.f32.mrf.mxu0 }
 0xe36   :  { %v3664_v60 = vadd.f32 %v1420_v53, %v3568_v14  ;;  %v1497_v14 = vpop.trf.xlu0 }
 0xe38   :  { %2965 = vmatmul.msk.f32.vlgmr.msrb.gmra.mxu0 %vm26_vm3, %v3664_v60 }
 0xe3b   :  { %v1732_v4 = vpop.trf.xlu1 }
 0xe3d   :  { %v1423_v61 = vpop.f32.mrf.mxu0 }
 0xe3e   :  { %v3669_v3 = vadd.f32 %v1423_v61, %v3579_v25 }
 0xe40   :  { %2966 = vmatmul.msk.f32.gmra.mxu0 %vm26_vm3, %v3669_v3 }
 0xe99   :  { %v1474_v6 = vpop.f32.mrf.mxu1 }
 0xea1   :  { %v1477_v62 = vpop.f32.mrf.mxu1 }
 0xea2   :  { %2954 = vmatpush.msk.msra.mxu3 %vm30_vm0, %v1477_v62 }
 0xea4   :  { %1536 = vmatpush.msra.mxu3 %v1474_v6 }
 0xea5   :  { %2955 = vmatmul.msk.f32.vlgmr.msra.gmra.mxu3 %vm26_vm3, %v1496_v57 }
 0xead   :  { %2956 = vmatmul.msk.f32.gmra.mxu3 %vm26_vm3, %v1497_v14 }
 0xeb5   :  { %v1709_v63 = vpop.f32.mrf.mxu0 }
 0xebd   :  { %v1712_v25 = vpop.f32.mrf.mxu0 }
 0xebe   :  { %2967 = vmatpush.msk.msrb.mxu1 %vm30_vm0, %v1712_v25 }
 0xec0   :  { %1771 = vmatpush.msrb.mxu1 %v1709_v63 }
 0xec1   :  { %2968 = vmatmul.msk.f32.vlgmr.msrb.gmra.mxu1 %vm26_vm3, %v1731_v0 }
 0xec9   :  { %2969 = vmatmul.msk.f32.gmra.mxu1 %vm26_vm3, %v1732_v4 }
 0xf28   :  { %v1538_v8 = vpop.f32.mrf.mxu3 }
 0xf29   :  { %v3683_v9 = vadd.f32 %v2949_v5, %v1538_v8 }
 0xf2b   :  { %1663 = vst.msk [vmem:[%s4276_s2 + $0x10] sm:$0xff] %vm254_vm4, %v3683_v9 }
 0xf30   :  { %v1541_v19 = vpop.f32.mrf.mxu3 }
 0xf31   :  { %v3693_v20 = vadd.f32 %v2950_v16, %v1541_v19 }
 0xf33   :  { %3135 = vrcp.f32 %v3693_v20  ;;  %1664 = vst.msk [vmem:[%s4276_s2 + $0x48] sm:$0x1f] %vm256_vm5, %v3693_v20 }
 0xf39   :  { %v3136_v10 = vpop.eup %3135 }
 0xf3a   :  { %v1547_v13 = vmul.f32 %v3136_v10, %v3693_v20 }
 0xf3c   :  { %v1548_v22 = vsub.f32 2.0, %v1547_v13 }
 0xf3e   :  { %v1773_v34 = vpop.f32.mrf.mxu1  ;;  %v1549_v35 = vmul.f32 %v3136_v10, %v1548_v22 }
 0xf3f   :  { %v3705_v36 = vadd.f32 %v2962_v24, %v1773_v34 }
 0xf40   :  { %1552 = vperm.xlu2 %3067, %v1549_v35  }
 0xf41   :  { %2973 = vst.msk [vmem:[%s4276_s2 + $0x80] sm:$0xff] %vm254_vm4, %v3705_v36 }
 0xf46   :  { %v1776_v38 = vpop.f32.mrf.mxu1 }
 0xf47   :  { %v3715_v41 = vadd.f32 %v2963_v37, %v1776_v38 }
 0xf48   :  { %1558 = vperm.xlu2 %3067, %v3693_v20  }
 0xf49   :  { %3137 = vrcp.f32 %v3715_v41  ;;  %2974 = vst.msk [vmem:[%s4276_s2 + $0xb8] sm:$0x1f] %vm256_vm5, %v3715_v41 }
 0xf4f   :  { %v3138_v42 = vpop.eup %3137 }
 0xf50   :  { %v1782_v43 = vmul.f32 %v3138_v42, %v3715_v41 }
 0xf52   :  { %v1783_v44 = vsub.f32 2.0, %v1782_v43 }
 0xf54   :  { %v1784_v48 = vmul.f32 %v3138_v42, %v1783_v44 }
 0xf56   :  { %1787 = vperm.xlu2 %3067, %v1784_v48  }
 0xf5e   :  { %1793 = vperm.xlu2 %3067, %v3715_v41  }
 0xf66   :  { %3068 = vset.pattern.permute.xlu2 %v3185_v18 }
 0xf9a   :  { %v1553_v50 = vpop.permute.xlu2 %1552 }
 0xf9b   :  { %v1555_v51 = vmul.f32 %v1553_v50, %v3693_v20 }
 0xf9d   :  { %v1561_v52 = vperm.slane %v1555_v51, 1 }
 0xfa2   :  { %v1559_v55 = vpop.permute.xlu2 %1558 }
 0xfa3   :  { %v1562_v58 = vmul.f32 %v1561_v52, %v1559_v55 }
 0xfa5   :  { %v1563_v53 = vsub.f32 %v3693_v20, %v1562_v58 }
 0xfa7   :  { %v1565_v61 = vrot.slane %v1563_v53, 1 }
 0xfa9   :  { %v1567_v6 = vsel %vm133_vm6, %v1561_v52, %v1565_v61 }
 0xfaa   :  { %1580 = vperm.xlu0 %3069, %v1567_v6   ;;  %3139 = vrcp.f32 %v1567_v6 }
 0xfb0   :  { %v3140_v57 = vpop.eup %3139  ;;  %v1788_v62 = vpop.permute.xlu2 %1787 }
 0xfb1   :  { %v1569_v14 = vmul.f32 %v3140_v57, %v1567_v6  ;;  %v1790_v63 = vmul.f32 %v1788_v62, %v3715_v41 }
 0xfb2   :  { %3073 = vset.pattern.permute.xlu0 %v3184_v7 }
 0xfb3   :  { %v1570_v0 = vsub.f32 2.0, %v1569_v14  ;;  %v1796_v4 = vperm.slane %v1790_v63, 1 }
 0xfb5   :  { %v1571_v25 = vmul.f32 %v3140_v57, %v1570_v0 }
 0xfb7   :  { %1574 = vperm.xlu2 %3068, %v1571_v25  }
 0xfb8   :  { %v1794_v5 = vpop.permute.xlu2 %1793 }
 0xfb9   :  { %v1797_v8 = vmul.f32 %v1796_v4, %v1794_v5 }
 0xfbb   :  { %v1798_v16 = vsub.f32 %v3715_v41, %v1797_v8 }
 0xfbd   :  { %v1800_v19 = vrot.slane %v1798_v16, 1 }
 0xfbf   :  { %v1802_v10 = vsel %vm133_vm6, %v1796_v4, %v1800_v19 }
 0xfc0   :  { %3141 = vrcp.f32 %v1802_v10 }
 0xfc6   :  { %v3142_v13 = vpop.eup %3141 }
 0xfc7   :  { %v1804_v24 = vmul.f32 %v3142_v13, %v1802_v10 }
 0xfc9   :  { %v1805_v22 = vsub.f32 2.0, %v1804_v24 }
 0xfcb   :  { %v1806_v34 = vmul.f32 %v3142_v13, %v1805_v22 }
 0xfcd   :  { %1809 = vperm.xlu2 %3068, %v1806_v34  }
 0xfd5   :  { %1815 = vperm.xlu2 %3068, %v1802_v10  }
 0xfdd   :  { %3070 = vset.pattern.permute.xlu2 %v3186_v33 }
0x1011   :  { %v1575_v35 = vpop.permute.xlu2 %1574 }
0x1012   :  { %v1577_v37 = vmul.f32 %v1575_v35, %v1567_v6 }
0x1014   :  { %v1583_v38 = vperm.slane %v1577_v37, 1 }
0x101c   :  { %v1581_v42 = vpop.permute.xlu0 %1580 }
0x101d   :  { %v1584_v43 = vmul.f32 %v1583_v38, %v1581_v42 }
0x101f   :  { %v1585_v44 = vsub.f32 %v1567_v6, %v1584_v43 }
0x1021   :  { %v1586_v48 = vsel %vm158_vm7, %v1583_v38, %v1585_v44 }
0x1022   :  { %3143 = vrcp.f32 %v1586_v48 }
0x1027   :  { %v1810_v50 = vpop.permute.xlu2 %1809 }
0x1028   :  { %v3144_v51 = vpop.eup %3143  ;;  %v1812_v55 = vmul.f32 %v1810_v50, %v1802_v10 }
0x1029   :  { %v1588_v52 = vmul.f32 %v3144_v51, %v1586_v48 }
0x102a   :  { %v1818_v61 = vperm.slane %v1812_v55, 1 }
0x102b   :  { %v1589_v58 = vsub.f32 2.0, %v1588_v52 }
0x102d   :  { %v1590_v53 = vmul.f32 %v3144_v51, %v1589_v58 }
0x102f   :  { %1593 = vperm.xlu2 %3070, %v1590_v53   ;;  %v1816_v57 = vpop.permute.xlu2 %1815 }
0x1030   :  { %v1819_v62 = vmul.f32 %v1818_v61, %v1816_v57 }
0x1032   :  { %v1820_v14 = vsub.f32 %v1802_v10, %v1819_v62 }
0x1034   :  { %v1821_v63 = vsel %vm158_vm7, %v1818_v61, %v1820_v14 }
0x1035   :  { %3145 = vrcp.f32 %v1821_v63 }
0x1037   :  { %1599 = vperm.xlu2 %3070, %v1586_v48  }
0x103b   :  { %v3146_v6 = vpop.eup %3145 }
0x103c   :  { %v1823_v0 = vmul.f32 %v3146_v6, %v1821_v63 }
0x103e   :  { %v1824_v25 = vsub.f32 2.0, %v1823_v0 }
0x103f   :  { %1834 = vperm.xlu2 %3070, %v1821_v63  }
0x1040   :  { %v1825_v4 = vmul.f32 %v3146_v6, %v1824_v25 }
0x1042   :  { %1828 = vperm.xlu1 %3071, %v1825_v4  }
0x1047   :  { %3072 = vset.pattern.permute.xlu2 %v3187_v45 }
0x1089   :  { %v1594_v5 = vpop.permute.xlu2 %1593 }
0x108a   :  { %v1596_v8 = vmul.f32 %v1594_v5, %v1586_v48 }
0x108c   :  { %v1602_v16 = vperm.slane %v1596_v8, 2 }
0x1091   :  { %v1600_v19 = vpop.permute.xlu2 %1599 }
0x1092   :  { %v1603_v13 = vmul.f32 %v1602_v16, %v1600_v19 }
0x1094   :  { %v1604_v24 = vsub.f32 %v1586_v48, %v1603_v13 }
0x1096   :  { %v1605_v10 = vsel %vm180_vm8, %v1602_v16, %v1604_v24 }
0x1097   :  { %3147 = vrcp.f32 %v1605_v10 }
0x1099   :  { %v1835_v44 = vpop.permute.xlu2 %1834 }
0x109d   :  { %v3148_v22 = vpop.eup %3147 }
0x109e   :  { %v1607_v34 = vmul.f32 %v3148_v22, %v1605_v10 }
0x10a0   :  { %v1608_v35 = vsub.f32 2.0, %v1607_v34 }
0x10a2   :  { %v1609_v37 = vmul.f32 %v3148_v22, %v1608_v35 }
0x10a4   :  { %1612 = vperm.xlu2 %3072, %v1609_v37  }
0x10ac   :  { %1618 = vperm.xlu2 %3072, %v1605_v10  }
0x10b4   :  { %v1829_v38 = vpop.permute.xlu1 %1828  ;;  %1627 = vrot.lane.b32.xlu2 %v3683_v9, %s3188_s5 }
0x10b5   :  { %v1831_v42 = vmul.f32 %v1829_v38, %v1821_v63  ;;  %v2979_v38 = vld [vmem:[%s4275_s0 + $0x28] sm:$0x1] }
0x10b7   :  { %v1837_v43 = vperm.slane %v1831_v42, 2  ;;  %v2978_v42 = vld [vmem:[%s4275_s0 + $0x20] sm:$0xff] }
0x10b9   :  { %v1838_v50 = vmul.f32 %v1837_v43, %v1835_v44  ;;  %v2992_v44 = vld [vmem:[%s4275_s0 + $0x38] sm:$0x1] }
0x10bb   :  { %v1839_v51 = vsub.f32 %v1821_v63, %v1838_v50 }
0x10bd   :  { %v1840_v48 = vsel %vm180_vm8, %v1837_v43, %v1839_v51  ;;  %v2991_v43 = vld [vmem:[%s4275_s0 + $0x30] sm:$0xff] }
0x10be   :  { %1853 = vperm.xlu2 %3072, %v1840_v48   ;;  %3149 = vrcp.f32 %v1840_v48  ;;  %2185 = vxpose.xlu1.b32.start [1/2] (short) (narrow) %v2991_v43, 16 }
0x10c4   :  { %v3150_v52 = vpop.eup %3149 }
0x10c5   :  { %v1842_v55 = vmul.f32 %v3150_v52, %v1840_v48 }
0x10c6   :  { %2186 = vxpose.xlu1.b32.end [2/2] (short) (narrow) %v2992_v44, 16 }
0x10c7   :  { %v1843_v58 = vsub.f32 2.0, %v1842_v55 }
0x10c9   :  { %v1844_v53 = vmul.f32 %v3150_v52, %v1843_v58 }
0x10cb   :  { %1847 = vperm.xlu2 %3072, %v1844_v53  }
0x10d3   :  { %1862 = vrot.lane.b32.xlu2 %v3705_v36, %s3188_s5 }
0x10db   :  { %1629 = vrot.lane.b32.xlu2 %v3693_v20, %s3188_s5 }
0x10e3   :  { %1864 = vrot.lane.b32.xlu2 %v3715_v41, %s3188_s5 }
0x10fe   :  { %v1613_v61 = vpop.permute.xlu2 %1612 }
0x10ff   :  { %v1615_v57 = vmul.f32 %v1613_v61, %v1605_v10 }
0x1101   :  { %v1621_v62 = vperm.slane %v1615_v57, 3 }
0x1106   :  { %v1619_v14 = vpop.permute.xlu2 %1618 }
0x1107   :  { %v1622_v63 = vmul.f32 %v1621_v62, %v1619_v14 }
0x1109   :  { %v1623_v6 = vsub.f32 %v1605_v10, %v1622_v63  ;;  %1950 = vxpose.xlu2.b32.start [1/2] (short) (narrow) %v2978_v42, 16 }
0x110b   :  { %v3756_v0 = vsel %vm202_vm9, %v1621_v62, %v1623_v6  ;;  %v2980_v6 = vld [vmem:[%s4277_s1 + $0x20] sm:$0xff] }
0x110c   :  { %v1625_v25 = vsub.f32 0.0, %v3756_v0 }
0x110e   :  { %2957 = vmatpush.msk.msrb.mxu2 %vm225_vm10, %v1625_v25  ;;  %v1628_v4 = vpop.permute.xlu2 %1627 }
0x110f   :  { %2958 = vmatmul.msk.f32.vlgmr.msrb.gmra.mxu2 %vm220_vm11, %v1628_v4 }
0x1110   :  { %2982 = vmatpush.msk.msra.mxu2 %vm30_vm0, %v2979_v38 }
0x1111   :  { %1951 = vxpose.xlu2.b32.end [2/2] (short) (narrow) %v2979_v38, 16  ;;  %v2994_v38 = vld [vmem:[%s4277_s1 + $0x38] sm:$0x1f] }
0x1112   :  { %1942 = vmatpush.msra.mxu2 %v2978_v42 }
0x1118   :  { %v1854_v5 = vpop.permute.xlu2 %1853 }
0x1119   :  { %3076 = vset.pattern.permute.xlu1 %v3185_v18 }
0x1125   :  { %v1848_v8 = vpop.permute.xlu2 %1847 }
0x1126   :  { %v1850_v16 = vmul.f32 %v1848_v8, %v1840_v48  ;;  %v2981_v8 = vld [vmem:[%s4277_s1 + $0x28] sm:$0x1f] }
0x1128   :  { %v1856_v19 = vperm.slane %v1850_v16, 3 }
0x112a   :  { %v1857_v13 = vmul.f32 %v1856_v19, %v1854_v5 }
0x112c   :  { %v1858_v24 = vsub.f32 %v1840_v48, %v1857_v13  ;;  %v2993_v13 = vld [vmem:[%s4277_s1 + $0x30] sm:$0xff] }
0x112d   :  { %v1863_v10 = vpop.permute.xlu2 %1862 }
0x112e   :  { %v3765_v22 = vsel %vm202_vm9, %v1856_v19, %v1858_v24 }
0x112f   :  { %v1860_v34 = vsub.f32 0.0, %v3765_v22 }
0x1131   :  { %2970 = vmatpush.msk.msrb.mxu3 %vm225_vm10, %v1860_v34 }
0x1132   :  { %2971 = vmatmul.msk.f32.vlgmr.msrb.gmra.mxu3 %vm220_vm11, %v1863_v10 }
0x1133   :  { %2995 = vmatpush.msk.msra.mxu3 %vm30_vm0, %v2992_v44 }
0x1135   :  { %v1630_v35 = vpop.permute.xlu2 %1629  ;;  %2177 = vmatpush.msra.mxu3 %v2991_v43 }
0x1136   :  { %2959 = vmatmul.msk.f32.gmra.mxu2 %vm220_vm11, %v1630_v35 }
0x113d   :  { %v1865_v37 = vpop.permute.xlu2 %1864 }
0x113e   :  { %2972 = vmatmul.msk.f32.gmra.mxu3 %vm220_vm11, %v1865_v37 }
0x1173   :  { %3074 = vset.pattern.permute.xlu2 %v3185_v18 }
0x1192   :  { %v1655_v50 = vpop.f32.mrf.mxu2 }
0x1193   :  { %v3789_v51 = vadd.f32 %v1655_v50, %v3683_v9 }
0x1195   :  { %2983 = vmatmul.msk.f32.vlgmr.msra.gmra.mxu2 %vm26_vm3, %v3789_v51 }
0x11a2   :  { %v1966_v61 = vpop.trf.xlu2 }
0x11b5   :  { %v1890_v48 = vpop.f32.mrf.mxu3 }
0x11b6   :  { %v3794_v52 = vadd.f32 %v1890_v48, %v3705_v36 }
0x11b8   :  { %2996 = vmatmul.msk.f32.vlgmr.msra.gmra.mxu3 %vm26_vm3, %v3794_v52 }
0x11b9   :  { %v1658_v55 = vpop.f32.mrf.mxu2 }
0x11ba   :  { %v3799_v58 = vadd.f32 %v1658_v55, %v3693_v20  ;;  %v2201_v20 = vpop.trf.xlu1 }
0x11bc   :  { %2984 = vmatmul.msk.f32.gmra.mxu2 %vm26_vm3, %v3799_v58 }
0x11c1   :  { %v1893_v53 = vpop.f32.mrf.mxu3 }
0x11c2   :  { %v3804_v9 = vadd.f32 %v1893_v53, %v3715_v41  ;;  %v1967_v41 = vpop.trf.xlu2  ;;  %v2202_v63 = vpop.trf.xlu1 }
0x11c4   :  { %2997 = vmatmul.msk.f32.gmra.mxu3 %vm26_vm3, %v3804_v9 }
0x1218   :  { %v1944_v36 = vpop.f32.mrf.mxu2 }
0x123b   :  { %v2179_v57 = vpop.f32.mrf.mxu3 }
0x123f   :  { %v1947_v62 = vpop.f32.mrf.mxu2 }
0x1240   :  { %2985 = vmatpush.msk.msra.mxu0 %vm30_vm0, %v1947_v62 }
0x1242   :  { %2006 = vmatpush.msra.mxu0 %v1944_v36 }
0x1243   :  { %2986 = vmatmul.msk.f32.vlgmr.msra.gmra.mxu0 %vm26_vm3, %v1966_v61 }
0x1247   :  { %v2182_v14 = vpop.f32.mrf.mxu3 }
0x1248   :  { %2998 = vmatpush.msk.msrb.mxu2 %vm30_vm0, %v2182_v14 }
0x124a   :  { %2241 = vmatpush.msrb.mxu2 %v2179_v57 }
0x124b   :  { %2987 = vmatmul.msk.f32.gmra.mxu0 %vm26_vm3, %v1967_v41  ;;  %2999 = vmatmul.msk.f32.vlgmr.msrb.gmra.mxu2 %vm26_vm3, %v2201_v20 }
0x1253   :  { %3000 = vmatmul.msk.f32.gmra.mxu2 %vm26_vm3, %v2202_v63 }
0x12c0   :  { %v2008_v4 = vpop.f32.mrf.mxu0 }
0x12c1   :  { %v3819_v5 = vadd.f32 %v2980_v6, %v2008_v4 }
0x12c3   :  { %2133 = vst.msk [vmem:[%s4276_s2 + $0x8] sm:$0xff] %vm254_vm4, %v3819_v5 }
0x12c8   :  { %v2011_v16 = vpop.f32.mrf.mxu0 }
0x12c9   :  { %v3829_v19 = vadd.f32 %v2981_v8, %v2011_v16 }
0x12cb   :  { %3151 = vrcp.f32 %v3829_v19  ;;  %2134 = vst.msk [vmem:[%s4276_s2 + $0x40] sm:$0x1f] %vm256_vm5, %v3829_v19 }
0x12ce   :  { %v2243_v24 = vpop.f32.mrf.mxu2 }
0x12cf   :  { %v3840_v10 = vadd.f32 %v2993_v13, %v2243_v24 }
0x12d1   :  { %v3152_v35 = vpop.eup %3151  ;;  %3004 = vst.msk [vmem:[%s4276_s2 + $0x78] sm:$0xff] %vm254_vm4, %v3840_v10 }
0x12d2   :  { %v2017_v37 = vmul.f32 %v3152_v35, %v3829_v19 }
0x12d4   :  { %v2018_v42 = vsub.f32 2.0, %v2017_v37 }
0x12d6   :  { %v2246_v43 = vpop.f32.mrf.mxu2  ;;  %v2019_v44 = vmul.f32 %v3152_v35, %v2018_v42 }
0x12d7   :  { %v3851_v50 = vadd.f32 %v2994_v38, %v2246_v43 }
0x12d8   :  { %2022 = vperm.xlu0 %3073, %v2019_v44  }
0x12d9   :  { %3153 = vrcp.f32 %v3851_v50  ;;  %3005 = vst.msk [vmem:[%s4276_s2 + $0xb0] sm:$0x1f] %vm256_vm5, %v3851_v50 }
0x12df   :  { %v3154_v48 = vpop.eup %3153 }
0x12e0   :  { %2028 = vperm.xlu0 %3073, %v3829_v19   ;;  %v2252_v55 = vmul.f32 %v3154_v48, %v3851_v50 }
0x12e2   :  { %v2253_v53 = vsub.f32 2.0, %v2252_v55 }
0x12e4   :  { %v2254_v36 = vmul.f32 %v3154_v48, %v2253_v53 }
0x12e8   :  { %2257 = vperm.xlu0 %3073, %v2254_v36  }
0x12f0   :  { %2263 = vperm.xlu0 %3073, %v3851_v50  }
0x12f8   :  { %3075 = vset.pattern.permute.xlu0 %v3185_v18 }
0x134a   :  { %v2023_v61 = vpop.permute.xlu0 %2022 }
0x134b   :  { %v2025_v57 = vmul.f32 %v2023_v61, %v3829_v19 }
0x134d   :  { %v2031_v62 = vperm.slane %v2025_v57, 1  ;;  %v3890_v57 = vld [vmem:[%s4275_s0 + $0x18] sm:$0x1] }
0x1352   :  { %v2029_v20 = vpop.permute.xlu0 %2028 }
0x1353   :  { %v2032_v14 = vmul.f32 %v2031_v62, %v2029_v20 }
0x1355   :  { %v2033_v41 = vsub.f32 %v3829_v19, %v2032_v14 }
0x1357   :  { %v2035_v63 = vrot.slane %v2033_v41, 1 }
0x1359   :  { %v2037_v6 = vsel %vm133_vm6, %v2031_v62, %v2035_v63 }
0x135a   :  { %2050 = vperm.xlu0 %3075, %v2037_v6   ;;  %v2258_v4 = vpop.permute.xlu0 %2257  ;;  %3155 = vrcp.f32 %v2037_v6 }
0x135b   :  { %v2260_v8 = vmul.f32 %v2258_v4, %v3851_v50 }
0x135d   :  { %v2266_v13 = vperm.slane %v2260_v8, 1 }
0x1360   :  { %v3156_v16 = vpop.eup %3155 }
0x1361   :  { %v2039_v24 = vmul.f32 %v3156_v16, %v2037_v6 }
0x1362   :  { %v2264_v35 = vpop.permute.xlu0 %2263 }
0x1363   :  { %v2267_v37 = vmul.f32 %v2266_v13, %v2264_v35  ;;  %v2040_v38 = vsub.f32 2.0, %v2039_v24 }
0x1365   :  { %v2268_v42 = vsub.f32 %v3851_v50, %v2267_v37  ;;  %v2041_v43 = vmul.f32 %v3156_v16, %v2040_v38 }
0x1367   :  { %v2270_v44 = vrot.slane %v2268_v42, 1  ;;  %2044 = vperm.xlu2 %3074, %v2041_v43  }
0x1369   :  { %v2272_v48 = vsel %vm133_vm6, %v2266_v13, %v2270_v44 }
0x136a   :  { %2285 = vperm.xlu1 %3076, %v2272_v48   ;;  %3157 = vrcp.f32 %v2272_v48 }
0x136f   :  { %2097 = vrot.lane.b32.xlu2 %v3819_v5, %s3188_s5 }
0x1370   :  { %v3158_v55 = vpop.eup %3157  ;;  %3079 = vset.pattern.permute.xlu2 %v3184_v7  ;;  %v3884_v7 = vld [vmem:[%s4275_s0 + $0x10] sm:$0xff] }
0x1371   :  { %v2274_v53 = vmul.f32 %v3158_v55, %v2272_v48 }
0x1372   :  { %2099 = vrot.lane.b32.xlu1 %v3829_v19, %s3188_s5 }
0x1373   :  { %v2275_v36 = vsub.f32 2.0, %v2274_v53 }
0x1375   :  { %v2276_v61 = vmul.f32 %v3158_v55, %v2275_v36 }
0x1377   :  { %2334 = vrot.lane.b32.xlu2 %v3851_v50, %s3188_s5  ;;  %2279 = vperm.xlu0 %3075, %v2276_v61  }
0x137f   :  { %260 = vrot.lane.b32.xlu2 %v3323_v15, %s3189_s29  ;;  %3077 = vset.pattern.permute.xlu0 %v3186_v33 }
0x13a7   :  { %2653 = vxpose.xlu1.b32.start [1/2] (short) (narrow) %v3884_v7, 16 }
0x13af   :  { %2654 = vxpose.xlu1.b32.end [2/2] (short) (narrow) %v3890_v57, 16 }
0x13c1   :  { %v2045_v62 = vpop.permute.xlu2 %2044 }
0x13c2   :  { %v2047_v20 = vmul.f32 %v2045_v62, %v2037_v6 }
0x13c4   :  { %v2053_v15 = vperm.slane %v2047_v20, 1 }
0x13c9   :  { %v3893_v14 = vpop.permute.xlu2 %2097 }
0x13cc   :  { %v2051_v41 = vpop.permute.xlu0 %2050 }
0x13cd   :  { %v2054_v63 = vmul.f32 %v2053_v15, %v2051_v41 }
0x13cf   :  { %v2055_v4 = vsub.f32 %v2037_v6, %v2054_v63 }
0x13d1   :  { %v2056_v8 = vsel %vm158_vm7, %v2053_v15, %v2055_v4  ;;  %v3897_v16 = vpop.permute.xlu2 %2334 }
0x13d2   :  { %3159 = vrcp.f32 %v2056_v8 }
0x13d8   :  { %v3160_v13 = vpop.eup %3159 }
0x13d9   :  { %v261_v24 = vpop.permute.xlu2 %260  ;;  %v2058_v35 = vmul.f32 %v3160_v13, %v2056_v8 }
0x13da   :  { %266 = vst.msk [vmem:[%s4276_s2 + $0x28] sm:$0xff] %vm13_vm1, %v261_v24 }
0x13db   :  { %v2059_v37 = vsub.f32 2.0, %v2058_v35 }
0x13dc   :  { %v2286_v44 = vpop.permute.xlu1 %2285 }
0x13dd   :  { %v2060_v38 = vmul.f32 %v3160_v13, %v2059_v37 }
0x13df   :  { %2063 = vperm.xlu0 %3077, %v2060_v38  }
0x13e7   :  { %2069 = vperm.xlu0 %3077, %v2056_v8  }
0x13e9   :  { %v2280_v42 = vpop.permute.xlu0 %2279 }
0x13ea   :  { %v2282_v6 = vmul.f32 %v2280_v42, %v2272_v48 }
0x13ec   :  { %v2288_v43 = vperm.slane %v2282_v6, 1 }
0x13ee   :  { %v2289_v55 = vmul.f32 %v2288_v43, %v2286_v44  ;;  %v2385_v44 = vld [vmem:[%s4275_s0 + $0x8] sm:$0x1] }
0x13f0   :  { %v2290_v53 = vsub.f32 %v2272_v48, %v2289_v55 }
0x13f2   :  { %v2291_v36 = vsel %vm158_vm7, %v2288_v43, %v2290_v53  ;;  %v2384_v43 = vld [vmem:[%s4275_s0] sm:$0xff] }
0x13f3   :  { %3161 = vrcp.f32 %v2291_v36 }
0x13f9   :  { %v3162_v61 = vpop.eup %3161 }
0x13fa   :  { %v2293_v62 = vmul.f32 %v3162_v61, %v2291_v36 }
0x13fc   :  { %v2294_v20 = vsub.f32 2.0, %v2293_v62 }
0x13fe   :  { %v2295_v15 = vmul.f32 %v3162_v61, %v2294_v20 }
0x1400   :  { %2298 = vperm.xlu0 %3077, %v2295_v15  }
0x1402   :  { %3083 = vset.pattern.permute.xlu1 %v3186_v33 }
0x1408   :  { %2304 = vperm.xlu0 %3077, %v2291_v36  }
0x1409   :  { %500 = vrot.lane.b32.xlu1 %v450_v11, %s3190_s9 }
0x1410   :  { %3078 = vset.pattern.permute.xlu0 %v3187_v45 }
0x1411   :  { %1205 = vrot.lane.b32.xlu1 %v1155_v21, %s3190_s9 }
0x1419   :  { %1440 = vrot.lane.b32.xlu1 %v1390_v47, %s3190_s9 }
0x1421   :  { %1675 = vrot.lane.b32.xlu1 %v1625_v25, %s3190_s9 }
0x1429   :  { %1910 = vrot.lane.b32.xlu1 %v1860_v34, %s3190_s9 }
0x1451   :  { %v2064_v12 = vpop.permute.xlu0 %2063 }
0x1452   :  { %v2066_v11 = vmul.f32 %v2064_v12, %v2056_v8 }
0x1454   :  { %v2072_v48 = vperm.slane %v2066_v11, 2  ;;  %v2100_v11 = vpop.permute.xlu1 %2099 }
0x1459   :  { %v2070_v41 = vpop.permute.xlu0 %2069 }
0x145a   :  { %v2073_v63 = vmul.f32 %v2072_v48, %v2070_v41 }
0x145c   :  { %v2074_v4 = vsub.f32 %v2056_v8, %v2073_v63 }
0x145e   :  { %v2075_v27 = vsel %vm180_vm8, %v2072_v48, %v2074_v4 }
0x145f   :  { %3163 = vrcp.f32 %v2075_v27 }
0x1465   :  { %v3164_v21 = vpop.eup %3163 }
0x1466   :  { %v2077_v46 = vmul.f32 %v3164_v21, %v2075_v27 }
0x1468   :  { %v2078_v47 = vsub.f32 2.0, %v2077_v46 }
0x146a   :  { %v2079_v13 = vmul.f32 %v3164_v21, %v2078_v47 }
0x146c   :  { %2082 = vperm.xlu0 %3078, %v2079_v13  }
0x1472   :  { %v2299_v0 = vpop.permute.xlu0 %2298 }
0x1473   :  { %v2301_v25 = vmul.f32 %v2299_v0, %v2291_v36 }
0x1474   :  { %2088 = vperm.xlu0 %3078, %v2075_v27  }
0x1475   :  { %v2307_v22 = vperm.slane %v2301_v25, 2 }
0x147a   :  { %v2305_v34 = vpop.permute.xlu0 %2304 }
0x147b   :  { %v2308_v24 = vmul.f32 %v2307_v22, %v2305_v34 }
0x147d   :  { %v2309_v35 = vsub.f32 %v2291_v36, %v2308_v24 }
0x147f   :  { %v2310_v37 = vsel %vm180_vm8, %v2307_v22, %v2309_v35 }
0x1480   :  { %2323 = vperm.xlu0 %3078, %v2310_v37   ;;  %3165 = vrcp.f32 %v2310_v37 }
0x1486   :  { %v3166_v8 = vpop.eup %3165 }
0x1487   :  { %v2312_v38 = vmul.f32 %v3166_v8, %v2310_v37 }
0x1489   :  { %v2313_v42 = vsub.f32 2.0, %v2312_v38  ;;  %v2386_v38 = vld [vmem:[%s4277_s1] sm:$0xff] }
0x148b   :  { %v2314_v6 = vmul.f32 %v3166_v8, %v2313_v42 }
0x148d   :  { %2317 = vperm.xlu0 %3078, %v2314_v6  }
0x1495   :  { %2332 = vrot.lane.b32.xlu0 %v3840_v10, %s3188_s5 }
0x14b7   :  { %2418 = vxpose.xlu0.b32.start [1/2] (short) (narrow) %v2384_v43, 16 }
0x14bf   :  { %2419 = vxpose.xlu0.b32.end [2/2] (short) (narrow) %v2385_v44, 16 }
0x14de   :  { %v2083_v55 = vpop.permute.xlu0 %2082 }
0x14df   :  { %v2085_v53 = vmul.f32 %v2083_v55, %v2075_v27 }
0x14e1   :  { %v2091_v36 = vperm.slane %v2085_v53, 3 }
0x14e6   :  { %v2089_v61 = vpop.permute.xlu0 %2088 }
0x14e7   :  { %v2092_v62 = vmul.f32 %v2091_v36, %v2089_v61 }
0x14e9   :  { %v2093_v20 = vsub.f32 %v2075_v27, %v2092_v62  ;;  %v3020_v62 = vld [vmem:[%s4277_s1 + $0x10] sm:$0xff] }
0x14eb   :  { %v3936_v15 = vsel %vm202_vm9, %v2091_v36, %v2093_v20 }
0x14ec   :  { %v2095_v12 = vsub.f32 0.0, %v3936_v15 }
0x14ee   :  { %2988 = vmatpush.msk.msra.mxu1 %vm225_vm10, %v2095_v12 }
0x14ef   :  { %2989 = vmatmul.msk.f32.vlgmr.msra.gmra.mxu1 %vm220_vm11, %v3893_v14 }
0x14f0   :  { %3009 = vmatpush.msk.msrb.mxu1 %vm30_vm0, %v2385_v44 }
0x14f2   :  { %2410 = vmatpush.msrb.mxu1 %v2384_v43  ;;  %v2324_v48 = vpop.permute.xlu0 %2323  ;;  %v2387_v43 = vld [vmem:[%s4277_s1 + $0x8] sm:$0x1f] }
0x14f7   :  { %2990 = vmatmul.msk.f32.gmra.mxu1 %vm220_vm11, %v2100_v11 }
0x14ff   :  { %v2318_v41 = vpop.permute.xlu0 %2317 }
0x1500   :  { %v2320_v63 = vmul.f32 %v2318_v41, %v2310_v37  ;;  %v3021_v41 = vld [vmem:[%s4277_s1 + $0x18] sm:$0x1f] }
0x1502   :  { %v2326_v4 = vperm.slane %v2320_v63, 3 }
0x1504   :  { %v2327_v27 = vmul.f32 %v2326_v4, %v2324_v48 }
0x1506   :  { %v2328_v21 = vsub.f32 %v2310_v37, %v2327_v27  ;;  %v2669_v37 = vpop.trf.xlu1 }
0x1507   :  { %v2333_v13 = vpop.permute.xlu0 %2332 }
0x1508   :  { %v3948_v46 = vsel %vm202_vm9, %v2326_v4, %v2328_v21 }
0x1509   :  { %v2330_v47 = vsub.f32 0.0, %v3948_v46 }
0x150b   :  { %3001 = vmatpush.msk.msrb.mxu0 %vm225_vm10, %v2330_v47 }
0x150c   :  { %3002 = vmatmul.msk.f32.vlgmr.msrb.gmra.mxu0 %vm220_vm11, %v2333_v13 }
0x150d   :  { %3022 = vmatpush.msk.msra.mxu0 %vm30_vm0, %v3890_v57 }
0x150e   :  { %v2670_v8 = vpop.trf.xlu1 }
0x150f   :  { %2645 = vmatpush.msra.mxu0 %v3884_v7 }
0x1514   :  { %3003 = vmatmul.msk.f32.gmra.mxu0 %vm220_vm11, %v3897_v16 }
0x1526   :  { %3082 = vset.pattern.permute.xlu0 %v3186_v33 }
0x152d   :  { %262 = vrot.lane.b32.xlu0 %v3328_v17, %s3189_s29 }
0x1535   :  { %1199 = vrot.lane.b32.xlu0 %v3659_v59, %s3189_s29 }
0x153d   :  { %1434 = vrot.lane.b32.xlu0 %v3669_v3, %s3189_s29 }
0x1545   :  { %1669 = vrot.lane.b32.xlu0 %v3799_v58, %s3189_s29 }
0x154d   :  { %1904 = vrot.lane.b32.xlu0 %v3804_v9, %s3189_s29 }
0x155b   :  { %v2434_v58 = vpop.trf.xlu0 }
0x156c   :  { %v2125_v7 = vpop.f32.mrf.mxu1 }
0x156d   :  { %v3972_v57 = vadd.f32 %v2125_v7, %v3819_v5 }
0x156f   :  { %3010 = vmatmul.msk.f32.vlgmr.msrb.gmra.mxu1 %vm26_vm3, %v3972_v57 }
0x1574   :  { %v2128_v17 = vpop.f32.mrf.mxu1 }
0x1575   :  { %v3977_v14 = vadd.f32 %v2128_v17, %v3829_v19  ;;  %v2435_v19 = vpop.trf.xlu0 }
0x1577   :  { %3011 = vmatmul.msk.f32.gmra.mxu1 %vm26_vm3, %v3977_v14 }
0x1589   :  { %v2360_v59 = vpop.f32.mrf.mxu0 }
0x158a   :  { %v3982_v3 = vadd.f32 %v2360_v59, %v3840_v10 }
0x158c   :  { %3023 = vmatmul.msk.f32.vlgmr.msra.gmra.mxu0 %vm26_vm3, %v3982_v3 }
0x1591   :  { %v2363_v9 = vpop.f32.mrf.mxu0 }
0x1592   :  { %v3987_v5 = vadd.f32 %v2363_v9, %v3851_v50 }
0x1594   :  { %3024 = vmatmul.msk.f32.gmra.mxu0 %vm26_vm3, %v3987_v5 }
0x159f   :  { %v263_v16 = vpop.permute.xlu0 %262 }
0x15a0   :  { %267 = vst.msk [vmem:[%s4276_s2 + $0x60] sm:$0x1] %vm15_vm2, %v263_v16 }
0x15a7   :  { %v1200_v10 = vpop.permute.xlu0 %1199 }
0x15a8   :  { %1204 = vst.msk [vmem:[%s4276_s2 + $0x50] sm:$0x1] %vm15_vm2, %v1200_v10 }
0x15af   :  { %v1435_v0 = vpop.permute.xlu0 %1434 }
0x15b0   :  { %2945 = vst.msk [vmem:[%s4276_s2 + $0xc0] sm:$0x1] %vm15_vm2, %v1435_v0 }
0x15b7   :  { %v1670_v50 = vpop.permute.xlu0 %1669 }
0x15b8   :  { %1674 = vst.msk [vmem:[%s4276_s2 + $0x48] sm:$0x1] %vm15_vm2, %v1670_v50 }
0x15bf   :  { %v1905_v25 = vpop.permute.xlu0 %1904 }
0x15c0   :  { %2976 = vst.msk [vmem:[%s4276_s2 + $0xb8] sm:$0x1] %vm15_vm2, %v1905_v25 }
0x15ec   :  { %v2412_v22 = vpop.f32.mrf.mxu1 }
0x15f4   :  { %v2415_v34 = vpop.f32.mrf.mxu1 }
0x15f5   :  { %3012 = vmatpush.msk.msrb.mxu3 %vm30_vm0, %v2415_v34 }
0x15f7   :  { %2474 = vmatpush.msrb.mxu3 %v2412_v22 }
0x15f8   :  { %3013 = vmatmul.msk.f32.vlgmr.msrb.gmra.mxu3 %vm26_vm3, %v2434_v58 }
0x1600   :  { %3014 = vmatmul.msk.f32.gmra.mxu3 %vm26_vm3, %v2435_v19 }
0x1609   :  { %v2647_v24 = vpop.f32.mrf.mxu0 }
0x1611   :  { %v2650_v35 = vpop.f32.mrf.mxu0 }
0x1612   :  { %3025 = vmatpush.msk.msra.mxu1 %vm30_vm0, %v2650_v35 }
0x1614   :  { %2709 = vmatpush.msra.mxu1 %v2647_v24 }
0x1615   :  { %3026 = vmatmul.msk.f32.vlgmr.msra.gmra.mxu1 %vm26_vm3, %v2669_v37 }
0x161d   :  { %3027 = vmatmul.msk.f32.gmra.mxu1 %vm26_vm3, %v2670_v8 }
0x167b   :  { %v2476_v42 = vpop.f32.mrf.mxu3 }
0x167c   :  { %v4020_v6 = vadd.f32 %v2476_v42, %v2386_v38 }
0x167e   :  { %2601 = vst.msk [vmem:[%s4276_s2] sm:$0xff] %vm254_vm4, %v4020_v6 }
0x1683   :  { %v2479_v44 = vpop.f32.mrf.mxu3 }
0x1684   :  { %v4030_v55 = vadd.f32 %v2479_v44, %v2387_v43 }
0x1686   :  { %2602 = vst.msk [vmem:[%s4276_s2 + $0x38] sm:$0x1f] %vm256_vm5, %v4030_v55  ;;  %3167 = vrcp.f32 %v4030_v55 }
0x168c   :  { %v3168_v53 = vpop.eup %3167 }
0x168d   :  { %v2485_v36 = vmul.f32 %v3168_v53, %v4030_v55 }
0x168f   :  { %v2486_v61 = vsub.f32 2.0, %v2485_v36 }
0x1691   :  { %v2487_v20 = vmul.f32 %v3168_v53, %v2486_v61 }
0x1692   :  { %v2711_v11 = vpop.f32.mrf.mxu1 }
0x1693   :  { %2490 = vperm.xlu2 %3079, %v2487_v20   ;;  %v4042_v48 = vadd.f32 %v3020_v62, %v2711_v11 }
0x1695   :  { %3031 = vst.msk [vmem:[%s4276_s2 + $0x70] sm:$0xff] %vm254_vm4, %v4042_v48 }
0x169a   :  { %v2714_v63 = vpop.f32.mrf.mxu1 }
0x169b   :  { %2496 = vperm.xlu2 %3079, %v4030_v55   ;;  %v4053_v4 = vadd.f32 %v3021_v41, %v2714_v63 }
0x169d   :  { %3032 = vst.msk [vmem:[%s4276_s2 + $0xa8] sm:$0x1f] %vm256_vm5, %v4053_v4  ;;  %3169 = vrcp.f32 %v4053_v4 }
0x16a3   :  { %268 = vrot.lane.b32.xlu2 %v214_v2, %s3190_s9  ;;  %v3170_v27 = vpop.eup %3169 }
0x16a4   :  { %v2720_v21 = vmul.f32 %v3170_v27, %v4053_v4 }
0x16a6   :  { %v2721_v13 = vsub.f32 2.0, %v2720_v21 }
0x16a8   :  { %v2722_v7 = vmul.f32 %v3170_v27, %v2721_v13 }
0x16ab   :  { %492 = vrot.lane.b32.xlu2 %v3396_v26, %s3189_s29 }
0x16b3   :  { %494 = vrot.lane.b32.xlu2 %v3401_v28, %s3189_s29 }
0x16bb   :  { %727 = vrot.lane.b32.xlu2 %v3513_v49, %s3189_s29 }
0x16c3   :  { %2731 = vperm.xlu2 %3079, %v4053_v4  }
0x16cb   :  { %2725 = vperm.xlu2 %3079, %v2722_v7  }
0x16d3   :  { %729 = vrot.lane.b32.xlu2 %v3523_v54, %s3189_s29 }
0x16d4   :  { %3080 = vset.pattern.permute.xlu2 %v3185_v18 }
0x16db   :  { %735 = vrot.lane.b32.xlu2 %v685_v30, %s3190_s9 }
0x16e3   :  { %962 = vrot.lane.b32.xlu2 %v3526_v31, %s3189_s29 }
0x16eb   :  { %964 = vrot.lane.b32.xlu2 %v3533_v56, %s3189_s29  ;;  %v501_v56 = vpop.permute.xlu1 %500 }
0x16ed   :  { %v2491_v1 = vpop.permute.xlu2 %2490 }
0x16ee   :  { %v2493_v2 = vmul.f32 %v2491_v1, %v4030_v55 }
0x16f0   :  { %v2499_v26 = vperm.slane %v2493_v2, 1 }
0x16f3   :  { %970 = vrot.lane.b32.xlu2 %v920_v40, %s3190_s9  ;;  %v1206_v1 = vpop.permute.xlu1 %1205 }
0x16f5   :  { %v2497_v28 = vpop.permute.xlu2 %2496 }
0x16f6   :  { %v2500_v18 = vmul.f32 %v2499_v26, %v2497_v28 }
0x16f8   :  { %v2501_v49 = vsub.f32 %v4030_v55, %v2500_v18 }
0x16fa   :  { %v2503_v29 = vrot.slane %v2501_v49, 1 }
0x16fb   :  { %v1441_v28 = vpop.permute.xlu1 %1440 }
0x16fc   :  { %v2505_v30 = vsel %vm133_vm6, %v2499_v26, %v2503_v29 }
0x16fd   :  { %3171 = vrcp.f32 %v2505_v30  ;;  %v269_v54 = vpop.permute.xlu2 %268 }
0x16fe   :  { %272 = vst.msk [vmem:[%s4276_s2 + $0x28] sm:$0xf] %vm271_vm12, %v269_v54 }
0x1703   :  { %v3172_v31 = vpop.eup %3171 }
0x1704   :  { %v2507_v39 = vmul.f32 %v3172_v31, %v2505_v30 }
0x1705   :  { %v493_v40 = vpop.permute.xlu2 %492 }
0x1706   :  { %2882 = vst.msk [vmem:[%s4276_s2 + $0x98] sm:$0xff] %vm13_vm1, %v493_v40  ;;  %v2508_v17 = vsub.f32 2.0, %v2507_v39 }
0x1707   :  { %2884 = vst.msk [vmem:[%s4276_s2 + $0x98] sm:$0xf] %vm271_vm12, %v501_v56 }
0x1708   :  { %v2509_v59 = vmul.f32 %v3172_v31, %v2508_v17 }
0x170a   :  { %2512 = vperm.xlu2 %3080, %v2509_v59  }
0x170d   :  { %v495_v58 = vpop.permute.xlu2 %494 }
0x170e   :  { %2883 = vst.msk [vmem:[%s4276_s2 + $0xd0] sm:$0x1] %vm15_vm2, %v495_v58 }
0x1712   :  { %2518 = vperm.xlu2 %3080, %v2505_v30  }
0x1715   :  { %v728_v9 = vpop.permute.xlu2 %727 }
0x1716   :  { %733 = vst.msk [vmem:[%s4276_s2 + $0x20] sm:$0xff] %vm13_vm1, %v728_v9 }
0x171d   :  { %v2732_v19 = vpop.permute.xlu2 %2731 }
0x1725   :  { %v2726_v16 = vpop.permute.xlu2 %2725 }
0x1726   :  { %v2728_v10 = vmul.f32 %v2726_v16, %v4053_v4 }
0x1728   :  { %v2734_v0 = vperm.slane %v2728_v10, 1 }
0x172a   :  { %v2735_v50 = vmul.f32 %v2734_v0, %v2732_v19 }
0x172c   :  { %v2736_v25 = vsub.f32 %v4053_v4, %v2735_v50 }
0x172d   :  { %v730_v22 = vpop.permute.xlu2 %729 }
0x172e   :  { %v2738_v34 = vrot.slane %v2736_v25, 1  ;;  %734 = vst.msk [vmem:[%s4276_s2 + $0x58] sm:$0x1] %vm15_vm2, %v730_v22 }
0x1730   :  { %v2740_v24 = vsel %vm133_vm6, %v2734_v0, %v2738_v34 }
0x1731   :  { %3173 = vrcp.f32 %v2740_v24 }
0x1735   :  { %v736_v35 = vpop.permute.xlu2 %735 }
0x1736   :  { %738 = vst.msk [vmem:[%s4276_s2 + $0x20] sm:$0xf] %vm271_vm12, %v736_v35 }
0x1737   :  { %v3174_v37 = vpop.eup %3173 }
0x1738   :  { %v2742_v8 = vmul.f32 %v3174_v37, %v2740_v24 }
0x173a   :  { %v2743_v38 = vsub.f32 2.0, %v2742_v8 }
0x173c   :  { %v2744_v42 = vmul.f32 %v3174_v37, %v2743_v38 }
0x173d   :  { %v963_v43 = vpop.permute.xlu2 %962 }
0x173e   :  { %2913 = vst.msk [vmem:[%s4276_s2 + $0x90] sm:$0xff] %vm13_vm1, %v963_v43  ;;  %2747 = vperm.xlu2 %3080, %v2744_v42  }
0x1745   :  { %v965_v44 = vpop.permute.xlu2 %964 }
0x1746   :  { %2914 = vst.msk [vmem:[%s4276_s2 + $0xc8] sm:$0x1] %vm15_vm2, %v965_v44  ;;  %2753 = vperm.xlu2 %3080, %v2740_v24  }
0x174d   :  { %v971_v53 = vpop.permute.xlu2 %970 }
0x174e   :  { %2915 = vst.msk [vmem:[%s4276_s2 + $0x90] sm:$0xf] %vm271_vm12, %v971_v53  ;;  %1197 = vrot.lane.b32.xlu2 %v3654_v32, %s3189_s29 }
0x174f   :  { %3081 = vset.pattern.permute.xlu2 %v3186_v33 }
0x1756   :  { %1432 = vrot.lane.b32.xlu2 %v3664_v60, %s3189_s29 }
0x175e   :  { %1667 = vrot.lane.b32.xlu2 %v3789_v51, %s3189_s29 }
0x1764   :  { %v2513_v36 = vpop.permute.xlu2 %2512 }
0x1765   :  { %v2515_v61 = vmul.f32 %v2513_v36, %v2505_v30 }
0x1766   :  { %1902 = vrot.lane.b32.xlu2 %v3794_v52, %s3189_s29 }
0x1767   :  { %v2521_v62 = vperm.slane %v2515_v61, 1 }
0x176c   :  { %v2519_v20 = vpop.permute.xlu2 %2518 }
0x176d   :  { %v2522_v11 = vmul.f32 %v2521_v62, %v2519_v20 }
0x176f   :  { %v2523_v41 = vsub.f32 %v2505_v30, %v2522_v11 }
0x1771   :  { %v2524_v32 = vsel %vm158_vm7, %v2521_v62, %v2523_v41 }
0x1772   :  { %2537 = vperm.xlu1 %3083, %v2524_v32   ;;  %3175 = vrcp.f32 %v2524_v32 }
0x1778   :  { %v3176_v33 = vpop.eup %3175 }
0x1779   :  { %v2526_v63 = vmul.f32 %v3176_v33, %v2524_v32 }
0x177a   :  { %2137 = vrot.lane.b32.xlu1 %v3972_v57, %s3189_s29 }
0x177b   :  { %v2527_v60 = vsub.f32 2.0, %v2526_v63  ;;  %3084 = vset.pattern.permute.xlu1 %v3187_v45 }
0x177d   :  { %v2528_v51 = vmul.f32 %v3176_v33, %v2527_v60 }
0x177f   :  { %2531 = vperm.xlu2 %3081, %v2528_v51  }
0x1782   :  { %2372 = vrot.lane.b32.xlu1 %v3982_v3, %s3189_s29 }
0x1798   :  { %v2748_v52 = vpop.permute.xlu2 %2747 }
0x1799   :  { %v2750_v27 = vmul.f32 %v2748_v52, %v2740_v24 }
0x179b   :  { %v2756_v21 = vperm.slane %v2750_v27, 1 }
0x17a0   :  { %v2754_v13 = vpop.permute.xlu2 %2753 }
0x17a1   :  { %v2757_v7 = vmul.f32 %v2756_v21, %v2754_v13 }
0x17a3   :  { %v2758_v2 = vsub.f32 %v2740_v24, %v2757_v7 }
0x17a5   :  { %v2759_v26 = vsel %vm158_vm7, %v2756_v21, %v2758_v2 }
0x17a6   :  { %2772 = vperm.xlu2 %3081, %v2759_v26   ;;  %3177 = vrcp.f32 %v2759_v26 }
0x17a8   :  { %v1198_v57 = vpop.permute.xlu2 %1197 }
0x17a9   :  { %1203 = vst.msk [vmem:[%s4276_s2 + $0x18] sm:$0xff] %vm13_vm1, %v1198_v57 }
0x17aa   :  { %1208 = vst.msk [vmem:[%s4276_s2 + $0x18] sm:$0xf] %vm271_vm12, %v1206_v1 }
0x17ac   :  { %v3178_v3 = vpop.eup %3177 }
0x17ad   :  { %v2761_v18 = vmul.f32 %v3178_v3, %v2759_v26 }
0x17ae   :  { %2139 = vrot.lane.b32.xlu2 %v3977_v14, %s3189_s29  ;;  %v1676_v14 = vpop.permute.xlu1 %1675 }
0x17af   :  { %v2762_v49 = vsub.f32 2.0, %v2761_v18  ;;  %3085 = vset.pattern.permute.xlu2 %v3187_v45 }
0x17b0   :  { %v1433_v29 = vpop.permute.xlu2 %1432 }
0x17b1   :  { %2944 = vst.msk [vmem:[%s4276_s2 + $0x88] sm:$0xff] %vm13_vm1, %v1433_v29  ;;  %v2763_v30 = vmul.f32 %v3178_v3, %v2762_v49 }
0x17b2   :  { %2946 = vst.msk [vmem:[%s4276_s2 + $0x88] sm:$0xf] %vm271_vm12, %v1441_v28 }
0x17b3   :  { %2766 = vperm.xlu0 %3082, %v2763_v30  }
0x17b6   :  { %2374 = vrot.lane.b32.xlu2 %v3987_v5, %s3189_s29  ;;  %v1911_v5 = vpop.permute.xlu1 %1910 }
0x17b8   :  { %v1668_v54 = vpop.permute.xlu2 %1667 }
0x17b9   :  { %1673 = vst.msk [vmem:[%s4276_s2 + $0x10] sm:$0xff] %vm13_vm1, %v1668_v54 }
0x17ba   :  { %1678 = vst.msk [vmem:[%s4276_s2 + $0x10] sm:$0xf] %vm271_vm12, %v1676_v14 }
0x17bb   :  { %2145 = vrot.lane.b32.xlu0 %v2095_v12, %s3190_s9 }
0x17bc   :  { %3086 = vset.pattern.permute.xlu0 %v3187_v45 }
0x17c0   :  { %v1903_v31 = vpop.permute.xlu2 %1902 }
0x17c1   :  { %2975 = vst.msk [vmem:[%s4276_s2 + $0x80] sm:$0xff] %vm13_vm1, %v1903_v31 }
0x17c2   :  { %2977 = vst.msk [vmem:[%s4276_s2 + $0x80] sm:$0xf] %vm271_vm12, %v1911_v5 }
0x17c3   :  { %2380 = vrot.lane.b32.xlu0 %v2330_v47, %s3190_s9 }
0x17cb   :  { %2565 = vrot.lane.b32.xlu0 %v4020_v6, %s3188_s5 }
0x17d9   :  { %v2532_v45 = vpop.permute.xlu2 %2531 }
0x17da   :  { %v2534_v15 = vmul.f32 %v2532_v45, %v2524_v32 }
0x17dc   :  { %v2540_v12 = vperm.slane %v2534_v15, 2 }
0x17e4   :  { %v2538_v39 = vpop.permute.xlu1 %2537 }
0x17e5   :  { %v2541_v40 = vmul.f32 %v2540_v12, %v2538_v39 }
0x17e7   :  { %v2542_v56 = vsub.f32 %v2524_v32, %v2541_v40 }
0x17e9   :  { %v2543_v17 = vsel %vm180_vm8, %v2540_v12, %v2542_v56 }
0x17ea   :  { %2556 = vperm.xlu2 %3085, %v2543_v17   ;;  %3179 = vrcp.f32 %v2543_v17 }
0x17ec   :  { %v2138_v59 = vpop.permute.xlu1 %2137 }
0x17ed   :  { %2143 = vst.msk [vmem:[%s4276_s2 + $0x8] sm:$0xff] %vm13_vm1, %v2138_v59 }
0x17f0   :  { %v3180_v46 = vpop.eup %3179 }
0x17f1   :  { %v2545_v47 = vmul.f32 %v3180_v46, %v2543_v17 }
0x17f3   :  { %v2546_v58 = vsub.f32 2.0, %v2545_v47 }
0x17f4   :  { %v2373_v9 = vpop.permute.xlu1 %2372 }
0x17f5   :  { %3006 = vst.msk [vmem:[%s4276_s2 + $0x78] sm:$0xff] %vm13_vm1, %v2373_v9  ;;  %v2547_v19 = vmul.f32 %v3180_v46, %v2546_v58 }
0x17f7   :  { %2550 = vperm.xlu1 %3084, %v2547_v19  }
0x17ff   :  { %2567 = vrot.lane.b32.xlu1 %v4030_v55, %s3188_s5 }
0x1800   :  { %v2773_v16 = vpop.permute.xlu2 %2772 }
0x1808   :  { %v2140_v10 = vpop.permute.xlu2 %2139 }
0x1809   :  { %2144 = vst.msk [vmem:[%s4276_s2 + $0x40] sm:$0x1] %vm15_vm2, %v2140_v10 }
0x1810   :  { %v2375_v0 = vpop.permute.xlu2 %2374 }
0x1811   :  { %3007 = vst.msk [vmem:[%s4276_s2 + $0xb0] sm:$0x1] %vm15_vm2, %v2375_v0 }
0x1825   :  { %v2767_v50 = vpop.permute.xlu0 %2766 }
0x1826   :  { %v2769_v25 = vmul.f32 %v2767_v50, %v2759_v26 }
0x1828   :  { %v2775_v22 = vperm.slane %v2769_v25, 2 }
0x182a   :  { %v2776_v34 = vmul.f32 %v2775_v22, %v2773_v16 }
0x182c   :  { %v2777_v24 = vsub.f32 %v2759_v26, %v2776_v34 }
0x182d   :  { %v2146_v35 = vpop.permute.xlu0 %2145 }
0x182e   :  { %v2778_v37 = vsel %vm180_vm8, %v2775_v22, %v2777_v24  ;;  %2148 = vst.msk [vmem:[%s4276_s2 + $0x8] sm:$0xf] %vm271_vm12, %v2146_v35 }
0x182f   :  { %3181 = vrcp.f32 %v2778_v37  ;;  %2791 = vperm.xlu1 %3084, %v2778_v37  }
0x1835   :  { %v3182_v8 = vpop.eup %3181  ;;  %v2381_v38 = vpop.permute.xlu0 %2380 }
0x1836   :  { %3008 = vst.msk [vmem:[%s4276_s2 + $0x78] sm:$0xf] %vm271_vm12, %v2381_v38  ;;  %v2780_v42 = vmul.f32 %v3182_v8, %v2778_v37 }
0x1838   :  { %v2781_v43 = vsub.f32 2.0, %v2780_v42 }
0x183a   :  { %v2782_v44 = vmul.f32 %v3182_v8, %v2781_v43 }
0x183c   :  { %2785 = vperm.xlu0 %3086, %v2782_v44  }
0x183d   :  { %v2566_v33 = vpop.permute.xlu0 %2565 }
0x1844   :  { %v2557_v62 = vpop.permute.xlu2 %2556 }
0x1869   :  { %v2551_v53 = vpop.permute.xlu1 %2550 }
0x186a   :  { %v2553_v36 = vmul.f32 %v2551_v53, %v2543_v17 }
0x186c   :  { %v2559_v61 = vperm.slane %v2553_v36, 3 }
0x186e   :  { %v2560_v20 = vmul.f32 %v2559_v61, %v2557_v62 }
0x1870   :  { %v2561_v11 = vsub.f32 %v2543_v17, %v2560_v20 }
0x1871   :  { %v2568_v63 = vpop.permute.xlu1 %2567 }
0x1872   :  { %v2562_v41 = vsel %vm202_vm9, %v2559_v61, %v2561_v11 }
0x1873   :  { %v2563_v32 = vsub.f32 0.0, %v2562_v41 }
0x1875   :  { %3015 = vmatpush.msk.msra.mxu2 %vm225_vm10, %v2563_v32  ;;  %2613 = vrot.lane.b32.xlu0 %v2563_v32, %s3190_s9 }
0x1876   :  { %3016 = vmatmul.msk.f32.vlgmr.msra.gmra.mxu2 %vm220_vm11, %v2566_v33 }
0x187e   :  { %3017 = vmatmul.msk.f32.gmra.mxu2 %vm220_vm11, %v2568_v63 }
0x18a1   :  { %v2792_v27 = vpop.permute.xlu1 %2791 }
0x18ae   :  { %v2786_v60 = vpop.permute.xlu0 %2785 }
0x18af   :  { %v2788_v51 = vmul.f32 %v2786_v60, %v2778_v37 }
0x18b1   :  { %v2794_v52 = vperm.slane %v2788_v51, 3 }
0x18b3   :  { %v2795_v21 = vmul.f32 %v2794_v52, %v2792_v27 }
0x18b5   :  { %v2796_v13 = vsub.f32 %v2778_v37, %v2795_v21 }
0x18b7   :  { %v2797_v7 = vsel %vm202_vm9, %v2794_v52, %v2796_v13 }
0x18b8   :  { %v2798_v1 = vsub.f32 0.0, %v2797_v7 }
0x18ba   :  { %2848 = vrot.lane.b32.xlu0 %v2798_v1, %s3190_s9  ;;  %3028 = vmatpush.msk.msra.mxu3 %vm225_vm10, %v2798_v1 }
0x18e7   :  { %v2614_v28 = vpop.permute.xlu0 %2613 }
0x18f9   :  { %v2593_v2 = vpop.f32.mrf.mxu2 }
0x18fa   :  { %v2599_v26 = vadd.f32 %v2593_v2, %v4020_v6 }
0x18fc   :  { %2605 = vrot.lane.b32.xlu2 %v2599_v26, %s3189_s29 }
0x1901   :  { %v2596_v57 = vpop.f32.mrf.mxu2 }
0x1902   :  { %v2600_v3 = vadd.f32 %v2596_v57, %v4030_v55 }
0x1904   :  { %2800 = vrot.lane.b32.xlu2 %v4042_v48, %s3188_s5  ;;  %2607 = vrot.lane.b32.xlu1 %v2600_v3, %s3189_s29 }
0x190c   :  { %2802 = vrot.lane.b32.xlu2 %v4053_v4, %s3188_s5 }
0x192c   :  { %v2849_v5 = vpop.permute.xlu0 %2848 }
0x1956   :  { %v2606_v23 = vpop.permute.xlu2 %2605 }
0x1957   :  { %2611 = vst.msk [vmem:[%s4276_s2] sm:$0xff] %vm13_vm1, %v2606_v23 }
0x1958   :  { %2616 = vst.msk [vmem:[%s4276_s2] sm:$0xf] %vm271_vm12, %v2614_v28 }
0x195e   :  { %v2801_v6 = vpop.permute.xlu2 %2800 }
0x195f   :  { %3029 = vmatmul.msk.f32.vlgmr.msra.gmra.mxu3 %vm220_vm11, %v2801_v6 }
0x1966   :  { %v2803_v55 = vpop.permute.xlu2 %2802 }
0x1967   :  { %3030 = vmatmul.msk.f32.gmra.mxu3 %vm220_vm11, %v2803_v55 }
0x1976   :  { %v2608_v18 = vpop.permute.xlu1 %2607 }
0x1977   :  { %2612 = vst.msk [vmem:[%s4276_s2 + $0x38] sm:$0x1] %vm15_vm2, %v2608_v18 }
0x19e2   :  { %v2828_v49 = vpop.f32.mrf.mxu3 }
0x19e3   :  { %v2834_v29 = vadd.f32 %v2828_v49, %v4042_v48 }
0x19e5   :  { %2840 = vrot.lane.b32.xlu1 %v2834_v29, %s3189_s29 }
0x19ea   :  { %v2831_v30 = vpop.f32.mrf.mxu3 }
0x19eb   :  { %v2835_v14 = vadd.f32 %v2831_v30, %v4053_v4 }
0x19ed   :  { %2842 = vrot.lane.b32.xlu2 %v2835_v14, %s3189_s29 }
0x1a47   :  { %v2843_v54 = vpop.permute.xlu2 %2842 }
0x1a48   :  { %3034 = vst.msk [vmem:[%s4276_s2 + $0xa8] sm:$0x1] %vm15_vm2, %v2843_v54 }
0x1a57   :  { %v2841_v31 = vpop.permute.xlu1 %2840 }
0x1a58   :  { %3033 = vst.msk [vmem:[%s4276_s2 + $0x70] sm:$0xff] %vm13_vm1, %v2841_v31 }
0x1a59   :  { %3035 = vst.msk [vmem:[%s4276_s2 + $0x70] sm:$0xf] %vm271_vm12, %v2849_v5 }

</bundles_post_ra>
